<compile_context>
chip_gen: v5e
topology: v5e:2x2
jax: 0.10.0
libtpu: 0.0.40
codegen_flags: <defaults>
</compile_context>

<pallas_src>
import jax
import jax.numpy as jnp
from jax import lax
from jax.experimental import pallas as pl
from jax.experimental.pallas import tpu as pltpu


def _round_up(x, m):
    return (x + m - 1) // m * m


def sentiment_kernel(tokens_ref,   # SMEM (Bp, S) int32   -- scalar prefetch
                     emb_ref,      # VMEM (Vp, 1, Ep)     -- padded embedding table
                     wih_ref,      # VMEM (Ep, 4*Hp)      -- W_ih^T, gate-slot padded
                     whh_ref,      # VMEM (Hp, 4*Hp)      -- W_hh^T, gate-slot padded
                     b_ref,        # VMEM (1, 4*Hp)       -- b_ih + b_hh, padded
                     wfc_ref,      # VMEM (Hp, Op)        -- W_fc^T, padded
                     bfc_ref,      # VMEM (1, Op)         -- b_fc, pad lanes = -1e30
                     out_ref,      # VMEM (Bp, Op)        -- softmax probabilities
                     xg_ref):      # VMEM scratch (S*Bp, Ep) gathered embeddings
    Bp, S = tokens_ref.shape
    Hp = whh_ref.shape[0]

    # 1) Fused embedding gather: one dynamic leading-axis row read per (t, b)
    #    token, written time-major into a VMEM scratch (static row writes).
    for t in range(S):
        for b in range(Bp):
            tok = tokens_ref[b, t]                       # SMEM scalar read
            xg_ref[pl.ds(t * Bp + b, 1), :] = emb_ref[tok]   # (1, Ep)

    # 2) Hoisted input projection: ONE (S*Bp, Ep) x (Ep, 4Hp) MXU matmul + one
    #    bias broadcast, instead of S small matmuls + S broadcasts in the loop.
    gates_x = jnp.dot(xg_ref[...], wih_ref[...],
                      preferred_element_type=jnp.float32) + b_ref[...]   # (S*Bp, 4Hp)

    whh = whh_ref[...]

    # 3) Serial LSTM recurrence, fully unrolled (S small & static).
    #    Gate slices are 128-lane aligned because H is padded to Hp=128; padded
    #    gate lanes see gates==0 -> c_pad/h_pad stay exactly 0 every step.
    h = jnp.zeros((Bp, Hp), jnp.float32)
    c = jnp.zeros((Bp, Hp), jnp.float32)
    for t in range(S):
        gates = gates_x[t * Bp:(t + 1) * Bp, :] + jnp.dot(
            h, whh, preferred_element_type=jnp.float32)       # (Bp, 4Hp)
        i_g = jax.nn.sigmoid(gates[:, 0 * Hp:1 * Hp])          # PyTorch order i,f,g,o
        f_g = jax.nn.sigmoid(gates[:, 1 * Hp:2 * Hp])
        g_g = jnp.tanh(gates[:, 2 * Hp:3 * Hp])
        o_g = jax.nn.sigmoid(gates[:, 3 * Hp:4 * Hp])
        c = f_g * c + i_g * g_g
        h = o_g * jnp.tanh(c)

    # 4) fc + softmax on a lane-dense (Bp, 128) block. Padded logit lanes carry a
    #    -1e30 bias so exp() underflows to exactly 0 and they never contribute.
    logits = jnp.dot(h, wfc_ref[...],
                     preferred_element_type=jnp.float32) + bfc_ref[...]   # (Bp, Op)
    m = jnp.max(logits, axis=1, keepdims=True)
    e = jnp.exp(logits - m)
    denom = jnp.sum(e, axis=1, keepdims=True)
    # pl.reciprocal(denom, approx=True) would move this onto the EUP slot; kept
    # exact so the result matches the f32 reference to ~1e-5.
    out_ref[...] = e * pl.reciprocal(denom, approx=False)


def init_params(key, vocab_size, embedding_dim=50, hidden_dim=64, output_dim=3):
    ks = jax.random.split(key, 7)
    s = 1.0 / jnp.sqrt(hidden_dim)
    return {
        "embedding": jax.random.normal(ks[0], (vocab_size, embedding_dim), jnp.float32),
        # PyTorch LSTM param shapes: w_ih (4H, E), w_hh (4H, H), b_ih (4H,), b_hh (4H,)
        "w_ih": jax.random.uniform(ks[1], (4 * hidden_dim, embedding_dim), jnp.float32, -s, s),
        "w_hh": jax.random.uniform(ks[2], (4 * hidden_dim, hidden_dim), jnp.float32, -s, s),
        "b_ih": jax.random.uniform(ks[3], (4 * hidden_dim,), jnp.float32, -s, s),
        "b_hh": jax.random.uniform(ks[4], (4 * hidden_dim,), jnp.float32, -s, s),
        # fc: (O, H) weight, (O,) bias
        "w_fc": jax.random.uniform(ks[5], (output_dim, hidden_dim), jnp.float32, -s, s),
        "b_fc": jax.random.uniform(ks[6], (output_dim,), jnp.float32, -s, s),
    }


def sentiment_forward(tokens, params):
    V, E = params["embedding"].shape
    H = params["w_hh"].shape[1]
    O = params["w_fc"].shape[0]
    B, S = tokens.shape

    # Padded tile sizes (lane = 128, sublane = 8).
    Bp = max(_round_up(B, 8), 8)      # batch -> full sublanes
    Ep = _round_up(E, 128)            # embedding dim -> lane-dense gather rows
    Hp = _round_up(H, 128)            # hidden dim -> 128-lane-aligned gate slices
    Op = _round_up(O, 128)            # output dim -> lane-dense store
    Vp = _round_up(V, 8)

    f32 = jnp.float32

    # --- parameter prep / padding (layout plumbing only; zero-padded so padded
    #     lanes/rows contribute exactly nothing) ---
    emb_p = jnp.zeros((Vp, Ep), f32).at[:V, :E].set(params["embedding"].astype(f32))
    emb_p = emb_p.reshape(Vp, 1, Ep)   # 3-D so the kernel can gather rows via emb_ref[tok]

    wih_t = params["w_ih"].T.astype(f32)            # (E, 4H), gate order i,f,g,o
    whh_t = params["w_hh"].T.astype(f32)            # (H, 4H)
    bias = (params["b_ih"] + params["b_hh"]).astype(f32)   # (4H,)

    wih_p = jnp.zeros((Ep, 4 * Hp), f32)
    whh_p = jnp.zeros((Hp, 4 * Hp), f32)
    b_p = jnp.zeros((1, 4 * Hp), f32)
    for g in range(4):   # scatter each gate into its own 128-lane-aligned slot
        wih_p = wih_p.at[:E, g * Hp:g * Hp + H].set(wih_t[:, g * H:(g + 1) * H])
        whh_p = whh_p.at[:H, g * Hp:g * Hp + H].set(whh_t[:, g * H:(g + 1) * H])
        b_p = b_p.at[0, g * Hp:g * Hp + H].set(bias[g * H:(g + 1) * H])

    wfc_p = jnp.zeros((Hp, Op), f32).at[:H, :O].set(params["w_fc"].T.astype(f32))
    bfc_p = jnp.full((1, Op), -1e30, f32).at[0, :O].set(params["b_fc"].astype(f32))

    tokens_p = jnp.zeros((Bp, S), jnp.int32).at[:B, :].set(tokens.astype(jnp.int32))

    out_p = pl.pallas_call(
        sentiment_kernel,
        out_shape=jax.ShapeDtypeStruct((Bp, Op), f32),
        grid_spec=pltpu.PrefetchScalarGridSpec(
            num_scalar_prefetch=1,          # tokens -> SMEM
            grid=(1,),
            in_specs=[
                pl.BlockSpec((Vp, 1, Ep), lambda i, tok: (0, 0, 0)),
                pl.BlockSpec((Ep, 4 * Hp), lambda i, tok: (0, 0)),
                pl.BlockSpec((Hp, 4 * Hp), lambda i, tok: (0, 0)),
                pl.BlockSpec((1, 4 * Hp), lambda i, tok: (0, 0)),
                pl.BlockSpec((Hp, Op), lambda i, tok: (0, 0)),
                pl.BlockSpec((1, Op), lambda i, tok: (0, 0)),
            ],
            out_specs=pl.BlockSpec((Bp, Op), lambda i, tok: (0, 0)),
            scratch_shapes=[pltpu.VMEM((S * Bp, Ep), f32)],
        ),
        compiler_params=pltpu.CompilerParams(dimension_semantics=("arbitrary",)),
    )(tokens_p, emb_p, wih_p, whh_p, b_p, wfc_p, bfc_p)

    return out_p[:B, :O]


def reference_forward(tokens, params):
    """Pure-JAX reference mirroring PyTorch semantics, for sanity checking."""
    emb = jnp.take(params["embedding"], tokens, axis=0)  # (B, S, E)
    B, S, E = emb.shape
    H = params["w_hh"].shape[1]

    def step(carry, x_t):
        h, c = carry
        gates = x_t @ params["w_ih"].T + params["b_ih"] + h @ params["w_hh"].T + params["b_hh"]
        i = jax.nn.sigmoid(gates[:, 0:H])
        f = jax.nn.sigmoid(gates[:, H:2 * H])
        g = jnp.tanh(gates[:, 2 * H:3 * H])
        o = jax.nn.sigmoid(gates[:, 3 * H:4 * H])
        c = f * c + i * g
        h = o * jnp.tanh(c)
        return (h, c), None

    h0 = jnp.zeros((B, H), jnp.float32)
    c0 = jnp.zeros((B, H), jnp.float32)
    (h_last, _), _ = lax.scan(step, (h0, c0), jnp.transpose(emb, (1, 0, 2)))
    logits = h_last @ params["w_fc"].T + params["b_fc"]
    return jax.nn.softmax(logits, axis=1)


if __name__ == "__main__":
    key = jax.random.PRNGKey(0)
    k_tok, k_param = jax.random.split(key)

    VOCAB, E, H, O = 100, 50, 64, 3
    B, S = 2, 8

    params = init_params(k_param, VOCAB, E, H, O)
    tokens = jax.random.randint(k_tok, (B, S), 0, VOCAB, dtype=jnp.int32)

    fwd = jax.jit(sentiment_forward)
    probs = jax.block_until_ready(fwd(tokens, params))

    ref = jax.block_until_ready(reference_forward(tokens, params))
    assert probs.shape == (B, O)
    assert jnp.allclose(jnp.sum(probs, axis=1), 1.0, atol=1e-4)
    assert jnp.allclose(probs, ref, atol=1e-4, rtol=1e-4)

    print("KERNEL_OK")
</pallas_src>

<mosaic_0001>
module attributes {stable_mosaic.version = 11 : i64} {
  func.func @sentiment_kernel(%arg0: i32, %arg1: memref<8x8xi32, #tpu.memory_space<smem>>, %arg2: memref<104x1x128xf32, #tpu.memory_space<vmem>>, %arg3: memref<128x512xf32, #tpu.memory_space<vmem>>, %arg4: memref<128x512xf32, #tpu.memory_space<vmem>>, %arg5: memref<1x512xf32, #tpu.memory_space<vmem>>, %arg6: memref<128x128xf32, #tpu.memory_space<vmem>>, %arg7: memref<1x128xf32, #tpu.memory_space<vmem>>, %arg8: memref<8x128xf32, #tpu.memory_space<vmem>>, %arg9: memref<64x128xf32, #tpu.memory_space<vmem>>) attributes {dimension_semantics = [#tpu.dimension_semantics<arbitrary>], iteration_bounds = array<i64: 1>, scalar_prefetch = 1 : i64, scratch_operands = 1 : i64, tpu.core_type = #tpu.core_type<tc>, window_params = [{pipeline_mode = #tpu.pipeline_mode<synchronous>, transform_indices = @transform_0, window_bounds = array<i64: 104, 1, 128>}, {pipeline_mode = #tpu.pipeline_mode<synchronous>, transform_indices = @transform_1, window_bounds = array<i64: 128, 512>}, {pipeline_mode = #tpu.pipeline_mode<synchronous>, transform_indices = @transform_2, window_bounds = array<i64: 128, 512>}, {pipeline_mode = #tpu.pipeline_mode<synchronous>, transform_indices = @transform_3, window_bounds = array<i64: 1, 512>}, {pipeline_mode = #tpu.pipeline_mode<synchronous>, transform_indices = @transform_4, window_bounds = array<i64: 128, 128>}, {pipeline_mode = #tpu.pipeline_mode<synchronous>, transform_indices = @transform_5, window_bounds = array<i64: 1, 128>}, {pipeline_mode = #tpu.pipeline_mode<synchronous>, transform_indices = @transform_6, window_bounds = array<i64: 8, 128>}]} {
    %c0 = arith.constant 0 : index
    %c0_0 = arith.constant 0 : index
    %0 = memref.load %arg1[%c0, %c0_0] : memref<8x8xi32, #tpu.memory_space<smem>>
    %1 = arith.index_cast %0 : i32 to index
    %c0_1 = arith.constant 0 : index
    %c0_2 = arith.constant 0 : index
    %2 = vector.load %arg2[%1, %c0_1, %c0_2] : memref<104x1x128xf32, #tpu.memory_space<vmem>>, vector<1x1x128xf32>
    %3 = vector.shape_cast %2 : vector<1x1x128xf32> to vector<1x128xf32>
    %c0_3 = arith.constant 0 : index
    %c0_4 = arith.constant 0 : index
    %4 = vector.load %arg9[%c0_3, %c0_4] : memref<64x128xf32, #tpu.memory_space<vmem>>, vector<1x128xf32>
    tpu.vector_store %arg9[%c0_3, %c0_4], %3 {strides = array<i32>} : memref<64x128xf32, #tpu.memory_space<vmem>>, vector<1x128xf32>,
    %c1 = arith.constant 1 : index
    %c0_5 = arith.constant 0 : index
    %5 = memref.load %arg1[%c1, %c0_5] : memref<8x8xi32, #tpu.memory_space<smem>>
    %6 = arith.index_cast %5 : i32 to index
    %c0_6 = arith.constant 0 : index
    %c0_7 = arith.constant 0 : index
    %7 = vector.load %arg2[%6, %c0_6, %c0_7] : memref<104x1x128xf32, #tpu.memory_space<vmem>>, vector<1x1x128xf32>
    %8 = vector.shape_cast %7 : vector<1x1x128xf32> to vector<1x128xf32>
    %c1_8 = arith.constant 1 : index
    %c0_9 = arith.constant 0 : index
    %9 = vector.load %arg9[%c1_8, %c0_9] : memref<64x128xf32, #tpu.memory_space<vmem>>, vector<1x128xf32>
    tpu.vector_store %arg9[%c1_8, %c0_9], %8 {strides = array<i32>} : memref<64x128xf32, #tpu.memory_space<vmem>>, vector<1x128xf32>,
    %c2 = arith.constant 2 : index
    %c0_10 = arith.constant 0 : index
    %10 = memref.load %arg1[%c2, %c0_10] : memref<8x8xi32, #tpu.memory_space<smem>>
    %11 = arith.index_cast %10 : i32 to index
    %c0_11 = arith.constant 0 : index
    %c0_12 = arith.constant 0 : index
    %12 = vector.load %arg2[%11, %c0_11, %c0_12] : memref<104x1x128xf32, #tpu.memory_space<vmem>>, vector<1x1x128xf32>
    %13 = vector.shape_cast %12 : vector<1x1x128xf32> to vector<1x128xf32>
    %c2_13 = arith.constant 2 : index
    %c0_14 = arith.constant 0 : index
    %14 = vector.load %arg9[%c2_13, %c0_14] : memref<64x128xf32, #tpu.memory_space<vmem>>, vector<1x128xf32>
    tpu.vector_store %arg9[%c2_13, %c0_14], %13 {strides = array<i32>} : memref<64x128xf32, #tpu.memory_space<vmem>>, vector<1x128xf32>,
    %c3 = arith.constant 3 : index
    %c0_15 = arith.constant 0 : index
    %15 = memref.load %arg1[%c3, %c0_15] : memref<8x8xi32, #tpu.memory_space<smem>>
    %16 = arith.index_cast %15 : i32 to index
    %c0_16 = arith.constant 0 : index
    %c0_17 = arith.constant 0 : index
    %17 = vector.load %arg2[%16, %c0_16, %c0_17] : memref<104x1x128xf32, #tpu.memory_space<vmem>>, vector<1x1x128xf32>
    %18 = vector.shape_cast %17 : vector<1x1x128xf32> to vector<1x128xf32>
    %c3_18 = arith.constant 3 : index
    %c0_19 = arith.constant 0 : index
    %19 = vector.load %arg9[%c3_18, %c0_19] : memref<64x128xf32, #tpu.memory_space<vmem>>, vector<1x128xf32>
    tpu.vector_store %arg9[%c3_18, %c0_19], %18 {strides = array<i32>} : memref<64x128xf32, #tpu.memory_space<vmem>>, vector<1x128xf32>,
    %c4 = arith.constant 4 : index
    %c0_20 = arith.constant 0 : index
    %20 = memref.load %arg1[%c4, %c0_20] : memref<8x8xi32, #tpu.memory_space<smem>>
    %21 = arith.index_cast %20 : i32 to index
    %c0_21 = arith.constant 0 : index
    %c0_22 = arith.constant 0 : index
    %22 = vector.load %arg2[%21, %c0_21, %c0_22] : memref<104x1x128xf32, #tpu.memory_space<vmem>>, vector<1x1x128xf32>
    %23 = vector.shape_cast %22 : vector<1x1x128xf32> to vector<1x128xf32>
    %c4_23 = arith.constant 4 : index
    %c0_24 = arith.constant 0 : index
    %24 = vector.load %arg9[%c4_23, %c0_24] : memref<64x128xf32, #tpu.memory_space<vmem>>, vector<1x128xf32>
    tpu.vector_store %arg9[%c4_23, %c0_24], %23 {strides = array<i32>} : memref<64x128xf32, #tpu.memory_space<vmem>>, vector<1x128xf32>,
    %c5 = arith.constant 5 : index
    %c0_25 = arith.constant 0 : index
    %25 = memref.load %arg1[%c5, %c0_25] : memref<8x8xi32, #tpu.memory_space<smem>>
    %26 = arith.index_cast %25 : i32 to index
    %c0_26 = arith.constant 0 : index
    %c0_27 = arith.constant 0 : index
    %27 = vector.load %arg2[%26, %c0_26, %c0_27] : memref<104x1x128xf32, #tpu.memory_space<vmem>>, vector<1x1x128xf32>
    %28 = vector.shape_cast %27 : vector<1x1x128xf32> to vector<1x128xf32>
    %c5_28 = arith.constant 5 : index
    %c0_29 = arith.constant 0 : index
    %29 = vector.load %arg9[%c5_28, %c0_29] : memref<64x128xf32, #tpu.memory_space<vmem>>, vector<1x128xf32>
    tpu.vector_store %arg9[%c5_28, %c0_29], %28 {strides = array<i32>} : memref<64x128xf32, #tpu.memory_space<vmem>>, vector<1x128xf32>,
    %c6 = arith.constant 6 : index
    %c0_30 = arith.constant 0 : index
    %30 = memref.load %arg1[%c6, %c0_30] : memref<8x8xi32, #tpu.memory_space<smem>>
    %31 = arith.index_cast %30 : i32 to index
    %c0_31 = arith.constant 0 : index
    %c0_32 = arith.constant 0 : index
    %32 = vector.load %arg2[%31, %c0_31, %c0_32] : memref<104x1x128xf32, #tpu.memory_space<vmem>>, vector<1x1x128xf32>
    %33 = vector.shape_cast %32 : vector<1x1x128xf32> to vector<1x128xf32>
    %c6_33 = arith.constant 6 : index
    %c0_34 = arith.constant 0 : index
    %34 = vector.load %arg9[%c6_33, %c0_34] : memref<64x128xf32, #tpu.memory_space<vmem>>, vector<1x128xf32>
    tpu.vector_store %arg9[%c6_33, %c0_34], %33 {strides = array<i32>} : memref<64x128xf32, #tpu.memory_space<vmem>>, vector<1x128xf32>,
    %c7 = arith.constant 7 : index
    %c0_35 = arith.constant 0 : index
    %35 = memref.load %arg1[%c7, %c0_35] : memref<8x8xi32, #tpu.memory_space<smem>>
    %36 = arith.index_cast %35 : i32 to index
    %c0_36 = arith.constant 0 : index
    %c0_37 = arith.constant 0 : index
    %37 = vector.load %arg2[%36, %c0_36, %c0_37] : memref<104x1x128xf32, #tpu.memory_space<vmem>>, vector<1x1x128xf32>
    %38 = vector.shape_cast %37 : vector<1x1x128xf32> to vector<1x128xf32>
    %c7_38 = arith.constant 7 : index
    %c0_39 = arith.constant 0 : index
    %39 = vector.load %arg9[%c7_38, %c0_39] : memref<64x128xf32, #tpu.memory_space<vmem>>, vector<1x128xf32>
    tpu.vector_store %arg9[%c7_38, %c0_39], %38 {strides = array<i32>} : memref<64x128xf32, #tpu.memory_space<vmem>>, vector<1x128xf32>,
    %c0_40 = arith.constant 0 : index
    %c1_41 = arith.constant 1 : index
    %40 = memref.load %arg1[%c0_40, %c1_41] : memref<8x8xi32, #tpu.memory_space<smem>>
    %41 = arith.index_cast %40 : i32 to index
    %c0_42 = arith.constant 0 : index
    %c0_43 = arith.constant 0 : index
    %42 = vector.load %arg2[%41, %c0_42, %c0_43] : memref<104x1x128xf32, #tpu.memory_space<vmem>>, vector<1x1x128xf32>
    %43 = vector.shape_cast %42 : vector<1x1x128xf32> to vector<1x128xf32>
    %c8 = arith.constant 8 : index
    %c0_44 = arith.constant 0 : index
    %44 = vector.load %arg9[%c8, %c0_44] : memref<64x128xf32, #tpu.memory_space<vmem>>, vector<1x128xf32>
    tpu.vector_store %arg9[%c8, %c0_44], %43 {strides = array<i32>} : memref<64x128xf32, #tpu.memory_space<vmem>>, vector<1x128xf32>,
    %c1_45 = arith.constant 1 : index
    %c1_46 = arith.constant 1 : index
    %45 = memref.load %arg1[%c1_45, %c1_46] : memref<8x8xi32, #tpu.memory_space<smem>>
    %46 = arith.index_cast %45 : i32 to index
    %c0_47 = arith.constant 0 : index
    %c0_48 = arith.constant 0 : index
    %47 = vector.load %arg2[%46, %c0_47, %c0_48] : memref<104x1x128xf32, #tpu.memory_space<vmem>>, vector<1x1x128xf32>
    %48 = vector.shape_cast %47 : vector<1x1x128xf32> to vector<1x128xf32>
    %c9 = arith.constant 9 : index
    %c0_49 = arith.constant 0 : index
    %49 = vector.load %arg9[%c9, %c0_49] : memref<64x128xf32, #tpu.memory_space<vmem>>, vector<1x128xf32>
    tpu.vector_store %arg9[%c9, %c0_49], %48 {strides = array<i32>} : memref<64x128xf32, #tpu.memory_space<vmem>>, vector<1x128xf32>,
    %c2_50 = arith.constant 2 : index
    %c1_51 = arith.constant 1 : index
    %50 = memref.load %arg1[%c2_50, %c1_51] : memref<8x8xi32, #tpu.memory_space<smem>>
    %51 = arith.index_cast %50 : i32 to index
    %c0_52 = arith.constant 0 : index
    %c0_53 = arith.constant 0 : index
    %52 = vector.load %arg2[%51, %c0_52, %c0_53] : memref<104x1x128xf32, #tpu.memory_space<vmem>>, vector<1x1x128xf32>
    %53 = vector.shape_cast %52 : vector<1x1x128xf32> to vector<1x128xf32>
    %c10 = arith.constant 10 : index
    %c0_54 = arith.constant 0 : index
    %54 = vector.load %arg9[%c10, %c0_54] : memref<64x128xf32, #tpu.memory_space<vmem>>, vector<1x128xf32>
    tpu.vector_store %arg9[%c10, %c0_54], %53 {strides = array<i32>} : memref<64x128xf32, #tpu.memory_space<vmem>>, vector<1x128xf32>,
    %c3_55 = arith.constant 3 : index
    %c1_56 = arith.constant 1 : index
    %55 = memref.load %arg1[%c3_55, %c1_56] : memref<8x8xi32, #tpu.memory_space<smem>>
    %56 = arith.index_cast %55 : i32 to index
    %c0_57 = arith.constant 0 : index
    %c0_58 = arith.constant 0 : index
    %57 = vector.load %arg2[%56, %c0_57, %c0_58] : memref<104x1x128xf32, #tpu.memory_space<vmem>>, vector<1x1x128xf32>
    %58 = vector.shape_cast %57 : vector<1x1x128xf32> to vector<1x128xf32>
    %c11 = arith.constant 11 : index
    %c0_59 = arith.constant 0 : index
    %59 = vector.load %arg9[%c11, %c0_59] : memref<64x128xf32, #tpu.memory_space<vmem>>, vector<1x128xf32>
    tpu.vector_store %arg9[%c11, %c0_59], %58 {strides = array<i32>} : memref<64x128xf32, #tpu.memory_space<vmem>>, vector<1x128xf32>,
    %c4_60 = arith.constant 4 : index
    %c1_61 = arith.constant 1 : index
    %60 = memref.load %arg1[%c4_60, %c1_61] : memref<8x8xi32, #tpu.memory_space<smem>>
    %61 = arith.index_cast %60 : i32 to index
    %c0_62 = arith.constant 0 : index
    %c0_63 = arith.constant 0 : index
    %62 = vector.load %arg2[%61, %c0_62, %c0_63] : memref<104x1x128xf32, #tpu.memory_space<vmem>>, vector<1x1x128xf32>
    %63 = vector.shape_cast %62 : vector<1x1x128xf32> to vector<1x128xf32>
    %c12 = arith.constant 12 : index
    %c0_64 = arith.constant 0 : index
    %64 = vector.load %arg9[%c12, %c0_64] : memref<64x128xf32, #tpu.memory_space<vmem>>, vector<1x128xf32>
    tpu.vector_store %arg9[%c12, %c0_64], %63 {strides = array<i32>} : memref<64x128xf32, #tpu.memory_space<vmem>>, vector<1x128xf32>,
    %c5_65 = arith.constant 5 : index
    %c1_66 = arith.constant 1 : index
    %65 = memref.load %arg1[%c5_65, %c1_66] : memref<8x8xi32, #tpu.memory_space<smem>>
    %66 = arith.index_cast %65 : i32 to index
    %c0_67 = arith.constant 0 : index
    %c0_68 = arith.constant 0 : index
    %67 = vector.load %arg2[%66, %c0_67, %c0_68] : memref<104x1x128xf32, #tpu.memory_space<vmem>>, vector<1x1x128xf32>
    %68 = vector.shape_cast %67 : vector<1x1x128xf32> to vector<1x128xf32>
    %c13 = arith.constant 13 : index
    %c0_69 = arith.constant 0 : index
    %69 = vector.load %arg9[%c13, %c0_69] : memref<64x128xf32, #tpu.memory_space<vmem>>, vector<1x128xf32>
    tpu.vector_store %arg9[%c13, %c0_69], %68 {strides = array<i32>} : memref<64x128xf32, #tpu.memory_space<vmem>>, vector<1x128xf32>,
    %c6_70 = arith.constant 6 : index
    %c1_71 = arith.constant 1 : index
    %70 = memref.load %arg1[%c6_70, %c1_71] : memref<8x8xi32, #tpu.memory_space<smem>>
    %71 = arith.index_cast %70 : i32 to index
    %c0_72 = arith.constant 0 : index
    %c0_73 = arith.constant 0 : index
    %72 = vector.load %arg2[%71, %c0_72, %c0_73] : memref<104x1x128xf32, #tpu.memory_space<vmem>>, vector<1x1x128xf32>
    %73 = vector.shape_cast %72 : vector<1x1x128xf32> to vector<1x128xf32>
    %c14 = arith.constant 14 : index
    %c0_74 = arith.constant 0 : index
    %74 = vector.load %arg9[%c14, %c0_74] : memref<64x128xf32, #tpu.memory_space<vmem>>, vector<1x128xf32>
    tpu.vector_store %arg9[%c14, %c0_74], %73 {strides = array<i32>} : memref<64x128xf32, #tpu.memory_space<vmem>>, vector<1x128xf32>,
    %c7_75 = arith.constant 7 : index
    %c1_76 = arith.constant 1 : index
    %75 = memref.load %arg1[%c7_75, %c1_76] : memref<8x8xi32, #tpu.memory_space<smem>>
    %76 = arith.index_cast %75 : i32 to index
    %c0_77 = arith.constant 0 : index
    %c0_78 = arith.constant 0 : index
    %77 = vector.load %arg2[%76, %c0_77, %c0_78] : memref<104x1x128xf32, #tpu.memory_space<vmem>>, vector<1x1x128xf32>
    %78 = vector.shape_cast %77 : vector<1x1x128xf32> to vector<1x128xf32>
    %c15 = arith.constant 15 : index
    %c0_79 = arith.constant 0 : index
    %79 = vector.load %arg9[%c15, %c0_79] : memref<64x128xf32, #tpu.memory_space<vmem>>, vector<1x128xf32>
    tpu.vector_store %arg9[%c15, %c0_79], %78 {strides = array<i32>} : memref<64x128xf32, #tpu.memory_space<vmem>>, vector<1x128xf32>,
    %c0_80 = arith.constant 0 : index
    %c2_81 = arith.constant 2 : index
    %80 = memref.load %arg1[%c0_80, %c2_81] : memref<8x8xi32, #tpu.memory_space<smem>>
    %81 = arith.index_cast %80 : i32 to index
    %c0_82 = arith.constant 0 : index
    %c0_83 = arith.constant 0 : index
    %82 = vector.load %arg2[%81, %c0_82, %c0_83] : memref<104x1x128xf32, #tpu.memory_space<vmem>>, vector<1x1x128xf32>
    %83 = vector.shape_cast %82 : vector<1x1x128xf32> to vector<1x128xf32>
    %c16 = arith.constant 16 : index
    %c0_84 = arith.constant 0 : index
    %84 = vector.load %arg9[%c16, %c0_84] : memref<64x128xf32, #tpu.memory_space<vmem>>, vector<1x128xf32>
    tpu.vector_store %arg9[%c16, %c0_84], %83 {strides = array<i32>} : memref<64x128xf32, #tpu.memory_space<vmem>>, vector<1x128xf32>,
    %c1_85 = arith.constant 1 : index
    %c2_86 = arith.constant 2 : index
    %85 = memref.load %arg1[%c1_85, %c2_86] : memref<8x8xi32, #tpu.memory_space<smem>>
    %86 = arith.index_cast %85 : i32 to index
    %c0_87 = arith.constant 0 : index
    %c0_88 = arith.constant 0 : index
    %87 = vector.load %arg2[%86, %c0_87, %c0_88] : memref<104x1x128xf32, #tpu.memory_space<vmem>>, vector<1x1x128xf32>
    %88 = vector.shape_cast %87 : vector<1x1x128xf32> to vector<1x128xf32>
    %c17 = arith.constant 17 : index
    %c0_89 = arith.constant 0 : index
    %89 = vector.load %arg9[%c17, %c0_89] : memref<64x128xf32, #tpu.memory_space<vmem>>, vector<1x128xf32>
    tpu.vector_store %arg9[%c17, %c0_89], %88 {strides = array<i32>} : memref<64x128xf32, #tpu.memory_space<vmem>>, vector<1x128xf32>,
    %c2_90 = arith.constant 2 : index
    %c2_91 = arith.constant 2 : index
    %90 = memref.load %arg1[%c2_90, %c2_91] : memref<8x8xi32, #tpu.memory_space<smem>>
    %91 = arith.index_cast %90 : i32 to index
    %c0_92 = arith.constant 0 : index
    %c0_93 = arith.constant 0 : index
    %92 = vector.load %arg2[%91, %c0_92, %c0_93] : memref<104x1x128xf32, #tpu.memory_space<vmem>>, vector<1x1x128xf32>
    %93 = vector.shape_cast %92 : vector<1x1x128xf32> to vector<1x128xf32>
    %c18 = arith.constant 18 : index
    %c0_94 = arith.constant 0 : index
    %94 = vector.load %arg9[%c18, %c0_94] : memref<64x128xf32, #tpu.memory_space<vmem>>, vector<1x128xf32>
    tpu.vector_store %arg9[%c18, %c0_94], %93 {strides = array<i32>} : memref<64x128xf32, #tpu.memory_space<vmem>>, vector<1x128xf32>,
    %c3_95 = arith.constant 3 : index
    %c2_96 = arith.constant 2 : index
    %95 = memref.load %arg1[%c3_95, %c2_96] : memref<8x8xi32, #tpu.memory_space<smem>>
    %96 = arith.index_cast %95 : i32 to index
    %c0_97 = arith.constant 0 : index
    %c0_98 = arith.constant 0 : index
    %97 = vector.load %arg2[%96, %c0_97, %c0_98] : memref<104x1x128xf32, #tpu.memory_space<vmem>>, vector<1x1x128xf32>
    %98 = vector.shape_cast %97 : vector<1x1x128xf32> to vector<1x128xf32>
    %c19 = arith.constant 19 : index
    %c0_99 = arith.constant 0 : index
    %99 = vector.load %arg9[%c19, %c0_99] : memref<64x128xf32, #tpu.memory_space<vmem>>, vector<1x128xf32>
    tpu.vector_store %arg9[%c19, %c0_99], %98 {strides = array<i32>} : memref<64x128xf32, #tpu.memory_space<vmem>>, vector<1x128xf32>,
    %c4_100 = arith.constant 4 : index
    %c2_101 = arith.constant 2 : index
    %100 = memref.load %arg1[%c4_100, %c2_101] : memref<8x8xi32, #tpu.memory_space<smem>>
    %101 = arith.index_cast %100 : i32 to index
    %c0_102 = arith.constant 0 : index
    %c0_103 = arith.constant 0 : index
    %102 = vector.load %arg2[%101, %c0_102, %c0_103] : memref<104x1x128xf32, #tpu.memory_space<vmem>>, vector<1x1x128xf32>
    %103 = vector.shape_cast %102 : vector<1x1x128xf32> to vector<1x128xf32>
    %c20 = arith.constant 20 : index
    %c0_104 = arith.constant 0 : index
    %104 = vector.load %arg9[%c20, %c0_104] : memref<64x128xf32, #tpu.memory_space<vmem>>, vector<1x128xf32>
    tpu.vector_store %arg9[%c20, %c0_104], %103 {strides = array<i32>} : memref<64x128xf32, #tpu.memory_space<vmem>>, vector<1x128xf32>,
    %c5_105 = arith.constant 5 : index
    %c2_106 = arith.constant 2 : index
    %105 = memref.load %arg1[%c5_105, %c2_106] : memref<8x8xi32, #tpu.memory_space<smem>>
    %106 = arith.index_cast %105 : i32 to index
    %c0_107 = arith.constant 0 : index
    %c0_108 = arith.constant 0 : index
    %107 = vector.load %arg2[%106, %c0_107, %c0_108] : memref<104x1x128xf32, #tpu.memory_space<vmem>>, vector<1x1x128xf32>
    %108 = vector.shape_cast %107 : vector<1x1x128xf32> to vector<1x128xf32>
    %c21 = arith.constant 21 : index
    %c0_109 = arith.constant 0 : index
    %109 = vector.load %arg9[%c21, %c0_109] : memref<64x128xf32, #tpu.memory_space<vmem>>, vector<1x128xf32>
    tpu.vector_store %arg9[%c21, %c0_109], %108 {strides = array<i32>} : memref<64x128xf32, #tpu.memory_space<vmem>>, vector<1x128xf32>,
    %c6_110 = arith.constant 6 : index
    %c2_111 = arith.constant 2 : index
    %110 = memref.load %arg1[%c6_110, %c2_111] : memref<8x8xi32, #tpu.memory_space<smem>>
    %111 = arith.index_cast %110 : i32 to index
    %c0_112 = arith.constant 0 : index
    %c0_113 = arith.constant 0 : index
    %112 = vector.load %arg2[%111, %c0_112, %c0_113] : memref<104x1x128xf32, #tpu.memory_space<vmem>>, vector<1x1x128xf32>
    %113 = vector.shape_cast %112 : vector<1x1x128xf32> to vector<1x128xf32>
    %c22 = arith.constant 22 : index
    %c0_114 = arith.constant 0 : index
    %114 = vector.load %arg9[%c22, %c0_114] : memref<64x128xf32, #tpu.memory_space<vmem>>, vector<1x128xf32>
    tpu.vector_store %arg9[%c22, %c0_114], %113 {strides = array<i32>} : memref<64x128xf32, #tpu.memory_space<vmem>>, vector<1x128xf32>,
    %c7_115 = arith.constant 7 : index
    %c2_116 = arith.constant 2 : index
    %115 = memref.load %arg1[%c7_115, %c2_116] : memref<8x8xi32, #tpu.memory_space<smem>>
    %116 = arith.index_cast %115 : i32 to index
    %c0_117 = arith.constant 0 : index
    %c0_118 = arith.constant 0 : index
    %117 = vector.load %arg2[%116, %c0_117, %c0_118] : memref<104x1x128xf32, #tpu.memory_space<vmem>>, vector<1x1x128xf32>
    %118 = vector.shape_cast %117 : vector<1x1x128xf32> to vector<1x128xf32>
    %c23 = arith.constant 23 : index
    %c0_119 = arith.constant 0 : index
    %119 = vector.load %arg9[%c23, %c0_119] : memref<64x128xf32, #tpu.memory_space<vmem>>, vector<1x128xf32>
    tpu.vector_store %arg9[%c23, %c0_119], %118 {strides = array<i32>} : memref<64x128xf32, #tpu.memory_space<vmem>>, vector<1x128xf32>,
    %c0_120 = arith.constant 0 : index
    %c3_121 = arith.constant 3 : index
    %120 = memref.load %arg1[%c0_120, %c3_121] : memref<8x8xi32, #tpu.memory_space<smem>>
    %121 = arith.index_cast %120 : i32 to index
    %c0_122 = arith.constant 0 : index
    %c0_123 = arith.constant 0 : index
    %122 = vector.load %arg2[%121, %c0_122, %c0_123] : memref<104x1x128xf32, #tpu.memory_space<vmem>>, vector<1x1x128xf32>
    %123 = vector.shape_cast %122 : vector<1x1x128xf32> to vector<1x128xf32>
    %c24 = arith.constant 24 : index
    %c0_124 = arith.constant 0 : index
    %124 = vector.load %arg9[%c24, %c0_124] : memref<64x128xf32, #tpu.memory_space<vmem>>, vector<1x128xf32>
    tpu.vector_store %arg9[%c24, %c0_124], %123 {strides = array<i32>} : memref<64x128xf32, #tpu.memory_space<vmem>>, vector<1x128xf32>,
    %c1_125 = arith.constant 1 : index
    %c3_126 = arith.constant 3 : index
    %125 = memref.load %arg1[%c1_125, %c3_126] : memref<8x8xi32, #tpu.memory_space<smem>>
    %126 = arith.index_cast %125 : i32 to index
    %c0_127 = arith.constant 0 : index
    %c0_128 = arith.constant 0 : index
    %127 = vector.load %arg2[%126, %c0_127, %c0_128] : memref<104x1x128xf32, #tpu.memory_space<vmem>>, vector<1x1x128xf32>
    %128 = vector.shape_cast %127 : vector<1x1x128xf32> to vector<1x128xf32>
    %c25 = arith.constant 25 : index
    %c0_129 = arith.constant 0 : index
    %129 = vector.load %arg9[%c25, %c0_129] : memref<64x128xf32, #tpu.memory_space<vmem>>, vector<1x128xf32>
    tpu.vector_store %arg9[%c25, %c0_129], %128 {strides = array<i32>} : memref<64x128xf32, #tpu.memory_space<vmem>>, vector<1x128xf32>,
    %c2_130 = arith.constant 2 : index
    %c3_131 = arith.constant 3 : index
    %130 = memref.load %arg1[%c2_130, %c3_131] : memref<8x8xi32, #tpu.memory_space<smem>>
    %131 = arith.index_cast %130 : i32 to index
    %c0_132 = arith.constant 0 : index
    %c0_133 = arith.constant 0 : index
    %132 = vector.load %arg2[%131, %c0_132, %c0_133] : memref<104x1x128xf32, #tpu.memory_space<vmem>>, vector<1x1x128xf32>
    %133 = vector.shape_cast %132 : vector<1x1x128xf32> to vector<1x128xf32>
    %c26 = arith.constant 26 : index
    %c0_134 = arith.constant 0 : index
    %134 = vector.load %arg9[%c26, %c0_134] : memref<64x128xf32, #tpu.memory_space<vmem>>, vector<1x128xf32>
    tpu.vector_store %arg9[%c26, %c0_134], %133 {strides = array<i32>} : memref<64x128xf32, #tpu.memory_space<vmem>>, vector<1x128xf32>,
    %c3_135 = arith.constant 3 : index
    %c3_136 = arith.constant 3 : index
    %135 = memref.load %arg1[%c3_135, %c3_136] : memref<8x8xi32, #tpu.memory_space<smem>>
    %136 = arith.index_cast %135 : i32 to index
    %c0_137 = arith.constant 0 : index
    %c0_138 = arith.constant 0 : index
    %137 = vector.load %arg2[%136, %c0_137, %c0_138] : memref<104x1x128xf32, #tpu.memory_space<vmem>>, vector<1x1x128xf32>
    %138 = vector.shape_cast %137 : vector<1x1x128xf32> to vector<1x128xf32>
    %c27 = arith.constant 27 : index
    %c0_139 = arith.constant 0 : index
    %139 = vector.load %arg9[%c27, %c0_139] : memref<64x128xf32, #tpu.memory_space<vmem>>, vector<1x128xf32>
    tpu.vector_store %arg9[%c27, %c0_139], %138 {strides = array<i32>} : memref<64x128xf32, #tpu.memory_space<vmem>>, vector<1x128xf32>,
    %c4_140 = arith.constant 4 : index
    %c3_141 = arith.constant 3 : index
    %140 = memref.load %arg1[%c4_140, %c3_141] : memref<8x8xi32, #tpu.memory_space<smem>>
    %141 = arith.index_cast %140 : i32 to index
    %c0_142 = arith.constant 0 : index
    %c0_143 = arith.constant 0 : index
    %142 = vector.load %arg2[%141, %c0_142, %c0_143] : memref<104x1x128xf32, #tpu.memory_space<vmem>>, vector<1x1x128xf32>
    %143 = vector.shape_cast %142 : vector<1x1x128xf32> to vector<1x128xf32>
    %c28 = arith.constant 28 : index
    %c0_144 = arith.constant 0 : index
    %144 = vector.load %arg9[%c28, %c0_144] : memref<64x128xf32, #tpu.memory_space<vmem>>, vector<1x128xf32>
    tpu.vector_store %arg9[%c28, %c0_144], %143 {strides = array<i32>} : memref<64x128xf32, #tpu.memory_space<vmem>>, vector<1x128xf32>,
    %c5_145 = arith.constant 5 : index
    %c3_146 = arith.constant 3 : index
    %145 = memref.load %arg1[%c5_145, %c3_146] : memref<8x8xi32, #tpu.memory_space<smem>>
    %146 = arith.index_cast %145 : i32 to index
    %c0_147 = arith.constant 0 : index
    %c0_148 = arith.constant 0 : index
    %147 = vector.load %arg2[%146, %c0_147, %c0_148] : memref<104x1x128xf32, #tpu.memory_space<vmem>>, vector<1x1x128xf32>
    %148 = vector.shape_cast %147 : vector<1x1x128xf32> to vector<1x128xf32>
    %c29 = arith.constant 29 : index
    %c0_149 = arith.constant 0 : index
    %149 = vector.load %arg9[%c29, %c0_149] : memref<64x128xf32, #tpu.memory_space<vmem>>, vector<1x128xf32>
    tpu.vector_store %arg9[%c29, %c0_149], %148 {strides = array<i32>} : memref<64x128xf32, #tpu.memory_space<vmem>>, vector<1x128xf32>,
    %c6_150 = arith.constant 6 : index
    %c3_151 = arith.constant 3 : index
    %150 = memref.load %arg1[%c6_150, %c3_151] : memref<8x8xi32, #tpu.memory_space<smem>>
    %151 = arith.index_cast %150 : i32 to index
    %c0_152 = arith.constant 0 : index
    %c0_153 = arith.constant 0 : index
    %152 = vector.load %arg2[%151, %c0_152, %c0_153] : memref<104x1x128xf32, #tpu.memory_space<vmem>>, vector<1x1x128xf32>
    %153 = vector.shape_cast %152 : vector<1x1x128xf32> to vector<1x128xf32>
    %c30 = arith.constant 30 : index
    %c0_154 = arith.constant 0 : index
    %154 = vector.load %arg9[%c30, %c0_154] : memref<64x128xf32, #tpu.memory_space<vmem>>, vector<1x128xf32>
    tpu.vector_store %arg9[%c30, %c0_154], %153 {strides = array<i32>} : memref<64x128xf32, #tpu.memory_space<vmem>>, vector<1x128xf32>,
    %c7_155 = arith.constant 7 : index
    %c3_156 = arith.constant 3 : index
    %155 = memref.load %arg1[%c7_155, %c3_156] : memref<8x8xi32, #tpu.memory_space<smem>>
    %156 = arith.index_cast %155 : i32 to index
    %c0_157 = arith.constant 0 : index
    %c0_158 = arith.constant 0 : index
    %157 = vector.load %arg2[%156, %c0_157, %c0_158] : memref<104x1x128xf32, #tpu.memory_space<vmem>>, vector<1x1x128xf32>
    %158 = vector.shape_cast %157 : vector<1x1x128xf32> to vector<1x128xf32>
    %c31 = arith.constant 31 : index
    %c0_159 = arith.constant 0 : index
    %159 = vector.load %arg9[%c31, %c0_159] : memref<64x128xf32, #tpu.memory_space<vmem>>, vector<1x128xf32>
    tpu.vector_store %arg9[%c31, %c0_159], %158 {strides = array<i32>} : memref<64x128xf32, #tpu.memory_space<vmem>>, vector<1x128xf32>,
    %c0_160 = arith.constant 0 : index
    %c4_161 = arith.constant 4 : index
    %160 = memref.load %arg1[%c0_160, %c4_161] : memref<8x8xi32, #tpu.memory_space<smem>>
    %161 = arith.index_cast %160 : i32 to index
    %c0_162 = arith.constant 0 : index
    %c0_163 = arith.constant 0 : index
    %162 = vector.load %arg2[%161, %c0_162, %c0_163] : memref<104x1x128xf32, #tpu.memory_space<vmem>>, vector<1x1x128xf32>
    %163 = vector.shape_cast %162 : vector<1x1x128xf32> to vector<1x128xf32>
    %c32 = arith.constant 32 : index
    %c0_164 = arith.constant 0 : index
    %164 = vector.load %arg9[%c32, %c0_164] : memref<64x128xf32, #tpu.memory_space<vmem>>, vector<1x128xf32>
    tpu.vector_store %arg9[%c32, %c0_164], %163 {strides = array<i32>} : memref<64x128xf32, #tpu.memory_space<vmem>>, vector<1x128xf32>,
    %c1_165 = arith.constant 1 : index
    %c4_166 = arith.constant 4 : index
    %165 = memref.load %arg1[%c1_165, %c4_166] : memref<8x8xi32, #tpu.memory_space<smem>>
    %166 = arith.index_cast %165 : i32 to index
    %c0_167 = arith.constant 0 : index
    %c0_168 = arith.constant 0 : index
    %167 = vector.load %arg2[%166, %c0_167, %c0_168] : memref<104x1x128xf32, #tpu.memory_space<vmem>>, vector<1x1x128xf32>
    %168 = vector.shape_cast %167 : vector<1x1x128xf32> to vector<1x128xf32>
    %c33 = arith.constant 33 : index
    %c0_169 = arith.constant 0 : index
    %169 = vector.load %arg9[%c33, %c0_169] : memref<64x128xf32, #tpu.memory_space<vmem>>, vector<1x128xf32>
    tpu.vector_store %arg9[%c33, %c0_169], %168 {strides = array<i32>} : memref<64x128xf32, #tpu.memory_space<vmem>>, vector<1x128xf32>,
    %c2_170 = arith.constant 2 : index
    %c4_171 = arith.constant 4 : index
    %170 = memref.load %arg1[%c2_170, %c4_171] : memref<8x8xi32, #tpu.memory_space<smem>>
    %171 = arith.index_cast %170 : i32 to index
    %c0_172 = arith.constant 0 : index
    %c0_173 = arith.constant 0 : index
    %172 = vector.load %arg2[%171, %c0_172, %c0_173] : memref<104x1x128xf32, #tpu.memory_space<vmem>>, vector<1x1x128xf32>
    %173 = vector.shape_cast %172 : vector<1x1x128xf32> to vector<1x128xf32>
    %c34 = arith.constant 34 : index
    %c0_174 = arith.constant 0 : index
    %174 = vector.load %arg9[%c34, %c0_174] : memref<64x128xf32, #tpu.memory_space<vmem>>, vector<1x128xf32>
    tpu.vector_store %arg9[%c34, %c0_174], %173 {strides = array<i32>} : memref<64x128xf32, #tpu.memory_space<vmem>>, vector<1x128xf32>,
    %c3_175 = arith.constant 3 : index
    %c4_176 = arith.constant 4 : index
    %175 = memref.load %arg1[%c3_175, %c4_176] : memref<8x8xi32, #tpu.memory_space<smem>>
    %176 = arith.index_cast %175 : i32 to index
    %c0_177 = arith.constant 0 : index
    %c0_178 = arith.constant 0 : index
    %177 = vector.load %arg2[%176, %c0_177, %c0_178] : memref<104x1x128xf32, #tpu.memory_space<vmem>>, vector<1x1x128xf32>
    %178 = vector.shape_cast %177 : vector<1x1x128xf32> to vector<1x128xf32>
    %c35 = arith.constant 35 : index
    %c0_179 = arith.constant 0 : index
    %179 = vector.load %arg9[%c35, %c0_179] : memref<64x128xf32, #tpu.memory_space<vmem>>, vector<1x128xf32>
    tpu.vector_store %arg9[%c35, %c0_179], %178 {strides = array<i32>} : memref<64x128xf32, #tpu.memory_space<vmem>>, vector<1x128xf32>,
    %c4_180 = arith.constant 4 : index
    %c4_181 = arith.constant 4 : index
    %180 = memref.load %arg1[%c4_180, %c4_181] : memref<8x8xi32, #tpu.memory_space<smem>>
    %181 = arith.index_cast %180 : i32 to index
    %c0_182 = arith.constant 0 : index
    %c0_183 = arith.constant 0 : index
    %182 = vector.load %arg2[%181, %c0_182, %c0_183] : memref<104x1x128xf32, #tpu.memory_space<vmem>>, vector<1x1x128xf32>
    %183 = vector.shape_cast %182 : vector<1x1x128xf32> to vector<1x128xf32>
    %c36 = arith.constant 36 : index
    %c0_184 = arith.constant 0 : index
    %184 = vector.load %arg9[%c36, %c0_184] : memref<64x128xf32, #tpu.memory_space<vmem>>, vector<1x128xf32>
    tpu.vector_store %arg9[%c36, %c0_184], %183 {strides = array<i32>} : memref<64x128xf32, #tpu.memory_space<vmem>>, vector<1x128xf32>,
    %c5_185 = arith.constant 5 : index
    %c4_186 = arith.constant 4 : index
    %185 = memref.load %arg1[%c5_185, %c4_186] : memref<8x8xi32, #tpu.memory_space<smem>>
    %186 = arith.index_cast %185 : i32 to index
    %c0_187 = arith.constant 0 : index
    %c0_188 = arith.constant 0 : index
    %187 = vector.load %arg2[%186, %c0_187, %c0_188] : memref<104x1x128xf32, #tpu.memory_space<vmem>>, vector<1x1x128xf32>
    %188 = vector.shape_cast %187 : vector<1x1x128xf32> to vector<1x128xf32>
    %c37 = arith.constant 37 : index
    %c0_189 = arith.constant 0 : index
    %189 = vector.load %arg9[%c37, %c0_189] : memref<64x128xf32, #tpu.memory_space<vmem>>, vector<1x128xf32>
    tpu.vector_store %arg9[%c37, %c0_189], %188 {strides = array<i32>} : memref<64x128xf32, #tpu.memory_space<vmem>>, vector<1x128xf32>,
    %c6_190 = arith.constant 6 : index
    %c4_191 = arith.constant 4 : index
    %190 = memref.load %arg1[%c6_190, %c4_191] : memref<8x8xi32, #tpu.memory_space<smem>>
    %191 = arith.index_cast %190 : i32 to index
    %c0_192 = arith.constant 0 : index
    %c0_193 = arith.constant 0 : index
    %192 = vector.load %arg2[%191, %c0_192, %c0_193] : memref<104x1x128xf32, #tpu.memory_space<vmem>>, vector<1x1x128xf32>
    %193 = vector.shape_cast %192 : vector<1x1x128xf32> to vector<1x128xf32>
    %c38 = arith.constant 38 : index
    %c0_194 = arith.constant 0 : index
    %194 = vector.load %arg9[%c38, %c0_194] : memref<64x128xf32, #tpu.memory_space<vmem>>, vector<1x128xf32>
    tpu.vector_store %arg9[%c38, %c0_194], %193 {strides = array<i32>} : memref<64x128xf32, #tpu.memory_space<vmem>>, vector<1x128xf32>,
    %c7_195 = arith.constant 7 : index
    %c4_196 = arith.constant 4 : index
    %195 = memref.load %arg1[%c7_195, %c4_196] : memref<8x8xi32, #tpu.memory_space<smem>>
    %196 = arith.index_cast %195 : i32 to index
    %c0_197 = arith.constant 0 : index
    %c0_198 = arith.constant 0 : index
    %197 = vector.load %arg2[%196, %c0_197, %c0_198] : memref<104x1x128xf32, #tpu.memory_space<vmem>>, vector<1x1x128xf32>
    %198 = vector.shape_cast %197 : vector<1x1x128xf32> to vector<1x128xf32>
    %c39 = arith.constant 39 : index
    %c0_199 = arith.constant 0 : index
    %199 = vector.load %arg9[%c39, %c0_199] : memref<64x128xf32, #tpu.memory_space<vmem>>, vector<1x128xf32>
    tpu.vector_store %arg9[%c39, %c0_199], %198 {strides = array<i32>} : memref<64x128xf32, #tpu.memory_space<vmem>>, vector<1x128xf32>,
    %c0_200 = arith.constant 0 : index
    %c5_201 = arith.constant 5 : index
    %200 = memref.load %arg1[%c0_200, %c5_201] : memref<8x8xi32, #tpu.memory_space<smem>>
    %201 = arith.index_cast %200 : i32 to index
    %c0_202 = arith.constant 0 : index
    %c0_203 = arith.constant 0 : index
    %202 = vector.load %arg2[%201, %c0_202, %c0_203] : memref<104x1x128xf32, #tpu.memory_space<vmem>>, vector<1x1x128xf32>
    %203 = vector.shape_cast %202 : vector<1x1x128xf32> to vector<1x128xf32>
    %c40 = arith.constant 40 : index
    %c0_204 = arith.constant 0 : index
    %204 = vector.load %arg9[%c40, %c0_204] : memref<64x128xf32, #tpu.memory_space<vmem>>, vector<1x128xf32>
    tpu.vector_store %arg9[%c40, %c0_204], %203 {strides = array<i32>} : memref<64x128xf32, #tpu.memory_space<vmem>>, vector<1x128xf32>,
    %c1_205 = arith.constant 1 : index
    %c5_206 = arith.constant 5 : index
    %205 = memref.load %arg1[%c1_205, %c5_206] : memref<8x8xi32, #tpu.memory_space<smem>>
    %206 = arith.index_cast %205 : i32 to index
    %c0_207 = arith.constant 0 : index
    %c0_208 = arith.constant 0 : index
    %207 = vector.load %arg2[%206, %c0_207, %c0_208] : memref<104x1x128xf32, #tpu.memory_space<vmem>>, vector<1x1x128xf32>
    %208 = vector.shape_cast %207 : vector<1x1x128xf32> to vector<1x128xf32>
    %c41 = arith.constant 41 : index
    %c0_209 = arith.constant 0 : index
    %209 = vector.load %arg9[%c41, %c0_209] : memref<64x128xf32, #tpu.memory_space<vmem>>, vector<1x128xf32>
    tpu.vector_store %arg9[%c41, %c0_209], %208 {strides = array<i32>} : memref<64x128xf32, #tpu.memory_space<vmem>>, vector<1x128xf32>,
    %c2_210 = arith.constant 2 : index
    %c5_211 = arith.constant 5 : index
    %210 = memref.load %arg1[%c2_210, %c5_211] : memref<8x8xi32, #tpu.memory_space<smem>>
    %211 = arith.index_cast %210 : i32 to index
    %c0_212 = arith.constant 0 : index
    %c0_213 = arith.constant 0 : index
    %212 = vector.load %arg2[%211, %c0_212, %c0_213] : memref<104x1x128xf32, #tpu.memory_space<vmem>>, vector<1x1x128xf32>
    %213 = vector.shape_cast %212 : vector<1x1x128xf32> to vector<1x128xf32>
    %c42 = arith.constant 42 : index
    %c0_214 = arith.constant 0 : index
    %214 = vector.load %arg9[%c42, %c0_214] : memref<64x128xf32, #tpu.memory_space<vmem>>, vector<1x128xf32>
    tpu.vector_store %arg9[%c42, %c0_214], %213 {strides = array<i32>} : memref<64x128xf32, #tpu.memory_space<vmem>>, vector<1x128xf32>,
    %c3_215 = arith.constant 3 : index
    %c5_216 = arith.constant 5 : index
    %215 = memref.load %arg1[%c3_215, %c5_216] : memref<8x8xi32, #tpu.memory_space<smem>>
    %216 = arith.index_cast %215 : i32 to index
    %c0_217 = arith.constant 0 : index
    %c0_218 = arith.constant 0 : index
    %217 = vector.load %arg2[%216, %c0_217, %c0_218] : memref<104x1x128xf32, #tpu.memory_space<vmem>>, vector<1x1x128xf32>
    %218 = vector.shape_cast %217 : vector<1x1x128xf32> to vector<1x128xf32>
    %c43 = arith.constant 43 : index
    %c0_219 = arith.constant 0 : index
    %219 = vector.load %arg9[%c43, %c0_219] : memref<64x128xf32, #tpu.memory_space<vmem>>, vector<1x128xf32>
    tpu.vector_store %arg9[%c43, %c0_219], %218 {strides = array<i32>} : memref<64x128xf32, #tpu.memory_space<vmem>>, vector<1x128xf32>,
    %c4_220 = arith.constant 4 : index
    %c5_221 = arith.constant 5 : index
    %220 = memref.load %arg1[%c4_220, %c5_221] : memref<8x8xi32, #tpu.memory_space<smem>>
    %221 = arith.index_cast %220 : i32 to index
    %c0_222 = arith.constant 0 : index
    %c0_223 = arith.constant 0 : index
    %222 = vector.load %arg2[%221, %c0_222, %c0_223] : memref<104x1x128xf32, #tpu.memory_space<vmem>>, vector<1x1x128xf32>
    %223 = vector.shape_cast %222 : vector<1x1x128xf32> to vector<1x128xf32>
    %c44 = arith.constant 44 : index
    %c0_224 = arith.constant 0 : index
    %224 = vector.load %arg9[%c44, %c0_224] : memref<64x128xf32, #tpu.memory_space<vmem>>, vector<1x128xf32>
    tpu.vector_store %arg9[%c44, %c0_224], %223 {strides = array<i32>} : memref<64x128xf32, #tpu.memory_space<vmem>>, vector<1x128xf32>,
    %c5_225 = arith.constant 5 : index
    %c5_226 = arith.constant 5 : index
    %225 = memref.load %arg1[%c5_225, %c5_226] : memref<8x8xi32, #tpu.memory_space<smem>>
    %226 = arith.index_cast %225 : i32 to index
    %c0_227 = arith.constant 0 : index
    %c0_228 = arith.constant 0 : index
    %227 = vector.load %arg2[%226, %c0_227, %c0_228] : memref<104x1x128xf32, #tpu.memory_space<vmem>>, vector<1x1x128xf32>
    %228 = vector.shape_cast %227 : vector<1x1x128xf32> to vector<1x128xf32>
    %c45 = arith.constant 45 : index
    %c0_229 = arith.constant 0 : index
    %229 = vector.load %arg9[%c45, %c0_229] : memref<64x128xf32, #tpu.memory_space<vmem>>, vector<1x128xf32>
    tpu.vector_store %arg9[%c45, %c0_229], %228 {strides = array<i32>} : memref<64x128xf32, #tpu.memory_space<vmem>>, vector<1x128xf32>,
    %c6_230 = arith.constant 6 : index
    %c5_231 = arith.constant 5 : index
    %230 = memref.load %arg1[%c6_230, %c5_231] : memref<8x8xi32, #tpu.memory_space<smem>>
    %231 = arith.index_cast %230 : i32 to index
    %c0_232 = arith.constant 0 : index
    %c0_233 = arith.constant 0 : index
    %232 = vector.load %arg2[%231, %c0_232, %c0_233] : memref<104x1x128xf32, #tpu.memory_space<vmem>>, vector<1x1x128xf32>
    %233 = vector.shape_cast %232 : vector<1x1x128xf32> to vector<1x128xf32>
    %c46 = arith.constant 46 : index
    %c0_234 = arith.constant 0 : index
    %234 = vector.load %arg9[%c46, %c0_234] : memref<64x128xf32, #tpu.memory_space<vmem>>, vector<1x128xf32>
    tpu.vector_store %arg9[%c46, %c0_234], %233 {strides = array<i32>} : memref<64x128xf32, #tpu.memory_space<vmem>>, vector<1x128xf32>,
    %c7_235 = arith.constant 7 : index
    %c5_236 = arith.constant 5 : index
    %235 = memref.load %arg1[%c7_235, %c5_236] : memref<8x8xi32, #tpu.memory_space<smem>>
    %236 = arith.index_cast %235 : i32 to index
    %c0_237 = arith.constant 0 : index
    %c0_238 = arith.constant 0 : index
    %237 = vector.load %arg2[%236, %c0_237, %c0_238] : memref<104x1x128xf32, #tpu.memory_space<vmem>>, vector<1x1x128xf32>
    %238 = vector.shape_cast %237 : vector<1x1x128xf32> to vector<1x128xf32>
    %c47 = arith.constant 47 : index
    %c0_239 = arith.constant 0 : index
    %239 = vector.load %arg9[%c47, %c0_239] : memref<64x128xf32, #tpu.memory_space<vmem>>, vector<1x128xf32>
    tpu.vector_store %arg9[%c47, %c0_239], %238 {strides = array<i32>} : memref<64x128xf32, #tpu.memory_space<vmem>>, vector<1x128xf32>,
    %c0_240 = arith.constant 0 : index
    %c6_241 = arith.constant 6 : index
    %240 = memref.load %arg1[%c0_240, %c6_241] : memref<8x8xi32, #tpu.memory_space<smem>>
    %241 = arith.index_cast %240 : i32 to index
    %c0_242 = arith.constant 0 : index
    %c0_243 = arith.constant 0 : index
    %242 = vector.load %arg2[%241, %c0_242, %c0_243] : memref<104x1x128xf32, #tpu.memory_space<vmem>>, vector<1x1x128xf32>
    %243 = vector.shape_cast %242 : vector<1x1x128xf32> to vector<1x128xf32>
    %c48 = arith.constant 48 : index
    %c0_244 = arith.constant 0 : index
    %244 = vector.load %arg9[%c48, %c0_244] : memref<64x128xf32, #tpu.memory_space<vmem>>, vector<1x128xf32>
    tpu.vector_store %arg9[%c48, %c0_244], %243 {strides = array<i32>} : memref<64x128xf32, #tpu.memory_space<vmem>>, vector<1x128xf32>,
    %c1_245 = arith.constant 1 : index
    %c6_246 = arith.constant 6 : index
    %245 = memref.load %arg1[%c1_245, %c6_246] : memref<8x8xi32, #tpu.memory_space<smem>>
    %246 = arith.index_cast %245 : i32 to index
    %c0_247 = arith.constant 0 : index
    %c0_248 = arith.constant 0 : index
    %247 = vector.load %arg2[%246, %c0_247, %c0_248] : memref<104x1x128xf32, #tpu.memory_space<vmem>>, vector<1x1x128xf32>
    %248 = vector.shape_cast %247 : vector<1x1x128xf32> to vector<1x128xf32>
    %c49 = arith.constant 49 : index
    %c0_249 = arith.constant 0 : index
    %249 = vector.load %arg9[%c49, %c0_249] : memref<64x128xf32, #tpu.memory_space<vmem>>, vector<1x128xf32>
    tpu.vector_store %arg9[%c49, %c0_249], %248 {strides = array<i32>} : memref<64x128xf32, #tpu.memory_space<vmem>>, vector<1x128xf32>,
    %c2_250 = arith.constant 2 : index
    %c6_251 = arith.constant 6 : index
    %250 = memref.load %arg1[%c2_250, %c6_251] : memref<8x8xi32, #tpu.memory_space<smem>>
    %251 = arith.index_cast %250 : i32 to index
    %c0_252 = arith.constant 0 : index
    %c0_253 = arith.constant 0 : index
    %252 = vector.load %arg2[%251, %c0_252, %c0_253] : memref<104x1x128xf32, #tpu.memory_space<vmem>>, vector<1x1x128xf32>
    %253 = vector.shape_cast %252 : vector<1x1x128xf32> to vector<1x128xf32>
    %c50 = arith.constant 50 : index
    %c0_254 = arith.constant 0 : index
    %254 = vector.load %arg9[%c50, %c0_254] : memref<64x128xf32, #tpu.memory_space<vmem>>, vector<1x128xf32>
    tpu.vector_store %arg9[%c50, %c0_254], %253 {strides = array<i32>} : memref<64x128xf32, #tpu.memory_space<vmem>>, vector<1x128xf32>,
    %c3_255 = arith.constant 3 : index
    %c6_256 = arith.constant 6 : index
    %255 = memref.load %arg1[%c3_255, %c6_256] : memref<8x8xi32, #tpu.memory_space<smem>>
    %256 = arith.index_cast %255 : i32 to index
    %c0_257 = arith.constant 0 : index
    %c0_258 = arith.constant 0 : index
    %257 = vector.load %arg2[%256, %c0_257, %c0_258] : memref<104x1x128xf32, #tpu.memory_space<vmem>>, vector<1x1x128xf32>
    %258 = vector.shape_cast %257 : vector<1x1x128xf32> to vector<1x128xf32>
    %c51 = arith.constant 51 : index
    %c0_259 = arith.constant 0 : index
    %259 = vector.load %arg9[%c51, %c0_259] : memref<64x128xf32, #tpu.memory_space<vmem>>, vector<1x128xf32>
    tpu.vector_store %arg9[%c51, %c0_259], %258 {strides = array<i32>} : memref<64x128xf32, #tpu.memory_space<vmem>>, vector<1x128xf32>,
    %c4_260 = arith.constant 4 : index
    %c6_261 = arith.constant 6 : index
    %260 = memref.load %arg1[%c4_260, %c6_261] : memref<8x8xi32, #tpu.memory_space<smem>>
    %261 = arith.index_cast %260 : i32 to index
    %c0_262 = arith.constant 0 : index
    %c0_263 = arith.constant 0 : index
    %262 = vector.load %arg2[%261, %c0_262, %c0_263] : memref<104x1x128xf32, #tpu.memory_space<vmem>>, vector<1x1x128xf32>
    %263 = vector.shape_cast %262 : vector<1x1x128xf32> to vector<1x128xf32>
    %c52 = arith.constant 52 : index
    %c0_264 = arith.constant 0 : index
    %264 = vector.load %arg9[%c52, %c0_264] : memref<64x128xf32, #tpu.memory_space<vmem>>, vector<1x128xf32>
    tpu.vector_store %arg9[%c52, %c0_264], %263 {strides = array<i32>} : memref<64x128xf32, #tpu.memory_space<vmem>>, vector<1x128xf32>,
    %c5_265 = arith.constant 5 : index
    %c6_266 = arith.constant 6 : index
    %265 = memref.load %arg1[%c5_265, %c6_266] : memref<8x8xi32, #tpu.memory_space<smem>>
    %266 = arith.index_cast %265 : i32 to index
    %c0_267 = arith.constant 0 : index
    %c0_268 = arith.constant 0 : index
    %267 = vector.load %arg2[%266, %c0_267, %c0_268] : memref<104x1x128xf32, #tpu.memory_space<vmem>>, vector<1x1x128xf32>
    %268 = vector.shape_cast %267 : vector<1x1x128xf32> to vector<1x128xf32>
    %c53 = arith.constant 53 : index
    %c0_269 = arith.constant 0 : index
    %269 = vector.load %arg9[%c53, %c0_269] : memref<64x128xf32, #tpu.memory_space<vmem>>, vector<1x128xf32>
    tpu.vector_store %arg9[%c53, %c0_269], %268 {strides = array<i32>} : memref<64x128xf32, #tpu.memory_space<vmem>>, vector<1x128xf32>,
    %c6_270 = arith.constant 6 : index
    %c6_271 = arith.constant 6 : index
    %270 = memref.load %arg1[%c6_270, %c6_271] : memref<8x8xi32, #tpu.memory_space<smem>>
    %271 = arith.index_cast %270 : i32 to index
    %c0_272 = arith.constant 0 : index
    %c0_273 = arith.constant 0 : index
    %272 = vector.load %arg2[%271, %c0_272, %c0_273] : memref<104x1x128xf32, #tpu.memory_space<vmem>>, vector<1x1x128xf32>
    %273 = vector.shape_cast %272 : vector<1x1x128xf32> to vector<1x128xf32>
    %c54 = arith.constant 54 : index
    %c0_274 = arith.constant 0 : index
    %274 = vector.load %arg9[%c54, %c0_274] : memref<64x128xf32, #tpu.memory_space<vmem>>, vector<1x128xf32>
    tpu.vector_store %arg9[%c54, %c0_274], %273 {strides = array<i32>} : memref<64x128xf32, #tpu.memory_space<vmem>>, vector<1x128xf32>,
    %c7_275 = arith.constant 7 : index
    %c6_276 = arith.constant 6 : index
    %275 = memref.load %arg1[%c7_275, %c6_276] : memref<8x8xi32, #tpu.memory_space<smem>>
    %276 = arith.index_cast %275 : i32 to index
    %c0_277 = arith.constant 0 : index
    %c0_278 = arith.constant 0 : index
    %277 = vector.load %arg2[%276, %c0_277, %c0_278] : memref<104x1x128xf32, #tpu.memory_space<vmem>>, vector<1x1x128xf32>
    %278 = vector.shape_cast %277 : vector<1x1x128xf32> to vector<1x128xf32>
    %c55 = arith.constant 55 : index
    %c0_279 = arith.constant 0 : index
    %279 = vector.load %arg9[%c55, %c0_279] : memref<64x128xf32, #tpu.memory_space<vmem>>, vector<1x128xf32>
    tpu.vector_store %arg9[%c55, %c0_279], %278 {strides = array<i32>} : memref<64x128xf32, #tpu.memory_space<vmem>>, vector<1x128xf32>,
    %c0_280 = arith.constant 0 : index
    %c7_281 = arith.constant 7 : index
    %280 = memref.load %arg1[%c0_280, %c7_281] : memref<8x8xi32, #tpu.memory_space<smem>>
    %281 = arith.index_cast %280 : i32 to index
    %c0_282 = arith.constant 0 : index
    %c0_283 = arith.constant 0 : index
    %282 = vector.load %arg2[%281, %c0_282, %c0_283] : memref<104x1x128xf32, #tpu.memory_space<vmem>>, vector<1x1x128xf32>
    %283 = vector.shape_cast %282 : vector<1x1x128xf32> to vector<1x128xf32>
    %c56 = arith.constant 56 : index
    %c0_284 = arith.constant 0 : index
    %284 = vector.load %arg9[%c56, %c0_284] : memref<64x128xf32, #tpu.memory_space<vmem>>, vector<1x128xf32>
    tpu.vector_store %arg9[%c56, %c0_284], %283 {strides = array<i32>} : memref<64x128xf32, #tpu.memory_space<vmem>>, vector<1x128xf32>,
    %c1_285 = arith.constant 1 : index
    %c7_286 = arith.constant 7 : index
    %285 = memref.load %arg1[%c1_285, %c7_286] : memref<8x8xi32, #tpu.memory_space<smem>>
    %286 = arith.index_cast %285 : i32 to index
    %c0_287 = arith.constant 0 : index
    %c0_288 = arith.constant 0 : index
    %287 = vector.load %arg2[%286, %c0_287, %c0_288] : memref<104x1x128xf32, #tpu.memory_space<vmem>>, vector<1x1x128xf32>
    %288 = vector.shape_cast %287 : vector<1x1x128xf32> to vector<1x128xf32>
    %c57 = arith.constant 57 : index
    %c0_289 = arith.constant 0 : index
    %289 = vector.load %arg9[%c57, %c0_289] : memref<64x128xf32, #tpu.memory_space<vmem>>, vector<1x128xf32>
    tpu.vector_store %arg9[%c57, %c0_289], %288 {strides = array<i32>} : memref<64x128xf32, #tpu.memory_space<vmem>>, vector<1x128xf32>,
    %c2_290 = arith.constant 2 : index
    %c7_291 = arith.constant 7 : index
    %290 = memref.load %arg1[%c2_290, %c7_291] : memref<8x8xi32, #tpu.memory_space<smem>>
    %291 = arith.index_cast %290 : i32 to index
    %c0_292 = arith.constant 0 : index
    %c0_293 = arith.constant 0 : index
    %292 = vector.load %arg2[%291, %c0_292, %c0_293] : memref<104x1x128xf32, #tpu.memory_space<vmem>>, vector<1x1x128xf32>
    %293 = vector.shape_cast %292 : vector<1x1x128xf32> to vector<1x128xf32>
    %c58 = arith.constant 58 : index
    %c0_294 = arith.constant 0 : index
    %294 = vector.load %arg9[%c58, %c0_294] : memref<64x128xf32, #tpu.memory_space<vmem>>, vector<1x128xf32>
    tpu.vector_store %arg9[%c58, %c0_294], %293 {strides = array<i32>} : memref<64x128xf32, #tpu.memory_space<vmem>>, vector<1x128xf32>,
    %c3_295 = arith.constant 3 : index
    %c7_296 = arith.constant 7 : index
    %295 = memref.load %arg1[%c3_295, %c7_296] : memref<8x8xi32, #tpu.memory_space<smem>>
    %296 = arith.index_cast %295 : i32 to index
    %c0_297 = arith.constant 0 : index
    %c0_298 = arith.constant 0 : index
    %297 = vector.load %arg2[%296, %c0_297, %c0_298] : memref<104x1x128xf32, #tpu.memory_space<vmem>>, vector<1x1x128xf32>
    %298 = vector.shape_cast %297 : vector<1x1x128xf32> to vector<1x128xf32>
    %c59 = arith.constant 59 : index
    %c0_299 = arith.constant 0 : index
    %299 = vector.load %arg9[%c59, %c0_299] : memref<64x128xf32, #tpu.memory_space<vmem>>, vector<1x128xf32>
    tpu.vector_store %arg9[%c59, %c0_299], %298 {strides = array<i32>} : memref<64x128xf32, #tpu.memory_space<vmem>>, vector<1x128xf32>,
    %c4_300 = arith.constant 4 : index
    %c7_301 = arith.constant 7 : index
    %300 = memref.load %arg1[%c4_300, %c7_301] : memref<8x8xi32, #tpu.memory_space<smem>>
    %301 = arith.index_cast %300 : i32 to index
    %c0_302 = arith.constant 0 : index
    %c0_303 = arith.constant 0 : index
    %302 = vector.load %arg2[%301, %c0_302, %c0_303] : memref<104x1x128xf32, #tpu.memory_space<vmem>>, vector<1x1x128xf32>
    %303 = vector.shape_cast %302 : vector<1x1x128xf32> to vector<1x128xf32>
    %c60 = arith.constant 60 : index
    %c0_304 = arith.constant 0 : index
    %304 = vector.load %arg9[%c60, %c0_304] : memref<64x128xf32, #tpu.memory_space<vmem>>, vector<1x128xf32>
    tpu.vector_store %arg9[%c60, %c0_304], %303 {strides = array<i32>} : memref<64x128xf32, #tpu.memory_space<vmem>>, vector<1x128xf32>,
    %c5_305 = arith.constant 5 : index
    %c7_306 = arith.constant 7 : index
    %305 = memref.load %arg1[%c5_305, %c7_306] : memref<8x8xi32, #tpu.memory_space<smem>>
    %306 = arith.index_cast %305 : i32 to index
    %c0_307 = arith.constant 0 : index
    %c0_308 = arith.constant 0 : index
    %307 = vector.load %arg2[%306, %c0_307, %c0_308] : memref<104x1x128xf32, #tpu.memory_space<vmem>>, vector<1x1x128xf32>
    %308 = vector.shape_cast %307 : vector<1x1x128xf32> to vector<1x128xf32>
    %c61 = arith.constant 61 : index
    %c0_309 = arith.constant 0 : index
    %309 = vector.load %arg9[%c61, %c0_309] : memref<64x128xf32, #tpu.memory_space<vmem>>, vector<1x128xf32>
    tpu.vector_store %arg9[%c61, %c0_309], %308 {strides = array<i32>} : memref<64x128xf32, #tpu.memory_space<vmem>>, vector<1x128xf32>,
    %c6_310 = arith.constant 6 : index
    %c7_311 = arith.constant 7 : index
    %310 = memref.load %arg1[%c6_310, %c7_311] : memref<8x8xi32, #tpu.memory_space<smem>>
    %311 = arith.index_cast %310 : i32 to index
    %c0_312 = arith.constant 0 : index
    %c0_313 = arith.constant 0 : index
    %312 = vector.load %arg2[%311, %c0_312, %c0_313] : memref<104x1x128xf32, #tpu.memory_space<vmem>>, vector<1x1x128xf32>
    %313 = vector.shape_cast %312 : vector<1x1x128xf32> to vector<1x128xf32>
    %c62 = arith.constant 62 : index
    %c0_314 = arith.constant 0 : index
    %314 = vector.load %arg9[%c62, %c0_314] : memref<64x128xf32, #tpu.memory_space<vmem>>, vector<1x128xf32>
    tpu.vector_store %arg9[%c62, %c0_314], %313 {strides = array<i32>} : memref<64x128xf32, #tpu.memory_space<vmem>>, vector<1x128xf32>,
    %c7_315 = arith.constant 7 : index
    %c7_316 = arith.constant 7 : index
    %315 = memref.load %arg1[%c7_315, %c7_316] : memref<8x8xi32, #tpu.memory_space<smem>>
    %316 = arith.index_cast %315 : i32 to index
    %c0_317 = arith.constant 0 : index
    %c0_318 = arith.constant 0 : index
    %317 = vector.load %arg2[%316, %c0_317, %c0_318] : memref<104x1x128xf32, #tpu.memory_space<vmem>>, vector<1x1x128xf32>
    %318 = vector.shape_cast %317 : vector<1x1x128xf32> to vector<1x128xf32>
    %c63 = arith.constant 63 : index
    %c0_319 = arith.constant 0 : index
    %319 = vector.load %arg9[%c63, %c0_319] : memref<64x128xf32, #tpu.memory_space<vmem>>, vector<1x128xf32>
    tpu.vector_store %arg9[%c63, %c0_319], %318 {strides = array<i32>} : memref<64x128xf32, #tpu.memory_space<vmem>>, vector<1x128xf32>,
    %c0_320 = arith.constant 0 : index
    %c0_321 = arith.constant 0 : index
    %320 = vector.load %arg9[%c0_320, %c0_321] : memref<64x128xf32, #tpu.memory_space<vmem>>, vector<64x128xf32>
    %c0_322 = arith.constant 0 : index
    %c0_323 = arith.constant 0 : index
    %321 = vector.load %arg3[%c0_322, %c0_323] : memref<128x512xf32, #tpu.memory_space<vmem>>, vector<128x512xf32>
    %cst = arith.constant dense<0.000000e+00> : vector<64x512xf32>
    %322 = tpu.matmul %320, %321, %cst {dimension_numbers = #tpu.dot_dimension_numbers<[1], [0], [0], [1], [0, 0, 1, 1], [], []>} : vector<64x128xf32>, vector<128x512xf32>, vector<64x512xf32> -> vector<64x512xf32>
    %c0_324 = arith.constant 0 : index
    %c0_325 = arith.constant 0 : index
    %323 = vector.load %arg5[%c0_324, %c0_325] : memref<1x512xf32, #tpu.memory_space<vmem>>, vector<1x512xf32>
    %324 = vector.broadcast %323 : vector<1x512xf32> to vector<64x512xf32>
    %325 = arith.addf %322, %324 : vector<64x512xf32>
    %c0_326 = arith.constant 0 : index
    %c0_327 = arith.constant 0 : index
    %326 = vector.load %arg4[%c0_326, %c0_327] : memref<128x512xf32, #tpu.memory_space<vmem>>, vector<128x512xf32>
    %cst_328 = arith.constant 0.000000e+00 : f32
    %327 = vector.broadcast %cst_328 : f32 to vector<8x128xf32>
    %cst_329 = arith.constant 0.000000e+00 : f32
    %328 = vector.broadcast %cst_329 : f32 to vector<8x128xf32>
    %329 = vector.extract_strided_slice %325 {offsets = [0, 0], sizes = [8, 512], strides = [1, 1]} : vector<64x512xf32> to vector<8x512xf32>
    %cst_330 = arith.constant dense<0.000000e+00> : vector<8x512xf32>
    %330 = tpu.matmul %327, %326, %cst_330 {dimension_numbers = #tpu.dot_dimension_numbers<[1], [0], [0], [1], [0, 0, 1, 1], [], []>} : vector<8x128xf32>, vector<128x512xf32>, vector<8x512xf32> -> vector<8x512xf32>
    %331 = arith.addf %329, %330 : vector<8x512xf32>
    %332 = vector.extract_strided_slice %331 {offsets = [0, 0], sizes = [8, 128], strides = [1, 1]} : vector<8x512xf32> to vector<8x128xf32>
    %333 = arith.negf %332 : vector<8x128xf32>
    %334 = math.exp %333 : vector<8x128xf32>
    %cst_331 = arith.constant 1.000000e+00 : f32
    %335 = vector.broadcast %cst_331 : f32 to vector<8x128xf32>
    %336 = arith.addf %335, %334 : vector<8x128xf32>
    %337 = arith.divf %335, %336 : vector<8x128xf32>
    %338 = vector.extract_strided_slice %331 {offsets = [0, 128], sizes = [8, 128], strides = [1, 1]} : vector<8x512xf32> to vector<8x128xf32>
    %339 = arith.negf %338 : vector<8x128xf32>
    %340 = math.exp %339 : vector<8x128xf32>
    %cst_332 = arith.constant 1.000000e+00 : f32
    %341 = vector.broadcast %cst_332 : f32 to vector<8x128xf32>
    %342 = arith.addf %341, %340 : vector<8x128xf32>
    %343 = arith.divf %341, %342 : vector<8x128xf32>
    %344 = vector.extract_strided_slice %331 {offsets = [0, 256], sizes = [8, 128], strides = [1, 1]} : vector<8x512xf32> to vector<8x128xf32>
    %345 = math.tanh %344 : vector<8x128xf32>
    %346 = vector.extract_strided_slice %331 {offsets = [0, 384], sizes = [8, 128], strides = [1, 1]} : vector<8x512xf32> to vector<8x128xf32>
    %347 = arith.negf %346 : vector<8x128xf32>
    %348 = math.exp %347 : vector<8x128xf32>
    %cst_333 = arith.constant 1.000000e+00 : f32
    %349 = vector.broadcast %cst_333 : f32 to vector<8x128xf32>
    %350 = arith.addf %349, %348 : vector<8x128xf32>
    %351 = arith.divf %349, %350 : vector<8x128xf32>
    %352 = arith.mulf %343, %328 : vector<8x128xf32>
    %353 = arith.mulf %337, %345 : vector<8x128xf32>
    %354 = arith.addf %352, %353 : vector<8x128xf32>
    %355 = math.tanh %354 : vector<8x128xf32>
    %356 = arith.mulf %351, %355 : vector<8x128xf32>
    %357 = vector.extract_strided_slice %325 {offsets = [8, 0], sizes = [8, 512], strides = [1, 1]} : vector<64x512xf32> to vector<8x512xf32>
    %cst_334 = arith.constant dense<0.000000e+00> : vector<8x512xf32>
    %358 = tpu.matmul %356, %326, %cst_334 {dimension_numbers = #tpu.dot_dimension_numbers<[1], [0], [0], [1], [0, 0, 1, 1], [], []>} : vector<8x128xf32>, vector<128x512xf32>, vector<8x512xf32> -> vector<8x512xf32>
    %359 = arith.addf %357, %358 : vector<8x512xf32>
    %360 = vector.extract_strided_slice %359 {offsets = [0, 0], sizes = [8, 128], strides = [1, 1]} : vector<8x512xf32> to vector<8x128xf32>
    %361 = arith.negf %360 : vector<8x128xf32>
    %362 = math.exp %361 : vector<8x128xf32>
    %cst_335 = arith.constant 1.000000e+00 : f32
    %363 = vector.broadcast %cst_335 : f32 to vector<8x128xf32>
    %364 = arith.addf %363, %362 : vector<8x128xf32>
    %365 = arith.divf %363, %364 : vector<8x128xf32>
    %366 = vector.extract_strided_slice %359 {offsets = [0, 128], sizes = [8, 128], strides = [1, 1]} : vector<8x512xf32> to vector<8x128xf32>
    %367 = arith.negf %366 : vector<8x128xf32>
    %368 = math.exp %367 : vector<8x128xf32>
    %cst_336 = arith.constant 1.000000e+00 : f32
    %369 = vector.broadcast %cst_336 : f32 to vector<8x128xf32>
    %370 = arith.addf %369, %368 : vector<8x128xf32>
    %371 = arith.divf %369, %370 : vector<8x128xf32>
    %372 = vector.extract_strided_slice %359 {offsets = [0, 256], sizes = [8, 128], strides = [1, 1]} : vector<8x512xf32> to vector<8x128xf32>
    %373 = math.tanh %372 : vector<8x128xf32>
    %374 = vector.extract_strided_slice %359 {offsets = [0, 384], sizes = [8, 128], strides = [1, 1]} : vector<8x512xf32> to vector<8x128xf32>
    %375 = arith.negf %374 : vector<8x128xf32>
    %376 = math.exp %375 : vector<8x128xf32>
    %cst_337 = arith.constant 1.000000e+00 : f32
    %377 = vector.broadcast %cst_337 : f32 to vector<8x128xf32>
    %378 = arith.addf %377, %376 : vector<8x128xf32>
    %379 = arith.divf %377, %378 : vector<8x128xf32>
    %380 = arith.mulf %371, %354 : vector<8x128xf32>
    %381 = arith.mulf %365, %373 : vector<8x128xf32>
    %382 = arith.addf %380, %381 : vector<8x128xf32>
    %383 = math.tanh %382 : vector<8x128xf32>
    %384 = arith.mulf %379, %383 : vector<8x128xf32>
    %385 = vector.extract_strided_slice %325 {offsets = [16, 0], sizes = [8, 512], strides = [1, 1]} : vector<64x512xf32> to vector<8x512xf32>
    %cst_338 = arith.constant dense<0.000000e+00> : vector<8x512xf32>
    %386 = tpu.matmul %384, %326, %cst_338 {dimension_numbers = #tpu.dot_dimension_numbers<[1], [0], [0], [1], [0, 0, 1, 1], [], []>} : vector<8x128xf32>, vector<128x512xf32>, vector<8x512xf32> -> vector<8x512xf32>
    %387 = arith.addf %385, %386 : vector<8x512xf32>
    %388 = vector.extract_strided_slice %387 {offsets = [0, 0], sizes = [8, 128], strides = [1, 1]} : vector<8x512xf32> to vector<8x128xf32>
    %389 = arith.negf %388 : vector<8x128xf32>
    %390 = math.exp %389 : vector<8x128xf32>
    %cst_339 = arith.constant 1.000000e+00 : f32
    %391 = vector.broadcast %cst_339 : f32 to vector<8x128xf32>
    %392 = arith.addf %391, %390 : vector<8x128xf32>
    %393 = arith.divf %391, %392 : vector<8x128xf32>
    %394 = vector.extract_strided_slice %387 {offsets = [0, 128], sizes = [8, 128], strides = [1, 1]} : vector<8x512xf32> to vector<8x128xf32>
    %395 = arith.negf %394 : vector<8x128xf32>
    %396 = math.exp %395 : vector<8x128xf32>
    %cst_340 = arith.constant 1.000000e+00 : f32
    %397 = vector.broadcast %cst_340 : f32 to vector<8x128xf32>
    %398 = arith.addf %397, %396 : vector<8x128xf32>
    %399 = arith.divf %397, %398 : vector<8x128xf32>
    %400 = vector.extract_strided_slice %387 {offsets = [0, 256], sizes = [8, 128], strides = [1, 1]} : vector<8x512xf32> to vector<8x128xf32>
    %401 = math.tanh %400 : vector<8x128xf32>
    %402 = vector.extract_strided_slice %387 {offsets = [0, 384], sizes = [8, 128], strides = [1, 1]} : vector<8x512xf32> to vector<8x128xf32>
    %403 = arith.negf %402 : vector<8x128xf32>
    %404 = math.exp %403 : vector<8x128xf32>
    %cst_341 = arith.constant 1.000000e+00 : f32
    %405 = vector.broadcast %cst_341 : f32 to vector<8x128xf32>
    %406 = arith.addf %405, %404 : vector<8x128xf32>
    %407 = arith.divf %405, %406 : vector<8x128xf32>
    %408 = arith.mulf %399, %382 : vector<8x128xf32>
    %409 = arith.mulf %393, %401 : vector<8x128xf32>
    %410 = arith.addf %408, %409 : vector<8x128xf32>
    %411 = math.tanh %410 : vector<8x128xf32>
    %412 = arith.mulf %407, %411 : vector<8x128xf32>
    %413 = vector.extract_strided_slice %325 {offsets = [24, 0], sizes = [8, 512], strides = [1, 1]} : vector<64x512xf32> to vector<8x512xf32>
    %cst_342 = arith.constant dense<0.000000e+00> : vector<8x512xf32>
    %414 = tpu.matmul %412, %326, %cst_342 {dimension_numbers = #tpu.dot_dimension_numbers<[1], [0], [0], [1], [0, 0, 1, 1], [], []>} : vector<8x128xf32>, vector<128x512xf32>, vector<8x512xf32> -> vector<8x512xf32>
    %415 = arith.addf %413, %414 : vector<8x512xf32>
    %416 = vector.extract_strided_slice %415 {offsets = [0, 0], sizes = [8, 128], strides = [1, 1]} : vector<8x512xf32> to vector<8x128xf32>
    %417 = arith.negf %416 : vector<8x128xf32>
    %418 = math.exp %417 : vector<8x128xf32>
    %cst_343 = arith.constant 1.000000e+00 : f32
    %419 = vector.broadcast %cst_343 : f32 to vector<8x128xf32>
    %420 = arith.addf %419, %418 : vector<8x128xf32>
    %421 = arith.divf %419, %420 : vector<8x128xf32>
    %422 = vector.extract_strided_slice %415 {offsets = [0, 128], sizes = [8, 128], strides = [1, 1]} : vector<8x512xf32> to vector<8x128xf32>
    %423 = arith.negf %422 : vector<8x128xf32>
    %424 = math.exp %423 : vector<8x128xf32>
    %cst_344 = arith.constant 1.000000e+00 : f32
    %425 = vector.broadcast %cst_344 : f32 to vector<8x128xf32>
    %426 = arith.addf %425, %424 : vector<8x128xf32>
    %427 = arith.divf %425, %426 : vector<8x128xf32>
    %428 = vector.extract_strided_slice %415 {offsets = [0, 256], sizes = [8, 128], strides = [1, 1]} : vector<8x512xf32> to vector<8x128xf32>
    %429 = math.tanh %428 : vector<8x128xf32>
    %430 = vector.extract_strided_slice %415 {offsets = [0, 384], sizes = [8, 128], strides = [1, 1]} : vector<8x512xf32> to vector<8x128xf32>
    %431 = arith.negf %430 : vector<8x128xf32>
    %432 = math.exp %431 : vector<8x128xf32>
    %cst_345 = arith.constant 1.000000e+00 : f32
    %433 = vector.broadcast %cst_345 : f32 to vector<8x128xf32>
    %434 = arith.addf %433, %432 : vector<8x128xf32>
    %435 = arith.divf %433, %434 : vector<8x128xf32>
    %436 = arith.mulf %427, %410 : vector<8x128xf32>
    %437 = arith.mulf %421, %429 : vector<8x128xf32>
    %438 = arith.addf %436, %437 : vector<8x128xf32>
    %439 = math.tanh %438 : vector<8x128xf32>
    %440 = arith.mulf %435, %439 : vector<8x128xf32>
    %441 = vector.extract_strided_slice %325 {offsets = [32, 0], sizes = [8, 512], strides = [1, 1]} : vector<64x512xf32> to vector<8x512xf32>
    %cst_346 = arith.constant dense<0.000000e+00> : vector<8x512xf32>
    %442 = tpu.matmul %440, %326, %cst_346 {dimension_numbers = #tpu.dot_dimension_numbers<[1], [0], [0], [1], [0, 0, 1, 1], [], []>} : vector<8x128xf32>, vector<128x512xf32>, vector<8x512xf32> -> vector<8x512xf32>
    %443 = arith.addf %441, %442 : vector<8x512xf32>
    %444 = vector.extract_strided_slice %443 {offsets = [0, 0], sizes = [8, 128], strides = [1, 1]} : vector<8x512xf32> to vector<8x128xf32>
    %445 = arith.negf %444 : vector<8x128xf32>
    %446 = math.exp %445 : vector<8x128xf32>
    %cst_347 = arith.constant 1.000000e+00 : f32
    %447 = vector.broadcast %cst_347 : f32 to vector<8x128xf32>
    %448 = arith.addf %447, %446 : vector<8x128xf32>
    %449 = arith.divf %447, %448 : vector<8x128xf32>
    %450 = vector.extract_strided_slice %443 {offsets = [0, 128], sizes = [8, 128], strides = [1, 1]} : vector<8x512xf32> to vector<8x128xf32>
    %451 = arith.negf %450 : vector<8x128xf32>
    %452 = math.exp %451 : vector<8x128xf32>
    %cst_348 = arith.constant 1.000000e+00 : f32
    %453 = vector.broadcast %cst_348 : f32 to vector<8x128xf32>
    %454 = arith.addf %453, %452 : vector<8x128xf32>
    %455 = arith.divf %453, %454 : vector<8x128xf32>
    %456 = vector.extract_strided_slice %443 {offsets = [0, 256], sizes = [8, 128], strides = [1, 1]} : vector<8x512xf32> to vector<8x128xf32>
    %457 = math.tanh %456 : vector<8x128xf32>
    %458 = vector.extract_strided_slice %443 {offsets = [0, 384], sizes = [8, 128], strides = [1, 1]} : vector<8x512xf32> to vector<8x128xf32>
    %459 = arith.negf %458 : vector<8x128xf32>
    %460 = math.exp %459 : vector<8x128xf32>
    %cst_349 = arith.constant 1.000000e+00 : f32
    %461 = vector.broadcast %cst_349 : f32 to vector<8x128xf32>
    %462 = arith.addf %461, %460 : vector<8x128xf32>
    %463 = arith.divf %461, %462 : vector<8x128xf32>
    %464 = arith.mulf %455, %438 : vector<8x128xf32>
    %465 = arith.mulf %449, %457 : vector<8x128xf32>
    %466 = arith.addf %464, %465 : vector<8x128xf32>
    %467 = math.tanh %466 : vector<8x128xf32>
    %468 = arith.mulf %463, %467 : vector<8x128xf32>
    %469 = vector.extract_strided_slice %325 {offsets = [40, 0], sizes = [8, 512], strides = [1, 1]} : vector<64x512xf32> to vector<8x512xf32>
    %cst_350 = arith.constant dense<0.000000e+00> : vector<8x512xf32>
    %470 = tpu.matmul %468, %326, %cst_350 {dimension_numbers = #tpu.dot_dimension_numbers<[1], [0], [0], [1], [0, 0, 1, 1], [], []>} : vector<8x128xf32>, vector<128x512xf32>, vector<8x512xf32> -> vector<8x512xf32>
    %471 = arith.addf %469, %470 : vector<8x512xf32>
    %472 = vector.extract_strided_slice %471 {offsets = [0, 0], sizes = [8, 128], strides = [1, 1]} : vector<8x512xf32> to vector<8x128xf32>
    %473 = arith.negf %472 : vector<8x128xf32>
    %474 = math.exp %473 : vector<8x128xf32>
    %cst_351 = arith.constant 1.000000e+00 : f32
    %475 = vector.broadcast %cst_351 : f32 to vector<8x128xf32>
    %476 = arith.addf %475, %474 : vector<8x128xf32>
    %477 = arith.divf %475, %476 : vector<8x128xf32>
    %478 = vector.extract_strided_slice %471 {offsets = [0, 128], sizes = [8, 128], strides = [1, 1]} : vector<8x512xf32> to vector<8x128xf32>
    %479 = arith.negf %478 : vector<8x128xf32>
    %480 = math.exp %479 : vector<8x128xf32>
    %cst_352 = arith.constant 1.000000e+00 : f32
    %481 = vector.broadcast %cst_352 : f32 to vector<8x128xf32>
    %482 = arith.addf %481, %480 : vector<8x128xf32>
    %483 = arith.divf %481, %482 : vector<8x128xf32>
    %484 = vector.extract_strided_slice %471 {offsets = [0, 256], sizes = [8, 128], strides = [1, 1]} : vector<8x512xf32> to vector<8x128xf32>
    %485 = math.tanh %484 : vector<8x128xf32>
    %486 = vector.extract_strided_slice %471 {offsets = [0, 384], sizes = [8, 128], strides = [1, 1]} : vector<8x512xf32> to vector<8x128xf32>
    %487 = arith.negf %486 : vector<8x128xf32>
    %488 = math.exp %487 : vector<8x128xf32>
    %cst_353 = arith.constant 1.000000e+00 : f32
    %489 = vector.broadcast %cst_353 : f32 to vector<8x128xf32>
    %490 = arith.addf %489, %488 : vector<8x128xf32>
    %491 = arith.divf %489, %490 : vector<8x128xf32>
    %492 = arith.mulf %483, %466 : vector<8x128xf32>
    %493 = arith.mulf %477, %485 : vector<8x128xf32>
    %494 = arith.addf %492, %493 : vector<8x128xf32>
    %495 = math.tanh %494 : vector<8x128xf32>
    %496 = arith.mulf %491, %495 : vector<8x128xf32>
    %497 = vector.extract_strided_slice %325 {offsets = [48, 0], sizes = [8, 512], strides = [1, 1]} : vector<64x512xf32> to vector<8x512xf32>
    %cst_354 = arith.constant dense<0.000000e+00> : vector<8x512xf32>
    %498 = tpu.matmul %496, %326, %cst_354 {dimension_numbers = #tpu.dot_dimension_numbers<[1], [0], [0], [1], [0, 0, 1, 1], [], []>} : vector<8x128xf32>, vector<128x512xf32>, vector<8x512xf32> -> vector<8x512xf32>
    %499 = arith.addf %497, %498 : vector<8x512xf32>
    %500 = vector.extract_strided_slice %499 {offsets = [0, 0], sizes = [8, 128], strides = [1, 1]} : vector<8x512xf32> to vector<8x128xf32>
    %501 = arith.negf %500 : vector<8x128xf32>
    %502 = math.exp %501 : vector<8x128xf32>
    %cst_355 = arith.constant 1.000000e+00 : f32
    %503 = vector.broadcast %cst_355 : f32 to vector<8x128xf32>
    %504 = arith.addf %503, %502 : vector<8x128xf32>
    %505 = arith.divf %503, %504 : vector<8x128xf32>
    %506 = vector.extract_strided_slice %499 {offsets = [0, 128], sizes = [8, 128], strides = [1, 1]} : vector<8x512xf32> to vector<8x128xf32>
    %507 = arith.negf %506 : vector<8x128xf32>
    %508 = math.exp %507 : vector<8x128xf32>
    %cst_356 = arith.constant 1.000000e+00 : f32
    %509 = vector.broadcast %cst_356 : f32 to vector<8x128xf32>
    %510 = arith.addf %509, %508 : vector<8x128xf32>
    %511 = arith.divf %509, %510 : vector<8x128xf32>
    %512 = vector.extract_strided_slice %499 {offsets = [0, 256], sizes = [8, 128], strides = [1, 1]} : vector<8x512xf32> to vector<8x128xf32>
    %513 = math.tanh %512 : vector<8x128xf32>
    %514 = vector.extract_strided_slice %499 {offsets = [0, 384], sizes = [8, 128], strides = [1, 1]} : vector<8x512xf32> to vector<8x128xf32>
    %515 = arith.negf %514 : vector<8x128xf32>
    %516 = math.exp %515 : vector<8x128xf32>
    %cst_357 = arith.constant 1.000000e+00 : f32
    %517 = vector.broadcast %cst_357 : f32 to vector<8x128xf32>
    %518 = arith.addf %517, %516 : vector<8x128xf32>
    %519 = arith.divf %517, %518 : vector<8x128xf32>
    %520 = arith.mulf %511, %494 : vector<8x128xf32>
    %521 = arith.mulf %505, %513 : vector<8x128xf32>
    %522 = arith.addf %520, %521 : vector<8x128xf32>
    %523 = math.tanh %522 : vector<8x128xf32>
    %524 = arith.mulf %519, %523 : vector<8x128xf32>
    %525 = vector.extract_strided_slice %325 {offsets = [56, 0], sizes = [8, 512], strides = [1, 1]} : vector<64x512xf32> to vector<8x512xf32>
    %cst_358 = arith.constant dense<0.000000e+00> : vector<8x512xf32>
    %526 = tpu.matmul %524, %326, %cst_358 {dimension_numbers = #tpu.dot_dimension_numbers<[1], [0], [0], [1], [0, 0, 1, 1], [], []>} : vector<8x128xf32>, vector<128x512xf32>, vector<8x512xf32> -> vector<8x512xf32>
    %527 = arith.addf %525, %526 : vector<8x512xf32>
    %528 = vector.extract_strided_slice %527 {offsets = [0, 0], sizes = [8, 128], strides = [1, 1]} : vector<8x512xf32> to vector<8x128xf32>
    %529 = arith.negf %528 : vector<8x128xf32>
    %530 = math.exp %529 : vector<8x128xf32>
    %cst_359 = arith.constant 1.000000e+00 : f32
    %531 = vector.broadcast %cst_359 : f32 to vector<8x128xf32>
    %532 = arith.addf %531, %530 : vector<8x128xf32>
    %533 = arith.divf %531, %532 : vector<8x128xf32>
    %534 = vector.extract_strided_slice %527 {offsets = [0, 128], sizes = [8, 128], strides = [1, 1]} : vector<8x512xf32> to vector<8x128xf32>
    %535 = arith.negf %534 : vector<8x128xf32>
    %536 = math.exp %535 : vector<8x128xf32>
    %cst_360 = arith.constant 1.000000e+00 : f32
    %537 = vector.broadcast %cst_360 : f32 to vector<8x128xf32>
    %538 = arith.addf %537, %536 : vector<8x128xf32>
    %539 = arith.divf %537, %538 : vector<8x128xf32>
    %540 = vector.extract_strided_slice %527 {offsets = [0, 256], sizes = [8, 128], strides = [1, 1]} : vector<8x512xf32> to vector<8x128xf32>
    %541 = math.tanh %540 : vector<8x128xf32>
    %542 = vector.extract_strided_slice %527 {offsets = [0, 384], sizes = [8, 128], strides = [1, 1]} : vector<8x512xf32> to vector<8x128xf32>
    %543 = arith.negf %542 : vector<8x128xf32>
    %544 = math.exp %543 : vector<8x128xf32>
    %cst_361 = arith.constant 1.000000e+00 : f32
    %545 = vector.broadcast %cst_361 : f32 to vector<8x128xf32>
    %546 = arith.addf %545, %544 : vector<8x128xf32>
    %547 = arith.divf %545, %546 : vector<8x128xf32>
    %548 = arith.mulf %539, %522 : vector<8x128xf32>
    %549 = arith.mulf %533, %541 : vector<8x128xf32>
    %550 = arith.addf %548, %549 : vector<8x128xf32>
    %551 = math.tanh %550 : vector<8x128xf32>
    %552 = arith.mulf %547, %551 : vector<8x128xf32>
    %c0_362 = arith.constant 0 : index
    %c0_363 = arith.constant 0 : index
    %553 = vector.load %arg6[%c0_362, %c0_363] : memref<128x128xf32, #tpu.memory_space<vmem>>, vector<128x128xf32>
    %cst_364 = arith.constant dense<0.000000e+00> : vector<8x128xf32>
    %554 = tpu.matmul %552, %553, %cst_364 {dimension_numbers = #tpu.dot_dimension_numbers<[1], [0], [0], [1], [0, 0, 1, 1], [], []>} : vector<8x128xf32>, vector<128x128xf32>, vector<8x128xf32> -> vector<8x128xf32>
    %c0_365 = arith.constant 0 : index
    %c0_366 = arith.constant 0 : index
    %555 = vector.load %arg7[%c0_365, %c0_366] : memref<1x128xf32, #tpu.memory_space<vmem>>, vector<1x128xf32>
    %556 = vector.broadcast %555 : vector<1x128xf32> to vector<8x128xf32>
    %557 = arith.addf %554, %556 : vector<8x128xf32>
    %cst_367 = arith.constant dense<0xFF800000> : vector<8xf32>
    %558 = vector.multi_reduction <maximumf>, %557, %cst_367 [1] : vector<8x128xf32> to vector<8xf32>
    %559 = vector.shape_cast %558 : vector<8xf32> to vector<8x1xf32>
    %560 = vector.broadcast %559 : vector<8x1xf32> to vector<8x128xf32>
    %561 = arith.subf %557, %560 : vector<8x128xf32>
    %562 = math.exp %561 : vector<8x128xf32>
    %cst_368 = arith.constant dense<0.000000e+00> : vector<8xf32>
    %563 = vector.multi_reduction <add>, %562, %cst_368 [1] : vector<8x128xf32> to vector<8xf32>
    %564 = vector.shape_cast %563 : vector<8xf32> to vector<8x1xf32>
    %565 = tpu.reciprocal %564 : vector<8x1xf32> -> vector<8x1xf32>
    %566 = vector.broadcast %565 : vector<8x1xf32> to vector<8x128xf32>
    %567 = arith.mulf %562, %566 : vector<8x128xf32>
    %c0_369 = arith.constant 0 : index
    %c0_370 = arith.constant 0 : index
    %568 = vector.load %arg8[%c0_369, %c0_370] : memref<8x128xf32, #tpu.memory_space<vmem>>, vector<8x128xf32>
    tpu.vector_store %arg8[%c0_369, %c0_370], %567 {strides = array<i32>} : memref<8x128xf32, #tpu.memory_space<vmem>>, vector<8x128xf32>,
    return
  }
  func.func @transform_0(%arg0: i32, %arg1: memref<8x8xi32, #tpu.memory_space<smem>>) -> (i32, i32, i32) {
    %c0_i32 = arith.constant 0 : i32
    %c0_i32_0 = arith.constant 0 : i32
    %c0_i32_1 = arith.constant 0 : i32
    %c0_i32_2 = arith.constant 0 : i32
    return %c0_i32, %c0_i32_0, %c0_i32_1 : i32, i32, i32
  }
  func.func @transform_1(%arg0: i32, %arg1: memref<8x8xi32, #tpu.memory_space<smem>>) -> (i32, i32) {
    %c0_i32 = arith.constant 0 : i32
    %c0_i32_0 = arith.constant 0 : i32
    %c0_i32_1 = arith.constant 0 : i32
    return %c0_i32, %c0_i32_0 : i32, i32
  }
  func.func @transform_2(%arg0: i32, %arg1: memref<8x8xi32, #tpu.memory_space<smem>>) -> (i32, i32) {
    %c0_i32 = arith.constant 0 : i32
    %c0_i32_0 = arith.constant 0 : i32
    %c0_i32_1 = arith.constant 0 : i32
    return %c0_i32, %c0_i32_0 : i32, i32
  }
  func.func @transform_3(%arg0: i32, %arg1: memref<8x8xi32, #tpu.memory_space<smem>>) -> (i32, i32) {
    %c0_i32 = arith.constant 0 : i32
    %c0_i32_0 = arith.constant 0 : i32
    %c0_i32_1 = arith.constant 0 : i32
    return %c0_i32, %c0_i32_0 : i32, i32
  }
  func.func @transform_4(%arg0: i32, %arg1: memref<8x8xi32, #tpu.memory_space<smem>>) -> (i32, i32) {
    %c0_i32 = arith.constant 0 : i32
    %c0_i32_0 = arith.constant 0 : i32
    %c0_i32_1 = arith.constant 0 : i32
    return %c0_i32, %c0_i32_0 : i32, i32
  }
  func.func @transform_5(%arg0: i32, %arg1: memref<8x8xi32, #tpu.memory_space<smem>>) -> (i32, i32) {
    %c0_i32 = arith.constant 0 : i32
    %c0_i32_0 = arith.constant 0 : i32
    %c0_i32_1 = arith.constant 0 : i32
    return %c0_i32, %c0_i32_0 : i32, i32
  }
  func.func @transform_6(%arg0: i32, %arg1: memref<8x8xi32, #tpu.memory_space<smem>>) -> (i32, i32) {
    %c0_i32 = arith.constant 0 : i32
    %c0_i32_0 = arith.constant 0 : i32
    %c0_i32_1 = arith.constant 0 : i32
    return %c0_i32, %c0_i32_0 : i32, i32
  }
}

</mosaic_0001>

<bundles_post_ra>
// kernel: sentiment_forward.1
= control target key start
LH: loop header
LB: loop body
LE: loop exit
PB: predicated region body
PF: predicated region fallthrough
CT: control target
= control target key end

     0   :  { %s2240_s27 = smov [#allocation4]   ;;  %s4273_s0 = inlined_call_operand.vmem [shape: s32[8,8], index: 0, kind: input, shape index: {}]   ;;  %s4274_s1 = inlined_call_operand.vmem [shape: f32[104,1,128], index: 1, kind: input, shape index: {}]   ;;  %s4275_s2 = inlined_call_operand.vmem [shape: f32[128,512], index: 2, kind: input, shape index: {}]   ;;  %s4276_s3 = inlined_call_operand.vmem [shape: f32[128,512], index: 3, kind: input, shape index: {}]   ;;  %s4277_s4 = inlined_call_operand.vmem [shape: f32[1,512], index: 4, kind: input, shape index: {}]   ;;  %s4278_s5 = inlined_call_operand.vmem [shape: f32[128,128], index: 5, kind: input, shape index: {}]   ;;  %s4279_s6 = inlined_call_operand.vmem [shape: f32[1,128], index: 6, kind: input, shape index: {}]   ;;  %s4280_s7 = inlined_call_operand.vmem [shape: f32[8,128], index: 7, kind: output, shape index: {}]  }
   0x1   :  { %4348 = sst [smem:[#allocation52_spill]] %s4277_s4  ;;  %s13_s26 = sshll.u32 %s4273_s0, 4  ;;  %s14_s26 = int_to_ptr.vmem [resolvable:$true] %s13_s26 }
   0x2   :  { %4349 = sst [smem:[#allocation53_spill]] %s4278_s5 }
   0x3   :  { %4350 = sst [smem:[#allocation54_spill]] %s4279_s6 }
   0x4   :  { %4351 = sst [smem:[#allocation55_spill]] %s4280_s7 }
   0x5   :  { %16 = dma.vmem_to_smem %s14_s26, 128, %s2240_s27, [#allocation3] }
   0x6   :  { %2238 = dma.done.wait [#allocation3], 128 }
   0x7   :  { %2239 = vsyncadd [#allocation3], 4294967168 }
   0x8   :  { %19 = sfence }
   0x9   :  { %v356_v0 = vld [vmem:[%s4275_s2 + $0x1e0] sm:$0xff]  ;;  %v357_v1 = vld [vmem:[%s4275_s2 + $0x1e8] sm:$0xff]  ;;  %v358_v2 = vld [vmem:[%s4275_s2 + $0x1f0] sm:$0xff]  ;;  %s2327_s9 = sld [smem:[#allocation4]] }
   0xa   :  { %370 = vmatpush.msra.mxu0 %v356_v0  ;;  %411 = vmatpush.msra.mxu1 %v357_v1  ;;  %v359_v3 = vld [vmem:[%s4275_s2 + $0x1f8] sm:$0xff]  ;;  %v352_v4 = vld [vmem:[%s4275_s2 + $0x1c0] sm:$0xff]  ;;  %v353_v5 = vld [vmem:[%s4275_s2 + $0x1c8] sm:$0xff]  ;;  %s2335_s13 = sld [smem:[#allocation4 + $0x80]] }
   0xb   :  { %452 = vmatpush.msra.mxu2 %v358_v2  ;;  %493 = vmatpush.msra.mxu3 %v359_v3  ;;  %v354_v6 = vld [vmem:[%s4275_s2 + $0x1d0] sm:$0xff]  ;;  %v355_v7 = vld [vmem:[%s4275_s2 + $0x1d8] sm:$0xff]  ;;  %v348_v8 = vld [vmem:[%s4275_s2 + $0x1a0] sm:$0xff]  ;;  %s2343_s18 = sld [smem:[#allocation4 + $0x100]] }
   0xc   :  { %371 = vmatpush.msra.mxu0 %v352_v4  ;;  %412 = vmatpush.msra.mxu1 %v353_v5  ;;  %v349_v9 = vld [vmem:[%s4275_s2 + $0x1a8] sm:$0xff]  ;;  %v350_v10 = vld [vmem:[%s4275_s2 + $0x1b0] sm:$0xff]  ;;  %v351_v11 = vld [vmem:[%s4275_s2 + $0x1b8] sm:$0xff]  ;;  %s2351_s23 = sld [smem:[#allocation4 + $0x180]] }
   0xd   :  { %453 = vmatpush.msra.mxu2 %v354_v6  ;;  %494 = vmatpush.msra.mxu3 %v355_v7  ;;  %v344_v12 = vld [vmem:[%s4275_s2 + $0x180] sm:$0xff]  ;;  %v345_v13 = vld [vmem:[%s4275_s2 + $0x188] sm:$0xff]  ;;  %v346_v14 = vld [vmem:[%s4275_s2 + $0x190] sm:$0xff]  ;;  %s2359_s28 = sld [smem:[#allocation4 + $0x200]] }
   0xe   :  { %372 = vmatpush.msra.mxu0 %v348_v8  ;;  %413 = vmatpush.msra.mxu1 %v349_v9  ;;  %v347_v15 = vld [vmem:[%s4275_s2 + $0x198] sm:$0xff]  ;;  %v340_v16 = vld [vmem:[%s4275_s2 + $0x160] sm:$0xff]  ;;  %v341_v17 = vld [vmem:[%s4275_s2 + $0x168] sm:$0xff]  ;;  %s2367_s0 = sld [smem:[#allocation4 + $0x280]] }
   0xf   :  { %454 = vmatpush.msra.mxu2 %v350_v10  ;;  %495 = vmatpush.msra.mxu3 %v351_v11  ;;  %v342_v18 = vld [vmem:[%s4275_s2 + $0x170] sm:$0xff]  ;;  %v343_v19 = vld [vmem:[%s4275_s2 + $0x178] sm:$0xff]  ;;  %v336_v20 = vld [vmem:[%s4275_s2 + $0x140] sm:$0xff]  ;;  %s2375_s16 = sld [smem:[#allocation4 + $0x300]]  ;;  %s4352_s25 = scalar_lea.vmem %s4274_s1, %s2327_s9 }
  0x10   :  { %373 = vmatpush.msra.mxu0 %v344_v12  ;;  %414 = vmatpush.msra.mxu1 %v345_v13  ;;  %v337_v21 = vld [vmem:[%s4275_s2 + $0x148] sm:$0xff]  ;;  %v338_v22 = vld [vmem:[%s4275_s2 + $0x150] sm:$0xff]  ;;  %v339_v23 = vld [vmem:[%s4275_s2 + $0x158] sm:$0xff]  ;;  %s2383_s22 = sld [smem:[#allocation4 + $0x380]]  ;;  %s37_s14 = scalar_lea.vmem %s4274_s1, %s2335_s13 }
  0x11   :  { %455 = vmatpush.msra.mxu2 %v346_v14  ;;  %496 = vmatpush.msra.mxu3 %v347_v15  ;;  %v332_v24 = vld [vmem:[%s4275_s2 + $0x120] sm:$0xff]  ;;  %v333_v25 = vld [vmem:[%s4275_s2 + $0x128] sm:$0xff]  ;;  %v334_v26 = vld [vmem:[%s4275_s2 + $0x130] sm:$0xff]  ;;  %s2391_s29 = sld [smem:[#allocation4 + $0x1]]  ;;  %s41_s13 = scalar_lea.vmem %s4274_s1, %s2343_s18 }
  0x12   :  { %374 = vmatpush.msra.mxu0 %v340_v16  ;;  %415 = vmatpush.msra.mxu1 %v341_v17  ;;  %v335_v27 = vld [vmem:[%s4275_s2 + $0x138] sm:$0xff]  ;;  %v328_v28 = vld [vmem:[%s4275_s2 + $0x100] sm:$0xff]  ;;  %v329_v29 = vld [vmem:[%s4275_s2 + $0x108] sm:$0xff]  ;;  %s2399_s12 = sld [smem:[#allocation4 + $0x81]]  ;;  %s45_s18 = scalar_lea.vmem %s4274_s1, %s2351_s23 }
  0x13   :  { %456 = vmatpush.msra.mxu2 %v342_v18  ;;  %497 = vmatpush.msra.mxu3 %v343_v19  ;;  %v330_v30 = vld [vmem:[%s4275_s2 + $0x110] sm:$0xff]  ;;  %v331_v31 = vld [vmem:[%s4275_s2 + $0x118] sm:$0xff]  ;;  %v324_v32 = vld [vmem:[%s4275_s2 + $0xe0] sm:$0xff]  ;;  %s2407_s20 = sld [smem:[#allocation4 + $0x101]]  ;;  %s49_s23 = scalar_lea.vmem %s4274_s1, %s2359_s28 }
  0x14   :  { %375 = vmatpush.msra.mxu0 %v336_v20  ;;  %416 = vmatpush.msra.mxu1 %v337_v21  ;;  %v325_v33 = vld [vmem:[%s4275_s2 + $0xe8] sm:$0xff]  ;;  %v326_v34 = vld [vmem:[%s4275_s2 + $0xf0] sm:$0xff]  ;;  %v327_v35 = vld [vmem:[%s4275_s2 + $0xf8] sm:$0xff]  ;;  %s2415_s27 = sld [smem:[#allocation4 + $0x181]]  ;;  %s53_s30 = scalar_lea.vmem %s4274_s1, %s2367_s0 }
  0x15   :  { %457 = vmatpush.msra.mxu2 %v338_v22  ;;  %498 = vmatpush.msra.mxu3 %v339_v23  ;;  %v320_v36 = vld [vmem:[%s4275_s2 + $0xc0] sm:$0xff]  ;;  %v321_v37 = vld [vmem:[%s4275_s2 + $0xc8] sm:$0xff]  ;;  %s2427_s19 = sld [smem:[#allocation4 + $0x201]]  ;;  %v322_v38 = vld [vmem:[%s4275_s2 + $0xd0] sm:$0xff]  ;;  %s57_s0 = scalar_lea.vmem %s4274_s1, %s2375_s16 }
  0x16   :  { %376 = vmatpush.msra.mxu0 %v332_v24  ;;  %417 = vmatpush.msra.mxu1 %v333_v25  ;;  %v323_v39 = vld [vmem:[%s4275_s2 + $0xd8] sm:$0xff]  ;;  %v316_v40 = vld [vmem:[%s4275_s2 + $0xa0] sm:$0xff]  ;;  %s2442_s15 = sld [smem:[#allocation4 + $0x281]]  ;;  %v317_v41 = vld [vmem:[%s4275_s2 + $0xa8] sm:$0xff] }
  0x17   :  { %458 = vmatpush.msra.mxu2 %v334_v26  ;;  %499 = vmatpush.msra.mxu3 %v335_v27  ;;  %v318_v42 = vld [vmem:[%s4275_s2 + $0xb0] sm:$0xff]  ;;  %v319_v43 = vld [vmem:[%s4275_s2 + $0xb8] sm:$0xff]  ;;  %s2457_s11 = sld [smem:[#allocation4 + $0x301]]  ;;  %v312_v44 = vld [vmem:[%s4275_s2 + $0x80] sm:$0xff] }
  0x18   :  { %377 = vmatpush.msra.mxu0 %v328_v28  ;;  %418 = vmatpush.msra.mxu1 %v329_v29  ;;  %v313_v45 = vld [vmem:[%s4275_s2 + $0x88] sm:$0xff]  ;;  %v314_v46 = vld [vmem:[%s4275_s2 + $0x90] sm:$0xff]  ;;  %s2472_s10 = sld [smem:[#allocation4 + $0x381]]  ;;  %v315_v47 = vld [vmem:[%s4275_s2 + $0x98] sm:$0xff]  ;;  %s69_s26 = scalar_lea.vmem %s4274_s1, %s2399_s12 }
  0x19   :  { %459 = vmatpush.msra.mxu2 %v330_v30  ;;  %500 = vmatpush.msra.mxu3 %v331_v31  ;;  %v308_v48 = vld [vmem:[%s4275_s2 + $0x60] sm:$0xff]  ;;  %v309_v49 = vld [vmem:[%s4275_s2 + $0x68] sm:$0xff]  ;;  %s2487_s8 = sld [smem:[#allocation4 + $0x2]]  ;;  %v310_v50 = vld [vmem:[%s4275_s2 + $0x70] sm:$0xff]  ;;  %s73_s12 = scalar_lea.vmem %s4274_s1, %s2407_s20 }
  0x1a   :  { %378 = vmatpush.msra.mxu0 %v324_v32  ;;  %419 = vmatpush.msra.mxu1 %v325_v33  ;;  %v311_v51 = vld [vmem:[%s4275_s2 + $0x78] sm:$0xff]  ;;  %v34_v52 = vld [vmem:[%s4352_s25] sm:$0x1]  ;;  %s2504_s4 = sld [smem:[#allocation4 + $0x82]]  ;;  %v305_v55 = vld [vmem:[%s4275_s2 + $0x48] sm:$0xff] }
  0x1b   :  { %460 = vmatpush.msra.mxu2 %v326_v34  ;;  %501 = vmatpush.msra.mxu3 %v327_v35  ;;  %v38_v53 = vld [vmem:[%s37_s14] sm:$0x1]  ;;  %35 = vst [vmem:[#allocation2] sm:$0x1] %v34_v52  ;;  %v306_v58 = vld [vmem:[%s4275_s2 + $0x50] sm:$0xff]  ;;  %v307_v59 = vld [vmem:[%s4275_s2 + $0x58] sm:$0xff]  ;;  %s65_s14 = scalar_lea.vmem %s4274_s1, %s2391_s29 }
  0x1c   :  { %379 = vmatpush.msra.mxu0 %v320_v36  ;;  %420 = vmatpush.msra.mxu1 %v321_v37  ;;  %v304_v54 = vld [vmem:[%s4275_s2 + $0x40] sm:$0xff]  ;;  %39 = vst [vmem:[#allocation2 + $0x1] sm:$0x1] %v38_v53  ;;  %s2526_s5 = sld [smem:[#allocation4 + $0x102]]  ;;  %v301_v62 = vld [vmem:[%s4275_s2 + $0x28] sm:$0xff]  ;;  %v302_v0 = vld [vmem:[%s4275_s2 + $0x30] sm:$0xff]  ;;  %s85_s16 = scalar_lea.vmem %s4274_s1, %s2442_s15 }
  0x1d   :  { %461 = vmatpush.msra.mxu2 %v322_v38  ;;  %502 = vmatpush.msra.mxu3 %v323_v39  ;;  %v42_v56 = vld [vmem:[%s41_s13] sm:$0x1]  ;;  %v303_v1 = vld [vmem:[%s4275_s2 + $0x38] sm:$0xff]  ;;  %s2548_s13 = sld [smem:[#allocation4 + $0x182]]  ;;  %v297_v4 = vld [vmem:[%s4275_s2 + $0x8] sm:$0xff]  ;;  %s89_s15 = scalar_lea.vmem %s4274_s1, %s2457_s11 }
  0x1e   :  { %380 = vmatpush.msra.mxu0 %v316_v40  ;;  %421 = vmatpush.msra.mxu1 %v317_v41  ;;  %v46_v57 = vld [vmem:[%s45_s18] sm:$0x1]  ;;  %s61_s18 = scalar_lea.vmem %s4274_s1, %s2383_s22  ;;  %43 = vst [vmem:[#allocation2 + $0x2] sm:$0x1] %v42_v56  ;;  %s77_s22 = scalar_lea.vmem %s4274_s1, %s2415_s27  ;;  %v298_v7 = vld [vmem:[%s4275_s2 + $0x10] sm:$0xff]  ;;  %v299_v8 = vld [vmem:[%s4275_s2 + $0x18] sm:$0xff] }
  0x1f   :  { %462 = vmatpush.msra.mxu2 %v318_v42  ;;  %503 = vmatpush.msra.mxu3 %v319_v43  ;;  %v50_v60 = vld [vmem:[%s49_s23] sm:$0x1]  ;;  %47 = vst [vmem:[#allocation2 + $0x3] sm:$0x1] %v46_v57  ;;  %s2564_s24 = sld [smem:[#allocation4 + $0x202]]  ;;  %s81_s27 = scalar_lea.vmem %s4274_s1, %s2427_s19  ;;  %v2588_v11 = vld [vmem:[%s4276_s3 + $0x1e8] sm:$0xff] }
  0x20   :  { %381 = vmatpush.msra.mxu0 %v312_v44  ;;  %422 = vmatpush.msra.mxu1 %v313_v45  ;;  %v300_v61 = vld [vmem:[%s4275_s2 + $0x20] sm:$0xff]  ;;  %51 = vst [vmem:[#allocation2 + $0x4] sm:$0x1] %v50_v60  ;;  %v2602_v14 = vld [vmem:[%s4276_s3 + $0x1f8] sm:$0xff]  ;;  %s97_s20 = scalar_lea.vmem %s4274_s1, %s2487_s8  ;;  %s101_s29 = scalar_lea.vmem %s4274_s1, %s2504_s4  ;;  %v2619_v18 = vld [vmem:[%s4276_s3 + $0x1c8] sm:$0xff] }
  0x21   :  { %463 = vmatpush.msra.mxu2 %v314_v46  ;;  %504 = vmatpush.msra.mxu3 %v315_v47  ;;  %v54_v63 = vld [vmem:[%s53_s30] sm:$0x1]  ;;  %v2624_v20 = vld [vmem:[%s4276_s3 + $0x1f0] sm:$0xff]  ;;  %v2635_v22 = vld [vmem:[%s4276_s3 + $0x1d8] sm:$0xff]  ;;  %s2659_s25 = sld [smem:[#allocation4 + $0x282]] }
  0x22   :  { %382 = vmatpush.msra.mxu0 %v308_v48  ;;  %423 = vmatpush.msra.mxu1 %v309_v49  ;;  %v58_v2 = vld [vmem:[%s57_s0] sm:$0x1]  ;;  %55 = vst [vmem:[#allocation2 + $0x5] sm:$0x1] %v54_v63  ;;  %s105_s17 = scalar_lea.vmem %s4274_s1, %s2526_s5  ;;  %v2646_v24 = vld [vmem:[%s4276_s3 + $0x1a8] sm:$0xff]  ;;  %v2677_v31 = vld [vmem:[%s4276_s3 + $0x1b8] sm:$0xff] }
  0x23   :  { %464 = vmatpush.msra.mxu2 %v310_v50  ;;  %505 = vmatpush.msra.mxu3 %v311_v51  ;;  %v296_v3 = vld [vmem:[%s4275_s2] sm:$0xff]  ;;  %59 = vst [vmem:[#allocation2 + $0x6] sm:$0x1] %v58_v2  ;;  %s109_s23 = scalar_lea.vmem %s4274_s1, %s2548_s13  ;;  %v2670_v30 = vld [vmem:[%s4276_s3 + $0x188] sm:$0xff]  ;;  %s2679_s30 = sld [smem:[#allocation4 + $0x382]]  ;;  %v2684_v32 = vld [vmem:[%s4276_s3 + $0x1d0] sm:$0xff] }
  0x24   :  { %v62_v5 = vld [vmem:[%s61_s18] sm:$0x1]  ;;  %383 = vmatpush.msra.mxu0 %v304_v54  ;;  %424 = vmatpush.msra.mxu1 %v305_v55  ;;  %s93_s18 = scalar_lea.vmem %s4274_s1, %s2472_s10  ;;  %v2691_v35 = vld [vmem:[%s4276_s3 + $0x198] sm:$0xff]  ;;  %v2696_v36 = vld [vmem:[%s4276_s3 + $0x1b0] sm:$0xff]  ;;  %s2712_s19 = sld [smem:[#allocation4 + $0x83]] }
  0x25   :  { %v66_v6 = vld [vmem:[%s65_s14] sm:$0x1]  ;;  %465 = vmatpush.msra.mxu2 %v306_v58  ;;  %506 = vmatpush.msra.mxu3 %v307_v59  ;;  %63 = vst [vmem:[#allocation2 + $0x7] sm:$0x1] %v62_v5  ;;  %v2709_v38 = vld [vmem:[%s4276_s3 + $0x168] sm:$0xff]  ;;  %v2723_v39 = vld [vmem:[%s4276_s3 + $0x178] sm:$0xff] }
  0x26   :  { %v70_v9 = vld [vmem:[%s69_s26] sm:$0x1]  ;;  %384 = vmatpush.msra.mxu0 %v300_v61  ;;  %425 = vmatpush.msra.mxu1 %v301_v62  ;;  %67 = vst [vmem:[#allocation2 + $0x8] sm:$0x1] %v66_v6  ;;  %s2725_s9 = sld [smem:[#allocation4 + $0x103]]  ;;  %v2730_v40 = vld [vmem:[%s4276_s3 + $0x190] sm:$0xff] }
  0x27   :  { %v2583_v10 = vld [vmem:[%s4276_s3 + $0x1e0] sm:$0xff]  ;;  %466 = vmatpush.msra.mxu2 %v302_v0  ;;  %507 = vmatpush.msra.mxu3 %v303_v1  ;;  %71 = vst [vmem:[#allocation2 + $0x9] sm:$0x1] %v70_v9  ;;  %v2745_v43 = vld [vmem:[%s4276_s3 + $0x148] sm:$0xff]  ;;  %s2756_s10 = sld [smem:[#allocation4 + $0x203]]  ;;  %v2779_v49 = vld [vmem:[%s4276_s3 + $0x158] sm:$0xff] }
  0x28   :  { %v74_v12 = vld [vmem:[%s73_s12] sm:$0x1]  ;;  %385 = vmatpush.msra.mxu0 %v296_v3  ;;  %426 = vmatpush.msra.mxu1 %v297_v4  ;;  %s113_s12 = scalar_lea.vmem %s4274_s1, %s2564_s24  ;;  %v2767_v48 = vld [vmem:[%s4276_s3 + $0x128] sm:$0xff]  ;;  %s2774_s5 = sld [smem:[#allocation4 + $0x283]]  ;;  %v2784_v50 = vld [vmem:[%s4276_s3 + $0x170] sm:$0xff] }
  0x29   :  { %v2597_v13 = vld [vmem:[%s4276_s3 + $0x1c0] sm:$0xff]  ;;  %467 = vmatpush.msra.mxu2 %v298_v7  ;;  %508 = vmatpush.msra.mxu3 %v299_v8  ;;  %75 = vst [vmem:[#allocation2 + $0xa] sm:$0x1] %v74_v12  ;;  %s125_s7 = scalar_lea.vmem %s4274_s1, %s2679_s30  ;;  %v2800_v53 = vld [vmem:[%s4276_s3 + $0x108] sm:$0xff]  ;;  %v2805_v54 = vld [vmem:[%s4276_s3 + $0x138] sm:$0xff]  ;;  %s2826_s2 = sld [smem:[#allocation4 + $0x4]] }
  0x2a   :  { %v78_v15 = vld [vmem:[%s77_s22] sm:$0x1]  ;;  %598 = vmatpush.msrb.mxu0 %v2583_v10  ;;  %618 = vmatpush.msrb.mxu1 %v2588_v11  ;;  %v2818_v56 = vld [vmem:[%s4276_s3 + $0x118] sm:$0xff]  ;;  %v2855_v61 = vld [vmem:[%s4276_s3 + $0xe8] sm:$0xff]  ;;  %s2890_s21 = sld [smem:[#allocation4 + $0x304]] }
  0x2b   :  { %v82_v16 = vld [vmem:[%s81_s27] sm:$0x1]  ;;  %79 = vst [vmem:[#allocation2 + $0xb] sm:$0x1] %v78_v15  ;;  %658 = vmatpush.msrb.mxu3 %v2602_v14  ;;  %638 = vmatpush.msrb.mxu2 %v2624_v20  ;;  %v2860_v62 = vld [vmem:[%s4276_s3 + $0x150] sm:$0xff]  ;;  %v2878_v2 = vld [vmem:[%s4276_s3 + $0xc8] sm:$0xff] }
  0x2c   :  { %v86_v17 = vld [vmem:[%s85_s16] sm:$0x1]  ;;  %83 = vst [vmem:[#allocation2 + $0xc] sm:$0x1] %v82_v16  ;;  %599 = vmatpush.msrb.mxu0 %v2597_v13  ;;  %619 = vmatpush.msrb.mxu1 %v2619_v18  ;;  %s2698_s16 = sld [smem:[#allocation4 + $0x3]]  ;;  %s137_s22 = scalar_lea.vmem %s4274_s1, %s2725_s9  ;;  %v2907_v7 = vld [vmem:[%s4276_s3 + $0xf8] sm:$0xff] }
  0x2d   :  { %v90_v19 = vld [vmem:[%s89_s15] sm:$0x1]  ;;  %87 = vst [vmem:[#allocation2 + $0xd] sm:$0x1] %v86_v17  ;;  %659 = vmatpush.msrb.mxu3 %v2635_v22  ;;  %639 = vmatpush.msrb.mxu2 %v2684_v32  ;;  %s117_s15 = scalar_lea.vmem %s4274_s1, %s2659_s25  ;;  %s145_s26 = scalar_lea.vmem %s4274_s1, %s2756_s10  ;;  %v2912_v8 = vld [vmem:[%s4276_s3 + $0x130] sm:$0xff] }
  0x2e   :  { %v94_v21 = vld [vmem:[%s93_s18] sm:$0x1]  ;;  %91 = vst [vmem:[#allocation2 + $0xe] sm:$0x1] %v90_v19  ;;  %620 = vmatpush.msrb.mxu1 %v2646_v24  ;;  %s2790_s18 = sld [smem:[#allocation4 + $0x303]] }
  0x2f   :  { %v2641_v23 = vld [vmem:[%s4276_s3 + $0x1a0] sm:$0xff]  ;;  %95 = vst [vmem:[#allocation2 + $0xf] sm:$0x1] %v94_v21  ;;  %660 = vmatpush.msrb.mxu3 %v2677_v31  ;;  %640 = vmatpush.msrb.mxu2 %v2696_v36  ;;  %s2896_s6 = sld [smem:[#allocation4 + $0x384]] }
  0x30   :  { %v98_v25 = vld [vmem:[%s97_s20] sm:$0x1]  ;;  %s2672_s20 = sld [smem:[#allocation4 + $0x302]]  ;;  %600 = vmatpush.msrb.mxu0 %v2641_v23  ;;  %621 = vmatpush.msrb.mxu1 %v2670_v30 }
  0x31   :  { %v102_v26 = vld [vmem:[%s101_s29] sm:$0x1]  ;;  %99 = vst [vmem:[#allocation2 + $0x10] sm:$0x1] %v98_v25  ;;  %661 = vmatpush.msrb.mxu3 %v2691_v35  ;;  %s2748_s29 = sld [smem:[#allocation4 + $0x183]]  ;;  %641 = vmatpush.msrb.mxu2 %v2730_v40 }
  0x32   :  { %v106_v27 = vld [vmem:[%s105_s17] sm:$0x1]  ;;  %103 = vst [vmem:[#allocation2 + $0x11] sm:$0x1] %v102_v26  ;;  %622 = vmatpush.msrb.mxu1 %v2709_v38  ;;  %s129_s0 = scalar_lea.vmem %s4274_s1, %s2698_s16  ;;  %s133_s16 = scalar_lea.vmem %s4274_s1, %s2712_s19  ;;  %v2962_v26 = vld [vmem:[%s4276_s3 + $0xa8] sm:$0xff] }
  0x33   :  { %v288_v28 = vld [vmem:[#allocation2] sm:$0xff]  ;;  %107 = vst [vmem:[#allocation2 + $0x12] sm:$0x1] %v106_v27  ;;  %662 = vmatpush.msrb.mxu3 %v2723_v39  ;;  %642 = vmatpush.msrb.mxu2 %v2784_v50  ;;  %s2866_s19 = sld [smem:[#allocation4 + $0x204]]  ;;  %v2967_v27 = vld [vmem:[%s4276_s3 + $0xd8] sm:$0xff] }
  0x34   :  { %v2665_v29 = vld [vmem:[%s4276_s3 + $0x180] sm:$0xff]  ;;  %386 = vmatmul.f32.vlgmr.msra.gmra.mxu0 %v288_v28  ;;  %427 = vmatmul.f32.vlgmr.msra.gmra.mxu1 %v288_v28  ;;  %s153_s14 = scalar_lea.vmem %s4274_s1, %s2790_s18  ;;  %s2928_s8 = sld [smem:[#allocation4 + $0x85]] }
  0x35   :  { %468 = vmatmul.f32.vlgmr.msra.gmra.mxu2 %v288_v28  ;;  %509 = vmatmul.f32.vlgmr.msra.gmra.mxu3 %v288_v28  ;;  %v110_v33 = vld [vmem:[%s109_s23] sm:$0x1]  ;;  %s3067_s11 = sld [smem:[#allocation4 + $0x286]] }
  0x36   :  { %v114_v34 = vld [vmem:[%s113_s12] sm:$0x1]  ;;  %601 = vmatpush.msrb.mxu0 %v2665_v29  ;;  %111 = vst [vmem:[#allocation2 + $0x13] sm:$0x1] %v110_v33  ;;  %s121_s13 = scalar_lea.vmem %s4274_s1, %s2672_s20  ;;  %v289_v45 = vld [vmem:[#allocation2 + $0x8] sm:$0xff]  ;;  %623 = vmatpush.msrb.mxu1 %v2745_v43  ;;  %s149_s12 = scalar_lea.vmem %s4274_s1, %s2774_s5  ;;  %v2978_v33 = vld [vmem:[%s4276_s3 + $0x110] sm:$0xff] }
  0x37   :  { %v2704_v37 = vld [vmem:[%s4276_s3 + $0x160] sm:$0xff]  ;;  %115 = vst [vmem:[#allocation2 + $0x14] sm:$0x1] %v114_v34  ;;  %s141_s30 = scalar_lea.vmem %s4274_s1, %s2748_s29  ;;  %663 = vmatpush.msrb.mxu3 %v2779_v49  ;;  %s2837_s29 = sld [smem:[#allocation4 + $0x104]]  ;;  %643 = vmatpush.msrb.mxu2 %v2860_v62 }
  0x38   :  { %v118_v41 = vld [vmem:[%s117_s15] sm:$0x1]  ;;  %602 = vmatpush.msrb.mxu0 %v2704_v37  ;;  %624 = vmatpush.msrb.mxu1 %v2767_v48  ;;  %s2834_s15 = sld [smem:[#allocation4 + $0x84]] }
  0x39   :  { %v2740_v42 = vld [vmem:[%s4276_s3 + $0x140] sm:$0xff]  ;;  %119 = vst [vmem:[#allocation2 + $0x15] sm:$0x1] %v118_v41  ;;  %664 = vmatpush.msrb.mxu3 %v2805_v54  ;;  %s177_s27 = scalar_lea.vmem %s4274_s1, %s2866_s19  ;;  %644 = vmatpush.msrb.mxu2 %v2912_v8  ;;  %s185_s19 = scalar_lea.vmem %s4274_s1, %s2890_s21 }
  0x3a   :  { %v122_v44 = vld [vmem:[%s121_s13] sm:$0x1]  ;;  %603 = vmatpush.msrb.mxu0 %v2740_v42  ;;  %625 = vmatpush.msrb.mxu1 %v2800_v53  ;;  %s2973_s20 = sld [smem:[#allocation4 + $0x305]] }
  0x3b   :  { %123 = vst [vmem:[#allocation2 + $0x16] sm:$0x1] %v122_v44  ;;  %v126_v46 = vld [vmem:[%s125_s7] sm:$0x1]  ;;  %s2813_s7 = sld [smem:[#allocation4 + $0x383]]  ;;  %665 = vmatpush.msrb.mxu3 %v2818_v56  ;;  %645 = vmatpush.msrb.mxu2 %v2978_v33 }
  0x3c   :  { %v2762_v47 = vld [vmem:[%s4276_s3 + $0x120] sm:$0xff]  ;;  %389 = vmatmul.f32.gmra.mxu0 %v289_v45  ;;  %430 = vmatmul.f32.gmra.mxu1 %v289_v45  ;;  %127 = vst [vmem:[#allocation2 + $0x17] sm:$0x1] %v126_v46  ;;  %v3007_v46 = vld [vmem:[%s4276_s3 + $0xb8] sm:$0xff]  ;;  %s3107_s9 = sld [smem:[#allocation4 + $0x386]] }
  0x3d   :  { %471 = vmatmul.f32.gmra.mxu2 %v289_v45  ;;  %512 = vmatmul.f32.gmra.mxu3 %v289_v45  ;;  %v130_v51 = vld [vmem:[%s129_s0] sm:$0x1]  ;;  %v3002_v45 = vld [vmem:[%s4276_s3 + $0x88] sm:$0xff]  ;;  %s3125_s21 = sld [smem:[#allocation4 + $0x7]] }
  0x3e   :  { %v2795_v52 = vld [vmem:[%s4276_s3 + $0x100] sm:$0xff]  ;;  %131 = vst [vmem:[#allocation2 + $0x18] sm:$0x1] %v130_v51  ;;  %604 = vmatpush.msrb.mxu0 %v2762_v47  ;;  %626 = vmatpush.msrb.mxu1 %v2855_v61  ;;  %s3140_s5 = sld [smem:[#allocation4 + $0x107]] }
  0x3f   :  { %v134_v55 = vld [vmem:[%s133_s16] sm:$0x1]  ;;  %s2850_s16 = sld [smem:[#allocation4 + $0x184]]  ;;  %666 = vmatpush.msrb.mxu3 %v2907_v7 }
  0x40   :  { %135 = vst [vmem:[#allocation2 + $0x19] sm:$0x1] %v134_v55  ;;  %v138_v57 = vld [vmem:[%s137_s22] sm:$0x1]  ;;  %605 = vmatpush.msrb.mxu0 %v2795_v52  ;;  %627 = vmatpush.msrb.mxu1 %v2878_v2  ;;  %v3018_v55 = vld [vmem:[%s4276_s3 + $0xf0] sm:$0xff]  ;;  %s245_s22 = scalar_lea.vmem %s4274_s1, %s3067_s11 }
  0x41   :  { %139 = vst [vmem:[#allocation2 + $0x1a] sm:$0x1] %v138_v57  ;;  %v142_v58 = vld [vmem:[%s141_s30] sm:$0x1]  ;;  %s157_s4 = scalar_lea.vmem %s4274_s1, %s2813_s7  ;;  %s2884_s30 = sld [smem:[#allocation4 + $0x284]]  ;;  %667 = vmatpush.msrb.mxu3 %v2967_v27  ;;  %646 = vmatpush.msrb.mxu2 %v3018_v55 }
  0x42   :  { %143 = vst [vmem:[#allocation2 + $0x1b] sm:$0x1] %v142_v58  ;;  %v146_v59 = vld [vmem:[%s145_s26] sm:$0x1]  ;;  %s161_s26 = scalar_lea.vmem %s4274_s1, %s2826_s2  ;;  %s165_s7 = scalar_lea.vmem %s4274_s1, %s2834_s15  ;;  %628 = vmatpush.msrb.mxu1 %v2962_v26 }
  0x43   :  { %v2842_v60 = vld [vmem:[%s4276_s3 + $0xe0] sm:$0xff]  ;;  %147 = vst [vmem:[#allocation2 + $0x1c] sm:$0x1] %v146_v59  ;;  %v290_v63 = vld [vmem:[#allocation2 + $0x10] sm:$0xff]  ;;  %s169_s2 = scalar_lea.vmem %s4274_s1, %s2837_s29  ;;  %s2920_s29 = sld [smem:[#allocation4 + $0x5]]  ;;  %668 = vmatpush.msrb.mxu3 %v3007_v46  ;;  %v3039_v59 = vld [vmem:[%s4276_s3 + $0x68] sm:$0xff] }
  0x44   :  { %v150_v0 = vld [vmem:[%s149_s12] sm:$0x1]  ;;  %392 = vmatmul.f32.gmra.mxu0 %v290_v63  ;;  %433 = vmatmul.f32.gmra.mxu1 %v290_v63  ;;  %s2946_s12 = sld [smem:[#allocation4 + $0x205]] }
  0x45   :  { %v2873_v1 = vld [vmem:[%s4276_s3 + $0xc0] sm:$0xff]  ;;  %151 = vst [vmem:[#allocation2 + $0x1d] sm:$0x1] %v150_v0  ;;  %474 = vmatmul.f32.gmra.mxu2 %v290_v63  ;;  %515 = vmatmul.f32.gmra.mxu3 %v290_v63  ;;  %v3044_v63 = vld [vmem:[%s4276_s3 + $0x98] sm:$0xff]  ;;  %s3084_s15 = sld [smem:[#allocation4 + $0x306]] }
  0x46   :  { %v154_v3 = vld [vmem:[%s153_s14] sm:$0x1]  ;;  %606 = vmatpush.msrb.mxu0 %v2842_v60  ;;  %s173_s14 = scalar_lea.vmem %s4274_s1, %s2850_s16  ;;  %629 = vmatpush.msrb.mxu1 %v3002_v45 }
  0x47   :  { %155 = vst [vmem:[#allocation2 + $0x1e] sm:$0x1] %v154_v3  ;;  %v158_v4 = vld [vmem:[%s157_s4] sm:$0x1]  ;;  %s181_s17 = scalar_lea.vmem %s4274_s1, %s2884_s30  ;;  %s2934_s4 = sld [smem:[#allocation4 + $0x105]]  ;;  %669 = vmatpush.msrb.mxu3 %v3044_v63 }
  0x48   :  { %159 = vst [vmem:[#allocation2 + $0x1f] sm:$0x1] %v158_v4  ;;  %v162_v5 = vld [vmem:[%s161_s26] sm:$0x1]  ;;  %607 = vmatpush.msrb.mxu0 %v2873_v1  ;;  %s2940_s26 = sld [smem:[#allocation4 + $0x185]]  ;;  %630 = vmatpush.msrb.mxu1 %v3039_v59  ;;  %v3057_v4 = vld [vmem:[%s4276_s3 + $0xd0] sm:$0xff] }
  0x49   :  { %163 = vst [vmem:[#allocation2 + $0x20] sm:$0x1] %v162_v5  ;;  %v166_v6 = vld [vmem:[%s165_s7] sm:$0x1]  ;;  %s189_s7 = scalar_lea.vmem %s4274_s1, %s2896_s6  ;;  %s193_s13 = scalar_lea.vmem %s4274_s1, %s2920_s29  ;;  %647 = vmatpush.msrb.mxu2 %v3057_v4 }
  0x4a   :  { %167 = vst [vmem:[#allocation2 + $0x21] sm:$0x1] %v166_v6  ;;  %v170_v9 = vld [vmem:[%s169_s2] sm:$0x1]  ;;  %s2957_s6 = sld [smem:[#allocation4 + $0x285]]  ;;  %s197_s29 = scalar_lea.vmem %s4274_s1, %s2928_s8 }
  0x4b   :  { %171 = vst [vmem:[#allocation2 + $0x22] sm:$0x1] %v170_v9  ;;  %v174_v12 = vld [vmem:[%s173_s14] sm:$0x1]  ;;  %s2989_s8 = sld [smem:[#allocation4 + $0x385]] }
  0x4c   :  { %175 = vst [vmem:[#allocation2 + $0x23] sm:$0x1] %v174_v12  ;;  %v178_v15 = vld [vmem:[%s177_s27] sm:$0x1]  ;;  %s3063_s30 = sld [smem:[#allocation4 + $0x186]]  ;;  %v3078_v12 = vld [vmem:[%s4276_s3 + $0x48] sm:$0xff] }
  0x4d   :  { %179 = vst [vmem:[#allocation2 + $0x24] sm:$0x1] %v178_v15  ;;  %v182_v16 = vld [vmem:[%s181_s17] sm:$0x1]  ;;  %s201_s0 = scalar_lea.vmem %s4274_s1, %s2934_s4  ;;  %s3065_s4 = sld [smem:[#allocation4 + $0x206]]  ;;  %631 = vmatpush.msrb.mxu1 %v3078_v12  ;;  %v3091_v15 = vld [vmem:[%s4276_s3 + $0xb0] sm:$0xff] }
  0x4e   :  { %183 = vst [vmem:[#allocation2 + $0x25] sm:$0x1] %v182_v16  ;;  %v186_v17 = vld [vmem:[%s185_s19] sm:$0x1]  ;;  %s205_s10 = scalar_lea.vmem %s4274_s1, %s2940_s26  ;;  %s209_s26 = scalar_lea.vmem %s4274_s1, %s2946_s12  ;;  %v3096_v16 = vld [vmem:[%s4276_s3 + $0x78] sm:$0xff]  ;;  %648 = vmatpush.msrb.mxu2 %v3091_v15 }
  0x4f   :  { %v291_v19 = vld [vmem:[#allocation2 + $0x18] sm:$0xff]  ;;  %187 = vst [vmem:[#allocation2 + $0x26] sm:$0x1] %v186_v17  ;;  %v190_v21 = vld [vmem:[%s189_s7] sm:$0x1]  ;;  %s3027_s12 = sld [smem:[#allocation4 + $0x6]]  ;;  %670 = vmatpush.msrb.mxu3 %v3096_v16 }
  0x50   :  { %v2951_v25 = vld [vmem:[%s4276_s3 + $0xa0] sm:$0xff]  ;;  %395 = vmatmul.f32.gmra.mxu0 %v291_v19  ;;  %436 = vmatmul.f32.gmra.mxu1 %v291_v19  ;;  %191 = vst [vmem:[#allocation2 + $0x27] sm:$0x1] %v190_v21  ;;  %s213_s14 = scalar_lea.vmem %s4274_s1, %s2957_s6  ;;  %s217_s6 = scalar_lea.vmem %s4274_s1, %s2973_s20  ;;  %v3101_v17 = vld [vmem:[%s4276_s3 + $0x90] sm:$0xff] }
  0x51   :  { %477 = vmatmul.f32.gmra.mxu2 %v291_v19  ;;  %518 = vmatmul.f32.gmra.mxu3 %v291_v19  ;;  %v194_v28 = vld [vmem:[%s193_s13] sm:$0x1]  ;;  %s221_s20 = scalar_lea.vmem %s4274_s1, %s2989_s8  ;;  %s3134_s13 = sld [smem:[#allocation4 + $0x87]] }
  0x52   :  { %v2983_v34 = vld [vmem:[%s4276_s3 + $0x80] sm:$0xff]  ;;  %195 = vst [vmem:[#allocation2 + $0x28] sm:$0x1] %v194_v28  ;;  %608 = vmatpush.msrb.mxu0 %v2951_v25  ;;  %v3119_v28 = vld [vmem:[%s4276_s3 + $0x28] sm:$0xff]  ;;  %649 = vmatpush.msrb.mxu2 %v3101_v17  ;;  %s3161_s19 = sld [smem:[#allocation4 + $0x207]] }
  0x53   :  { %v198_v41 = vld [vmem:[%s197_s29] sm:$0x1]  ;;  %s3033_s29 = sld [smem:[#allocation4 + $0x86]]  ;;  %4353 = vst [vmem:[#allocation6_spill] sm:$0xff] %v3119_v28  ;;  %632 = vmatpush.msrb.mxu1 %v3119_v28 }
  0x54   :  { %199 = vst [vmem:[#allocation2 + $0x29] sm:$0x1] %v198_v41  ;;  %v202_v44 = vld [vmem:[%s201_s0] sm:$0x1]  ;;  %609 = vmatpush.msrb.mxu0 %v2983_v34  ;;  %s3050_s0 = sld [smem:[#allocation4 + $0x106]] }
  0x55   :  { %203 = vst [vmem:[#allocation2 + $0x2a] sm:$0x1] %v202_v44  ;;  %v206_v51 = vld [vmem:[%s205_s10] sm:$0x1]  ;;  %s225_s28 = scalar_lea.vmem %s4274_s1, %s3027_s12  ;;  %s249_s12 = scalar_lea.vmem %s4274_s1, %s3084_s15 }
  0x56   :  { %v3023_v57 = vld [vmem:[%s4276_s3 + $0x60] sm:$0xff]  ;;  %207 = vst [vmem:[#allocation2 + $0x2b] sm:$0x1] %v206_v51  ;;  %s257_s10 = scalar_lea.vmem %s4274_s1, %s3125_s21  ;;  %s3180_s21 = sld [smem:[#allocation4 + $0x387]] }
  0x57   :  { %v210_v58 = vld [vmem:[%s209_s26] sm:$0x1]  ;;  %610 = vmatpush.msrb.mxu0 %v3023_v57  ;;  %s237_s26 = scalar_lea.vmem %s4274_s1, %s3063_s30  ;;  %s3146_s30 = sld [smem:[#allocation4 + $0x187]] }
  0x58   :  { %211 = vst [vmem:[#allocation2 + $0x2c] sm:$0x1] %v210_v58  ;;  %v292_v0 = vld [vmem:[#allocation2 + $0x20] sm:$0xff]  ;;  %s261_s2 = scalar_lea.vmem %s4274_s1, %s3134_s13  ;;  %s273_s11 = scalar_lea.vmem %s4274_s1, %s3161_s19 }
  0x59   :  { %v214_v3 = vld [vmem:[%s213_s14] sm:$0x1]  ;;  %398 = vmatmul.f32.gmra.mxu0 %v292_v0  ;;  %439 = vmatmul.f32.gmra.mxu1 %v292_v0  ;;  %s229_s17 = scalar_lea.vmem %s4274_s1, %s3033_s29  ;;  %s3167_s29 = sld [smem:[#allocation4 + $0x287]] }
  0x5a   :  { %215 = vst [vmem:[#allocation2 + $0x2d] sm:$0x1] %v214_v3  ;;  %v218_v5 = vld [vmem:[%s217_s6] sm:$0x1]  ;;  %480 = vmatmul.f32.gmra.mxu2 %v292_v0  ;;  %521 = vmatmul.f32.gmra.mxu3 %v292_v0  ;;  %s253_s6 = scalar_lea.vmem %s4274_s1, %s3107_s9  ;;  %s3173_s9 = sld [smem:[#allocation4 + $0x307]] }
  0x5b   :  { %219 = vst [vmem:[#allocation2 + $0x2e] sm:$0x1] %v218_v5  ;;  %v222_v6 = vld [vmem:[%s221_s20] sm:$0x1]  ;;  %s233_s20 = scalar_lea.vmem %s4274_s1, %s3050_s0  ;;  %v3155_v5 = vld [vmem:[%s4276_s3 + $0x70] sm:$0xff]  ;;  %s265_s0 = scalar_lea.vmem %s4274_s1, %s3140_s5 }
  0x5c   :  { %223 = vst [vmem:[#allocation2 + $0x2f] sm:$0x1] %v222_v6  ;;  %v3073_v9 = vld [vmem:[%s4276_s3 + $0x40] sm:$0xff]  ;;  %650 = vmatpush.msrb.mxu2 %v3155_v5  ;;  %s285_s13 = scalar_lea.vmem %s4274_s1, %s3180_s21  ;;  %s4361_s21 = sld [smem:[#allocation52_spill]] }
  0x5d   :  { %611 = vmatpush.msrb.mxu0 %v3073_v9  ;;  %v226_v19 = vld [vmem:[%s225_s28] sm:$0x1]  ;;  %s241_s28 = scalar_lea.vmem %s4274_s1, %s3065_s4  ;;  %s269_s24 = scalar_lea.vmem %s4274_s1, %s3146_s30 }
  0x5e   :  { %v3114_v21 = vld [vmem:[%s4276_s3 + $0x20] sm:$0xff]  ;;  %227 = vst [vmem:[#allocation2 + $0x30] sm:$0x1] %v226_v19  ;;  %s4486_s8 = sld [smem:[#allocation53_spill]] }
  0x5f   :  { %v230_v41 = vld [vmem:[%s229_s17] sm:$0x1]  ;;  %612 = vmatpush.msrb.mxu0 %v3114_v21 }
  0x60   :  { %231 = vst [vmem:[#allocation2 + $0x31] sm:$0x1] %v230_v41  ;;  %v234_v44 = vld [vmem:[%s233_s20] sm:$0x1] }
  0x61   :  { %235 = vst [vmem:[#allocation2 + $0x32] sm:$0x1] %v234_v44  ;;  %v238_v51 = vld [vmem:[%s237_s26] sm:$0x1] }
  0x62   :  { %239 = vst [vmem:[#allocation2 + $0x33] sm:$0x1] %v238_v51  ;;  %v242_v58 = vld [vmem:[%s241_s28] sm:$0x1]  ;;  %s281_s28 = scalar_lea.vmem %s4274_s1, %s3173_s9 }
  0x63   :  { %v293_v0 = vld [vmem:[#allocation2 + $0x28] sm:$0xff]  ;;  %243 = vst [vmem:[#allocation2 + $0x34] sm:$0x1] %v242_v58  ;;  %v246_v3 = vld [vmem:[%s245_s22] sm:$0x1]  ;;  %v3189_v58 = vld [vmem:[%s4276_s3 + $0x58] sm:$0xff] }
  0x64   :  { %401 = vmatmul.f32.gmra.mxu0 %v293_v0  ;;  %442 = vmatmul.f32.gmra.mxu1 %v293_v0  ;;  %247 = vst [vmem:[#allocation2 + $0x35] sm:$0x1] %v246_v3  ;;  %v250_v6 = vld [vmem:[%s249_s12] sm:$0x1] }
  0x65   :  { %483 = vmatmul.f32.gmra.mxu2 %v293_v0  ;;  %524 = vmatmul.f32.gmra.mxu3 %v293_v0  ;;  %251 = vst [vmem:[#allocation2 + $0x36] sm:$0x1] %v250_v6  ;;  %v254_v19 = vld [vmem:[%s253_s6] sm:$0x1]  ;;  %v3194_v0 = vld [vmem:[%s4276_s3 + $0x50] sm:$0xff] }
  0x66   :  { %255 = vst [vmem:[#allocation2 + $0x37] sm:$0x1] %v254_v19  ;;  %v258_v41 = vld [vmem:[%s257_s10] sm:$0x1]  ;;  %671 = vmatpush.msrb.mxu3 %v3189_v58  ;;  %651 = vmatpush.msrb.mxu2 %v3194_v0  ;;  %v3206_v19 = vld [vmem:[%s4276_s3 + $0x8] sm:$0xff] }
  0x67   :  { %259 = vst [vmem:[#allocation2 + $0x38] sm:$0x1] %v258_v41  ;;  %v262_v44 = vld [vmem:[%s261_s2] sm:$0x1]  ;;  %633 = vmatpush.msrb.mxu1 %v3206_v19  ;;  %v3217_v41 = vld [vmem:[%s4276_s3 + $0x30] sm:$0xff]  ;;  %s277_s2 = scalar_lea.vmem %s4274_s1, %s3167_s29  ;;  %s4492_s29 = sld [smem:[#allocation55_spill]] }
  0x68   :  { %263 = vst [vmem:[#allocation2 + $0x39] sm:$0x1] %v262_v44  ;;  %v266_v51 = vld [vmem:[%s265_s0] sm:$0x1]  ;;  %v3222_v44 = vld [vmem:[%s4276_s3 + $0x38] sm:$0xff]  ;;  %652 = vmatpush.msrb.mxu2 %v3217_v41  ;;  %s4491_s0 = sld [smem:[#allocation54_spill]] }
  0x69   :  { %267 = vst [vmem:[#allocation2 + $0x3a] sm:$0x1] %v266_v51  ;;  %v270_v3 = vld [vmem:[%s269_s24] sm:$0x1]  ;;  %v3227_v51 = vld [vmem:[%s4276_s3 + $0x10] sm:$0xff]  ;;  %672 = vmatpush.msrb.mxu3 %v3222_v44  ;;  %765 = vmatpush.msra.mxu1 %v2588_v11 }
  0x6a   :  { %v3201_v6 = vld [vmem:[%s4276_s3] sm:$0xff]  ;;  %4355 = vst [vmem:[#allocation8_spill] sm:$0xff] %v3206_v19  ;;  %v3238_v19 = vld [vmem:[%s4276_s3 + $0x18] sm:$0xff]  ;;  %653 = vmatpush.msrb.mxu2 %v3227_v51 }
  0x6b   :  { %4354 = vst [vmem:[#allocation7_spill] sm:$0xff] %v3201_v6  ;;  %613 = vmatpush.msrb.mxu0 %v3201_v6  ;;  %v278_v6 = vld [vmem:[%s277_s2] sm:$0x1]  ;;  %673 = vmatpush.msrb.mxu3 %v3238_v19 }
  0x6c   :  { %271 = vst [vmem:[#allocation2 + $0x3b] sm:$0x1] %v270_v3  ;;  %v274_v3 = vld [vmem:[%s273_s11] sm:$0x1]  ;;  %785 = vmatpush.msra.mxu2 %v2624_v20  ;;  %766 = vmatpush.msra.mxu1 %v2619_v18 }
  0x6d   :  { %4356 = vst [vmem:[#allocation9_spill] sm:$0xff] %v3217_v41  ;;  %745 = vmatpush.msra.mxu0 %v2583_v10  ;;  %v294_v28 = vld [vmem:[#allocation2 + $0x30] sm:$0xff]  ;;  %v282_v41 = vld [vmem:[%s281_s28] sm:$0x1]  ;;  %805 = vmatpush.msra.mxu3 %v2602_v14 }
  0x6e   :  { %275 = vst [vmem:[#allocation2 + $0x3c] sm:$0x1] %v274_v3  ;;  %404 = vmatmul.f32.gmra.mxu0 %v294_v28  ;;  %445 = vmatmul.f32.gmra.mxu1 %v294_v28  ;;  %v286_v3 = vld [vmem:[%s285_s13] sm:$0x1] }
  0x6f   :  { %279 = vst [vmem:[#allocation2 + $0x3d] sm:$0x1] %v278_v6  ;;  %486 = vmatmul.f32.gmra.mxu2 %v294_v28  ;;  %527 = vmatmul.f32.gmra.mxu3 %v294_v28  ;;  %v2241_v6 = vmov 0.0  }
  0x70   :  { %283 = vst [vmem:[#allocation2 + $0x3e] sm:$0x1] %v282_v41  ;;  %746 = vmatpush.msra.mxu0 %v2597_v13  ;;  %786 = vmatpush.msra.mxu2 %v2684_v32  ;;  %v4357_v41 = vld [vmem:[#allocation6_spill] sm:$0xff] }
  0x71   :  { %287 = vst [vmem:[#allocation2 + $0x3f] sm:$0x1] %v286_v3  ;;  %806 = vmatpush.msra.mxu3 %v2635_v22  ;;  %767 = vmatpush.msra.mxu1 %v2646_v24 }
  0x72   :  { %747 = vmatpush.msra.mxu0 %v2641_v23  ;;  %787 = vmatpush.msra.mxu2 %v2696_v36 }
  0x73   :  { %807 = vmatpush.msra.mxu3 %v2677_v31  ;;  %768 = vmatpush.msra.mxu1 %v2670_v30 }
  0x74   :  { %748 = vmatpush.msra.mxu0 %v2665_v29  ;;  %788 = vmatpush.msra.mxu2 %v2730_v40  ;;  %v4358_v3 = vld [vmem:[#allocation9_spill] sm:$0xff] }
  0x75   :  { %808 = vmatpush.msra.mxu3 %v2691_v35  ;;  %769 = vmatpush.msra.mxu1 %v2709_v38 }
  0x76   :  { %749 = vmatpush.msra.mxu0 %v2704_v37  ;;  %789 = vmatpush.msra.mxu2 %v2784_v50 }
  0x77   :  { %809 = vmatpush.msra.mxu3 %v2723_v39  ;;  %770 = vmatpush.msra.mxu1 %v2745_v43 }
  0x78   :  { %v295_v28 = vld [vmem:[#allocation2 + $0x38] sm:$0xff]  ;;  %750 = vmatpush.msra.mxu0 %v2740_v42  ;;  %790 = vmatpush.msra.mxu2 %v2860_v62 }
  0x79   :  { %407 = vmatmul.f32.gmra.mxu0 %v295_v28  ;;  %448 = vmatmul.f32.gmra.mxu1 %v295_v28 }
  0x7a   :  { %489 = vmatmul.f32.gmra.mxu2 %v295_v28  ;;  %530 = vmatmul.f32.gmra.mxu3 %v295_v28  ;;  %v4359_v28 = vld [vmem:[#allocation7_spill] sm:$0xff] }
  0x7b   :  { %810 = vmatpush.msra.mxu3 %v2779_v49  ;;  %751 = vmatpush.msra.mxu0 %v2762_v47 }
  0x7c   :  { %771 = vmatpush.msra.mxu1 %v2767_v48  ;;  %791 = vmatpush.msra.mxu2 %v2912_v8 }
  0x7d   :  { %811 = vmatpush.msra.mxu3 %v2805_v54  ;;  %752 = vmatpush.msra.mxu0 %v2795_v52 }
  0x7e   :  { %772 = vmatpush.msra.mxu1 %v2800_v53  ;;  %792 = vmatpush.msra.mxu2 %v2978_v33 }
  0x7f   :  { %812 = vmatpush.msra.mxu3 %v2818_v56  ;;  %753 = vmatpush.msra.mxu0 %v2842_v60 }
  0x80   :  { %773 = vmatpush.msra.mxu1 %v2855_v61  ;;  %793 = vmatpush.msra.mxu2 %v3018_v55 }
  0x81   :  { %614 = vmatmul.f32.vlgmr.msrb.gmra.mxu0 %v2241_v6  ;;  %634 = vmatmul.f32.vlgmr.msrb.gmra.mxu1 %v2241_v6 }
  0x82   :  { %654 = vmatmul.f32.vlgmr.msrb.gmra.mxu2 %v2241_v6  ;;  %674 = vmatmul.f32.vlgmr.msrb.gmra.mxu3 %v2241_v6  ;;  %v4360_v6 = vld [vmem:[#allocation8_spill] sm:$0xff] }
  0x83   :  { %813 = vmatpush.msra.mxu3 %v2907_v7  ;;  %754 = vmatpush.msra.mxu0 %v2873_v1 }
  0x84   :  { %774 = vmatpush.msra.mxu1 %v2878_v2  ;;  %794 = vmatpush.msra.mxu2 %v3057_v4 }
  0x85   :  { %814 = vmatpush.msra.mxu3 %v2967_v27  ;;  %755 = vmatpush.msra.mxu0 %v2951_v25 }
  0x86   :  { %775 = vmatpush.msra.mxu1 %v2962_v26  ;;  %795 = vmatpush.msra.mxu2 %v3091_v15 }
  0x87   :  { %815 = vmatpush.msra.mxu3 %v3007_v46  ;;  %756 = vmatpush.msra.mxu0 %v2983_v34 }
  0x88   :  { %776 = vmatpush.msra.mxu1 %v3002_v45  ;;  %796 = vmatpush.msra.mxu2 %v3101_v17 }
  0x89   :  { %816 = vmatpush.msra.mxu3 %v3044_v63  ;;  %757 = vmatpush.msra.mxu0 %v3023_v57 }
  0x8a   :  { %777 = vmatpush.msra.mxu1 %v3039_v59  ;;  %797 = vmatpush.msra.mxu2 %v3155_v5 }
  0x8b   :  { %817 = vmatpush.msra.mxu3 %v3096_v16  ;;  %758 = vmatpush.msra.mxu0 %v3073_v9 }
  0x8c   :  { %778 = vmatpush.msra.mxu1 %v3078_v12  ;;  %798 = vmatpush.msra.mxu2 %v3194_v0 }
  0x8d   :  { %818 = vmatpush.msra.mxu3 %v3189_v58  ;;  %759 = vmatpush.msra.mxu0 %v3114_v21 }
  0x8e   :  { %779 = vmatpush.msra.mxu1 %v4357_v41  ;;  %799 = vmatpush.msra.mxu2 %v4358_v3 }
  0x8f   :  { %819 = vmatpush.msra.mxu3 %v3222_v44  ;;  %760 = vmatpush.msra.mxu0 %v4359_v28 }
  0x90   :  { %780 = vmatpush.msra.mxu1 %v4360_v6  ;;  %800 = vmatpush.msra.mxu2 %v3227_v51 }
  0x91   :  { %820 = vmatpush.msra.mxu3 %v3238_v19  ;;  %892 = vmatpush.msrb.mxu0 %v2583_v10 }
  0x92   :  { %912 = vmatpush.msrb.mxu1 %v2588_v11  ;;  %932 = vmatpush.msrb.mxu2 %v2624_v20 }
  0x93   :  { %952 = vmatpush.msrb.mxu3 %v2602_v14  ;;  %893 = vmatpush.msrb.mxu0 %v2597_v13  ;;  %v360_v13 = vld [vmem:[%s4361_s21] sm:$0xf] }
  0x94   :  { %913 = vmatpush.msrb.mxu1 %v2619_v18  ;;  %933 = vmatpush.msrb.mxu2 %v2684_v32  ;;  %v362_v14 = vperm.slane %v360_v13, 0  ;;  %v363_v18 = vperm.slane %v360_v13, 1  ;;  %v365_v32 = vperm.slane %v360_v13, 3 }
  0x95   :  { %953 = vmatpush.msrb.mxu3 %v2635_v22  ;;  %894 = vmatpush.msrb.mxu0 %v2641_v23 }
  0x96   :  { %914 = vmatpush.msrb.mxu1 %v2646_v24  ;;  %934 = vmatpush.msrb.mxu2 %v2696_v36 }
  0x97   :  { %954 = vmatpush.msrb.mxu3 %v2677_v31  ;;  %895 = vmatpush.msrb.mxu0 %v2665_v29  ;;  %v3389_v31 = vperm.slane %v360_v13, 2 }
  0x98   :  { %915 = vmatpush.msrb.mxu1 %v2670_v30  ;;  %935 = vmatpush.msrb.mxu2 %v2730_v40 }
  0x99   :  { %955 = vmatpush.msrb.mxu3 %v2691_v35  ;;  %896 = vmatpush.msrb.mxu0 %v2704_v37 }
  0x9a   :  { %916 = vmatpush.msrb.mxu1 %v2709_v38  ;;  %936 = vmatpush.msrb.mxu2 %v2784_v50 }
  0x9b   :  { %956 = vmatpush.msrb.mxu3 %v2723_v39  ;;  %897 = vmatpush.msrb.mxu0 %v2740_v42 }
  0x9c   :  { %917 = vmatpush.msrb.mxu1 %v2745_v43  ;;  %937 = vmatpush.msrb.mxu2 %v2860_v62 }
  0x9d   :  { %957 = vmatpush.msrb.mxu3 %v2779_v49  ;;  %898 = vmatpush.msrb.mxu0 %v2762_v47 }
  0x9e   :  { %918 = vmatpush.msrb.mxu1 %v2767_v48  ;;  %938 = vmatpush.msrb.mxu2 %v2912_v8 }
  0x9f   :  { %958 = vmatpush.msrb.mxu3 %v2805_v54  ;;  %899 = vmatpush.msrb.mxu0 %v2795_v52 }
  0xa0   :  { %919 = vmatpush.msrb.mxu1 %v2800_v53  ;;  %939 = vmatpush.msrb.mxu2 %v2978_v33 }
  0xa1   :  { %959 = vmatpush.msrb.mxu3 %v2818_v56  ;;  %900 = vmatpush.msrb.mxu0 %v2842_v60 }
  0xa2   :  { %920 = vmatpush.msrb.mxu1 %v2855_v61  ;;  %940 = vmatpush.msrb.mxu2 %v3018_v55 }
  0xa3   :  { %960 = vmatpush.msrb.mxu3 %v2907_v7  ;;  %901 = vmatpush.msrb.mxu0 %v2873_v1 }
  0xa4   :  { %921 = vmatpush.msrb.mxu1 %v2878_v2  ;;  %941 = vmatpush.msrb.mxu2 %v3057_v4 }
  0xa5   :  { %961 = vmatpush.msrb.mxu3 %v2967_v27  ;;  %902 = vmatpush.msrb.mxu0 %v2951_v25 }
  0xa6   :  { %922 = vmatpush.msrb.mxu1 %v2962_v26  ;;  %942 = vmatpush.msrb.mxu2 %v3091_v15 }
  0xa7   :  { %962 = vmatpush.msrb.mxu3 %v3007_v46  ;;  %903 = vmatpush.msrb.mxu0 %v2983_v34 }
  0xa8   :  { %923 = vmatpush.msrb.mxu1 %v3002_v45  ;;  %943 = vmatpush.msrb.mxu2 %v3101_v17 }
  0xa9   :  { %963 = vmatpush.msrb.mxu3 %v3044_v63  ;;  %904 = vmatpush.msrb.mxu0 %v3023_v57 }
  0xaa   :  { %924 = vmatpush.msrb.mxu1 %v3039_v59  ;;  %944 = vmatpush.msrb.mxu2 %v3155_v5 }
  0xab   :  { %964 = vmatpush.msrb.mxu3 %v3096_v16  ;;  %905 = vmatpush.msrb.mxu0 %v3073_v9 }
  0xac   :  { %925 = vmatpush.msrb.mxu1 %v3078_v12  ;;  %945 = vmatpush.msrb.mxu2 %v3194_v0 }
  0xad   :  { %965 = vmatpush.msrb.mxu3 %v3189_v58  ;;  %906 = vmatpush.msrb.mxu0 %v3114_v21 }
  0xae   :  { %926 = vmatpush.msrb.mxu1 %v4357_v41  ;;  %946 = vmatpush.msrb.mxu2 %v4358_v3 }
  0xaf   :  { %966 = vmatpush.msrb.mxu3 %v3222_v44  ;;  %907 = vmatpush.msrb.mxu0 %v4359_v28 }
  0xb0   :  { %927 = vmatpush.msrb.mxu1 %v4360_v6  ;;  %947 = vmatpush.msrb.mxu2 %v3227_v51 }
  0xb1   :  { %967 = vmatpush.msrb.mxu3 %v3238_v19  ;;  %v387_v10 = vpop.f32.mrf.mxu0  ;;  %v428_v11 = vpop.f32.mrf.mxu1 }
  0xb8   :  { %v3381_v20 = vpop.f32.mrf.mxu2  ;;  %v3383_v22 = vpop.f32.mrf.mxu3 }
  0xb9   :  { %v390_v23 = vpop.f32.mrf.mxu0  ;;  %v431_v24 = vpop.f32.mrf.mxu1 }
  0xba   :  { %v3385_v29 = vadd.f32 %v390_v23, %v362_v14  ;;  %v3387_v30 = vadd.f32 %v431_v24, %v363_v18 }
  0xc0   :  { %v472_v35 = vpop.f32.mrf.mxu2  ;;  %v513_v36 = vpop.f32.mrf.mxu3 }
  0xc1   :  { %v3392_v37 = vadd.f32 %v472_v35, %v3389_v31  ;;  %v3394_v38 = vadd.f32 %v513_v36, %v365_v32  ;;  %v393_v39 = vpop.f32.mrf.mxu0  ;;  %v434_v40 = vpop.f32.mrf.mxu1 }
  0xc2   :  { %v3396_v42 = vadd.f32 %v393_v39, %v362_v14  ;;  %v3398_v43 = vadd.f32 %v434_v40, %v363_v18 }
  0xc4   :  { %4362 = vst [vmem:[#allocation6_spill] sm:$0xff] %v3396_v42  ;;  %v3641_v42 = vld [vmem:[%s4276_s3 + $0xe0] sm:$0xff] }
  0xc5   :  { %4363 = vst [vmem:[#allocation9_spill] sm:$0xff] %v3398_v43  ;;  %v3628_v43 = vld [vmem:[%s4276_s3 + $0x108] sm:$0xff] }
  0xc6   :  { %4386 = vst [vmem:[#allocation30_spill] sm:$0xff] %v3628_v43 }
  0xc7   :  { %4387 = vst [vmem:[#allocation31_spill] sm:$0xff] %v3641_v42 }
  0xc8   :  { %v475_v47 = vpop.f32.mrf.mxu2  ;;  %v516_v48 = vpop.f32.mrf.mxu3 }
  0xc9   :  { %v3401_v49 = vadd.f32 %v475_v47, %v3389_v31  ;;  %v3403_v50 = vadd.f32 %v516_v48, %v365_v32 }
  0xcb   :  { %4364 = vst [vmem:[#allocation7_spill] sm:$0xff] %v3401_v49  ;;  %v3616_v49 = vld [vmem:[%s4276_s3 + $0x138] sm:$0xff] }
  0xcc   :  { %4365 = vst [vmem:[#allocation8_spill] sm:$0xff] %v3403_v50  ;;  %v3622_v50 = vld [vmem:[%s4276_s3 + $0x100] sm:$0xff] }
  0xcd   :  { %v396_v52 = vpop.f32.mrf.mxu0  ;;  %v437_v53 = vpop.f32.mrf.mxu1 }
  0xce   :  { %v3405_v54 = vadd.f32 %v396_v52, %v362_v14  ;;  %v3407_v56 = vadd.f32 %v437_v53, %v363_v18 }
  0xd0   :  { %4366 = vst [vmem:[#allocation10_spill] sm:$0xff] %v3405_v54  ;;  %v3609_v54 = vld [vmem:[%s4276_s3 + $0x128] sm:$0xff] }
  0xd1   :  { %4367 = vst [vmem:[#allocation11_spill] sm:$0xff] %v3407_v56 }
  0xd4   :  { %v478_v60 = vpop.f32.mrf.mxu2  ;;  %v519_v61 = vpop.f32.mrf.mxu3 }
  0xd5   :  { %v3410_v62 = vadd.f32 %v478_v60, %v3389_v31  ;;  %v3412_v1 = vadd.f32 %v519_v61, %v365_v32 }
  0xd6   :  { %v399_v2 = vpop.f32.mrf.mxu0  ;;  %v440_v7 = vpop.f32.mrf.mxu1 }
  0xd7   :  { %4368 = vst [vmem:[#allocation12_spill] sm:$0xff] %v3410_v62  ;;  %v3414_v13 = vadd.f32 %v399_v2, %v362_v14  ;;  %v3416_v23 = vadd.f32 %v440_v7, %v363_v18 }
  0xd8   :  { %4369 = vst [vmem:[#allocation13_spill] sm:$0xff] %v3412_v1 }
  0xd9   :  { %4370 = vst [vmem:[#allocation14_spill] sm:$0xff] %v3414_v13 }
  0xda   :  { %4371 = vst [vmem:[#allocation15_spill] sm:$0xff] %v3416_v23 }
  0xdd   :  { %v481_v24 = vpop.f32.mrf.mxu2  ;;  %v522_v35 = vpop.f32.mrf.mxu3 }
  0xde   :  { %v3419_v36 = vadd.f32 %v481_v24, %v3389_v31  ;;  %v3421_v39 = vadd.f32 %v522_v35, %v365_v32 }
  0xe0   :  { %4372 = vst [vmem:[#allocation16_spill] sm:$0xff] %v3419_v36 }
  0xe1   :  { %4373 = vst [vmem:[#allocation17_spill] sm:$0xff] %v3421_v39  ;;  %v402_v40 = vpop.f32.mrf.mxu0  ;;  %v443_v47 = vpop.f32.mrf.mxu1 }
  0xe2   :  { %v3423_v48 = vadd.f32 %v402_v40, %v362_v14  ;;  %v3425_v52 = vadd.f32 %v443_v47, %v363_v18 }
  0xe4   :  { %4374 = vst [vmem:[#allocation18_spill] sm:$0xff] %v3423_v48 }
  0xe5   :  { %4375 = vst [vmem:[#allocation19_spill] sm:$0xff] %v3425_v52 }
  0xe8   :  { %v484_v53 = vpop.f32.mrf.mxu2  ;;  %v525_v60 = vpop.f32.mrf.mxu3 }
  0xe9   :  { %v3428_v61 = vadd.f32 %v484_v53, %v3389_v31  ;;  %v3430_v2 = vadd.f32 %v525_v60, %v365_v32  ;;  %v388_v60 = vadd.f32 %v387_v10, %v362_v14 }
  0xeb   :  { %4376 = vst [vmem:[#allocation20_spill] sm:$0xff] %v3428_v61  ;;  %v405_v7 = vpop.f32.mrf.mxu0  ;;  %v446_v23 = vpop.f32.mrf.mxu1  ;;  %v429_v61 = vadd.f32 %v428_v11, %v363_v18 }
  0xec   :  { %4377 = vst [vmem:[#allocation21_spill] sm:$0xff] %v3430_v2  ;;  %v3432_v13 = vadd.f32 %v405_v7, %v362_v14  ;;  %v3434_v24 = vadd.f32 %v446_v23, %v363_v18 }
  0xee   :  { %4378 = vst [vmem:[#allocation22_spill] sm:$0xff] %v3432_v13 }
  0xef   :  { %4379 = vst [vmem:[#allocation23_spill] sm:$0xff] %v3434_v24 }
  0xf2   :  { %v487_v35 = vpop.f32.mrf.mxu2  ;;  %v528_v36 = vpop.f32.mrf.mxu3 }
  0xf3   :  { %v3437_v40 = vadd.f32 %v487_v35, %v3389_v31  ;;  %v3439_v47 = vadd.f32 %v528_v36, %v365_v32 }
  0xf5   :  { %4380 = vst [vmem:[#allocation24_spill] sm:$0xff] %v3437_v40 }
  0xf6   :  { %4381 = vst [vmem:[#allocation25_spill] sm:$0xff] %v3439_v47  ;;  %v408_v52 = vpop.f32.mrf.mxu0  ;;  %v449_v48 = vpop.f32.mrf.mxu1 }
  0xf7   :  { %v3441_v39 = vadd.f32 %v408_v52, %v362_v14  ;;  %v3443_v53 = vadd.f32 %v449_v48, %v363_v18  ;;  %v511_v52 = vadd.f32 %v3383_v22, %v365_v32 }
  0xf9   :  { %4382 = vst [vmem:[#allocation26_spill] sm:$0xff] %v3441_v39 }
  0xfa   :  { %4383 = vst [vmem:[#allocation27_spill] sm:$0xff] %v3443_v53 }
  0xfd   :  { %v490_v2 = vpop.f32.mrf.mxu2  ;;  %v531_v7 = vpop.f32.mrf.mxu3 }
  0xfe   :  { %v3446_v23 = vadd.f32 %v490_v2, %v3389_v31  ;;  %v3448_v24 = vadd.f32 %v531_v7, %v365_v32  ;;  %v615_v13 = vpop.f32.mrf.mxu0  ;;  %v635_v35 = vpop.f32.mrf.mxu1 }
  0xff   :  { %v678_v40 = vadd.f32 %v615_v13, %v388_v60  ;;  %v679_v36 = vadd.f32 %v635_v35, %v429_v61  ;;  %v470_v13 = vadd.f32 %v3381_v20, %v3389_v31 }
 0x100   :  { %4384 = vst [vmem:[#allocation28_spill] sm:$0xff] %v3446_v23 }
 0x101   :  { %4385 = vst [vmem:[#allocation29_spill] sm:$0xff] %v3448_v24  ;;  %v1968_v47 = vmul.f32 -1.442695, %v678_v40  ;;  %v1969_v62 = vmul.f32 -1.442695, %v679_v36 }
 0x103   :  { %1995 = vpow2.f32 %v1968_v47 }
 0x104   :  { %1997 = vpow2.f32 %v1969_v62 }
 0x105   :  { %v675_v48 = vpop.f32.mrf.mxu3  ;;  %v655_v7 = vpop.f32.mrf.mxu2 }
 0x106   :  { %v681_v10 = vadd.f32 %v675_v48, %v511_v52  ;;  %v680_v47 = vadd.f32 %v655_v7, %v470_v13 }
 0x108   :  { %v1970_v11 = vmul.f32 -1.442695, %v681_v10 }
 0x109   :  { %v1996_v14 = vpop.eup %1995 }
 0x10a   :  { %v1998_v18 = vpop.eup %1997  ;;  %v685_v53 = vadd.f32 1.0, %v1996_v14  ;;  %1999 = vpow2.f32 %v1970_v11 }
 0x10b   :  { %v704_v2 = vadd.f32 1.0, %v1998_v18 }
 0x10c   :  { %2001 = vrcp.f32 %v685_v53  ;;  %v697_v36 = vand.u32 2147483648, %v685_v53  ;;  %v695_v10 = vand.u32 2147483647, %v685_v53  ;;  %vm691_vm2 = vweird.f32 %v685_v53 }
 0x10d   :  { %2003 = vrcp.f32 %v704_v2  ;;  %v716_v52 = vand.u32 2147483648, %v704_v2  ;;  %v714_v14 = vand.u32 2147483647, %v704_v2  ;;  %vm710_vm3 = vweird.f32 %v704_v2 }
 0x10e   :  { %v698_v31 = vor.u32 1.1754944e-38, %v697_v36  ;;  %vm696_vm5 = vcmp.eq.f32.partialorder %v695_v10, 8.507059e+37 }
 0x10f   :  { %v717_v13 = vor.u32 1.1754944e-38, %v716_v52  ;;  %vm715_vm7 = vcmp.eq.f32.partialorder %v714_v14, 8.507059e+37  ;;  %v3489_v14 = vld [vmem:[%s4276_s3 + $0x1c8] sm:$0xff] }
 0x110   :  { %v2000_v23 = vpop.eup %1999 }
 0x111   :  { %v724_v61 = vadd.f32 1.0, %v2000_v23 }
 0x112   :  { %v2002_v40 = vpop.eup %2001 }
 0x113   :  { %v2004_v22 = vpop.eup %2003  ;;  %v687_v32 = vmul.f32 %v2002_v40, %v685_v53  ;;  %2005 = vrcp.f32 %v724_v61  ;;  %vm692_vm0 = vweird.f32 %v2002_v40  ;;  %vm730_vm9 = vweird.f32 %v724_v61 }
 0x114   :  { %v706_v62 = vmul.f32 %v2004_v22, %v704_v2  ;;  %2007 = vtanh.f32 %v680_v47  ;;  %vm711_vm1 = vweird.f32 %v2004_v22  ;;  %vm693_vm4 = vmor %vm691_vm2, %vm692_vm0  ;;  %v736_v2 = vand.u32 2147483648, %v724_v61 }
 0x115   :  { %v688_v60 = vsub.f32 1.0, %v687_v32  ;;  %vm712_vm6 = vmor %vm710_vm3, %vm711_vm1 }
 0x116   :  { %v707_v35 = vsub.f32 1.0, %v706_v62  ;;  %v737_v52 = vor.u32 1.1754944e-38, %v736_v2  ;;  %v3567_v2 = vld [vmem:[%s4276_s3 + $0x170] sm:$0xff] }
 0x117   :  { %v689_v48 = vmul.f32 %v2002_v40, %v688_v60 }
 0x118   :  { %v708_v11 = vmul.f32 %v2004_v22, %v707_v35 }
 0x119   :  { %v2006_v18 = vpop.eup %2005  ;;  %v690_v20 = vadd.f32 %v2002_v40, %v689_v48 }
 0x11a   :  { %v709_v23 = vadd.f32 %v2004_v22, %v708_v11  ;;  %v726_v7 = vmul.f32 %v2006_v18, %v724_v61  ;;  %v2008_v47 = vpop.eup %2007  ;;  %vm731_vm8 = vweird.f32 %v2006_v18 }
 0x11b   :  { %v694_v32 = vsel %vm693_vm4, %v2002_v40, %v690_v20  ;;  %v734_v40 = vand.u32 2147483647, %v724_v61  ;;  %vm732_vm10 = vmor %vm730_vm9, %vm731_vm8  ;;  %v3483_v61 = vld [vmem:[%s4276_s3 + $0x1c0] sm:$0xff]  ;;  %v3501_v20 = vld [vmem:[%s4276_s3 + $0x1d8] sm:$0xff] }
 0x11c   :  { %v699_v62 = vsel %vm696_vm5, %v698_v31, %v694_v32  ;;  %v713_v60 = vsel %vm712_vm6, %v2004_v22, %v709_v23  ;;  %v727_v24 = vsub.f32 1.0, %v726_v7  ;;  %v3507_v31 = vld [vmem:[%s4276_s3 + $0x1a0] sm:$0xff]  ;;  %v3513_v23 = vld [vmem:[%s4276_s3 + $0x1a8] sm:$0xff]  ;;  %v3519_v7 = vld [vmem:[%s4276_s3 + $0x1b0] sm:$0xff] }
 0x11d   :  { %v718_v35 = vsel %vm715_vm7, %v717_v13, %v713_v60  ;;  %v741_v39 = vmul.f32 %v2008_v47, %v699_v62  ;;  %vm735_vm11 = vcmp.eq.f32.partialorder %v734_v40, 8.507059e+37  ;;  %v3525_v13 = vld [vmem:[%s4276_s3 + $0x1b8] sm:$0xff]  ;;  %v3531_v32 = vld [vmem:[%s4276_s3 + $0x180] sm:$0xff]  ;;  %v3537_v47 = vld [vmem:[%s4276_s3 + $0x188] sm:$0xff] }
 0x11e   :  { %v740_v1 = vmul.f32 0.0, %v718_v35  ;;  %v728_v56 = vmul.f32 %v2006_v18, %v727_v24  ;;  %v3477_v24 = vld [vmem:[%s4276_s3 + $0x1f8] sm:$0xff]  ;;  %v3543_v62 = vld [vmem:[%s4276_s3 + $0x190] sm:$0xff]  ;;  %v3555_v35 = vld [vmem:[%s4276_s3 + $0x160] sm:$0xff] }
 0x11f   :  { %v3549_v60 = vld [vmem:[%s4276_s3 + $0x198] sm:$0xff] }
 0x120   :  { %v3453_v48 = vadd.f32 %v741_v39, %v740_v1  ;;  %v729_v53 = vadd.f32 %v2006_v18, %v728_v56  ;;  %v3459_v56 = vld [vmem:[%s4276_s3 + $0x1e0] sm:$0xff]  ;;  %v3465_v1 = vld [vmem:[%s4276_s3 + $0x1e8] sm:$0xff]  ;;  %v3471_v39 = vld [vmem:[%s4276_s3 + $0x1f0] sm:$0xff] }
 0x121   :  { %v3573_v40 = vld [vmem:[%s4276_s3 + $0x178] sm:$0xff] }
 0x122   :  { %2009 = vtanh.f32 %v3453_v48  ;;  %v733_v36 = vsel %vm732_vm10, %v2006_v18, %v729_v53  ;;  %v3495_v18 = vld [vmem:[%s4276_s3 + $0x1d0] sm:$0xff]  ;;  %v3561_v53 = vld [vmem:[%s4276_s3 + $0x168] sm:$0xff] }
 0x123   :  { %v738_v10 = vsel %vm735_vm11, %v737_v52, %v733_v36  ;;  %v3579_v36 = vld [vmem:[%s4276_s3 + $0x140] sm:$0xff]  ;;  %v3585_v52 = vld [vmem:[%s4276_s3 + $0x148] sm:$0xff] }
 0x128   :  { %v2010_v22 = vpop.eup %2009 }
 0x129   :  { %v744_v11 = vmul.f32 %v2010_v22, %v738_v10  ;;  %v3591_v22 = vld [vmem:[%s4276_s3 + $0x150] sm:$0xff]  ;;  %v3597_v10 = vld [vmem:[%s4276_s3 + $0x158] sm:$0xff] }
 0x12b   :  { %761 = vmatmul.f32.vlgmr.msra.gmra.mxu0 %v744_v11  ;;  %781 = vmatmul.f32.vlgmr.msra.gmra.mxu1 %v744_v11 }
 0x12c   :  { %801 = vmatmul.f32.vlgmr.msra.gmra.mxu2 %v744_v11  ;;  %821 = vmatmul.f32.vlgmr.msra.gmra.mxu3 %v744_v11  ;;  %v3603_v11 = vld [vmem:[%s4276_s3 + $0x120] sm:$0xff] }
 0x12d   :  { %1039 = vmatpush.msra.mxu0 %v3459_v56  ;;  %1059 = vmatpush.msra.mxu1 %v3465_v1 }
 0x12e   :  { %1079 = vmatpush.msra.mxu2 %v3471_v39  ;;  %1099 = vmatpush.msra.mxu3 %v3477_v24 }
 0x12f   :  { %1040 = vmatpush.msra.mxu0 %v3483_v61  ;;  %1060 = vmatpush.msra.mxu1 %v3489_v14 }
 0x130   :  { %1080 = vmatpush.msra.mxu2 %v3495_v18  ;;  %1100 = vmatpush.msra.mxu3 %v3501_v20 }
 0x131   :  { %1041 = vmatpush.msra.mxu0 %v3507_v31  ;;  %1061 = vmatpush.msra.mxu1 %v3513_v23 }
 0x132   :  { %1081 = vmatpush.msra.mxu2 %v3519_v7  ;;  %1101 = vmatpush.msra.mxu3 %v3525_v13 }
 0x133   :  { %1042 = vmatpush.msra.mxu0 %v3531_v32  ;;  %1062 = vmatpush.msra.mxu1 %v3537_v47 }
 0x134   :  { %1082 = vmatpush.msra.mxu2 %v3543_v62  ;;  %1102 = vmatpush.msra.mxu3 %v3549_v60 }
 0x135   :  { %1043 = vmatpush.msra.mxu0 %v3555_v35  ;;  %1063 = vmatpush.msra.mxu1 %v3561_v53 }
 0x136   :  { %1083 = vmatpush.msra.mxu2 %v3567_v2  ;;  %1103 = vmatpush.msra.mxu3 %v3573_v40 }
 0x137   :  { %1044 = vmatpush.msra.mxu0 %v3579_v36  ;;  %1064 = vmatpush.msra.mxu1 %v3585_v52 }
 0x138   :  { %1084 = vmatpush.msra.mxu2 %v3591_v22  ;;  %1104 = vmatpush.msra.mxu3 %v3597_v10 }
 0x139   :  { %1045 = vmatpush.msra.mxu0 %v3603_v11  ;;  %1065 = vmatpush.msra.mxu1 %v3609_v54 }
 0x13a   :  { %1085 = vmatpush.msra.mxu2 %v2912_v8  ;;  %1105 = vmatpush.msra.mxu3 %v3616_v49  ;;  %v3635_v8 = vld [vmem:[%s4276_s3 + $0x118] sm:$0xff] }
 0x13b   :  { %1046 = vmatpush.msra.mxu0 %v3622_v50  ;;  %1066 = vmatpush.msra.mxu1 %v3628_v43  ;;  %v3647_v43 = vld [vmem:[%s4276_s3 + $0xe8] sm:$0xff] }
 0x13c   :  { %1086 = vmatpush.msra.mxu2 %v2978_v33  ;;  %1106 = vmatpush.msra.mxu3 %v3635_v8  ;;  %4388 = vst [vmem:[#allocation32_spill] sm:$0xff] %v3647_v43  ;;  %v3654_v33 = vld [vmem:[%s4276_s3 + $0xf8] sm:$0xff] }
 0x13d   :  { %1047 = vmatpush.msra.mxu0 %v3641_v42  ;;  %1067 = vmatpush.msra.mxu1 %v3647_v43  ;;  %v3660_v42 = vld [vmem:[%s4276_s3 + $0xc0] sm:$0xff]  ;;  %v3666_v43 = vld [vmem:[%s4276_s3 + $0xc8] sm:$0xff] }
 0x13e   :  { %1087 = vmatpush.msra.mxu2 %v3018_v55  ;;  %1107 = vmatpush.msra.mxu3 %v3654_v33 }
 0x13f   :  { %1048 = vmatpush.msra.mxu0 %v3660_v42  ;;  %1068 = vmatpush.msra.mxu1 %v3666_v43 }
 0x140   :  { %1088 = vmatpush.msra.mxu2 %v3057_v4  ;;  %1108 = vmatpush.msra.mxu3 %v2967_v27 }
 0x141   :  { %1049 = vmatpush.msra.mxu0 %v2951_v25  ;;  %1069 = vmatpush.msra.mxu1 %v2962_v26 }
 0x142   :  { %1089 = vmatpush.msra.mxu2 %v3091_v15  ;;  %1109 = vmatpush.msra.mxu3 %v3007_v46 }
 0x143   :  { %1050 = vmatpush.msra.mxu0 %v2983_v34  ;;  %1070 = vmatpush.msra.mxu1 %v3002_v45 }
 0x144   :  { %1090 = vmatpush.msra.mxu2 %v3101_v17  ;;  %1110 = vmatpush.msra.mxu3 %v3044_v63 }
 0x145   :  { %1051 = vmatpush.msra.mxu0 %v3023_v57  ;;  %1071 = vmatpush.msra.mxu1 %v3039_v59 }
 0x146   :  { %1091 = vmatpush.msra.mxu2 %v3155_v5  ;;  %1111 = vmatpush.msra.mxu3 %v3096_v16 }
 0x147   :  { %1052 = vmatpush.msra.mxu0 %v3073_v9  ;;  %1072 = vmatpush.msra.mxu1 %v3078_v12 }
 0x148   :  { %1092 = vmatpush.msra.mxu2 %v3194_v0  ;;  %1112 = vmatpush.msra.mxu3 %v3189_v58 }
 0x149   :  { %1053 = vmatpush.msra.mxu0 %v3114_v21  ;;  %1073 = vmatpush.msra.mxu1 %v4357_v41 }
 0x14a   :  { %1093 = vmatpush.msra.mxu2 %v4358_v3  ;;  %1113 = vmatpush.msra.mxu3 %v3222_v44 }
 0x14b   :  { %1054 = vmatpush.msra.mxu0 %v4359_v28  ;;  %1074 = vmatpush.msra.mxu1 %v4360_v6 }
 0x14c   :  { %1094 = vmatpush.msra.mxu2 %v3227_v51  ;;  %1114 = vmatpush.msra.mxu3 %v3238_v19 }
 0x1a8   :  { %v762_v25 = vpop.f32.mrf.mxu0  ;;  %v782_v26 = vpop.f32.mrf.mxu1 }
 0x1a9   :  { %v825_v27 = vadd.f32 %v762_v25, %v3385_v29  ;;  %v826_v34 = vadd.f32 %v782_v26, %v3387_v30 }
 0x1ab   :  { %v1971_v45 = vmul.f32 -1.442695, %v825_v27  ;;  %v1972_v46 = vmul.f32 -1.442695, %v826_v34 }
 0x1ad   :  { %2011 = vpow2.f32 %v1971_v45 }
 0x1ae   :  { %2013 = vpow2.f32 %v1972_v46 }
 0x1af   :  { %v822_v55 = vpop.f32.mrf.mxu3  ;;  %v802_v15 = vpop.f32.mrf.mxu2 }
 0x1b0   :  { %v828_v57 = vadd.f32 %v822_v55, %v3394_v38  ;;  %v827_v5 = vadd.f32 %v802_v15, %v3392_v37 }
 0x1b2   :  { %v1973_v59 = vmul.f32 -1.442695, %v828_v57 }
 0x1b3   :  { %v2012_v63 = vpop.eup %2011 }
 0x1b4   :  { %v2014_v4 = vpop.eup %2013  ;;  %v832_v9 = vadd.f32 1.0, %v2012_v63  ;;  %2015 = vpow2.f32 %v1973_v59 }
 0x1b5   :  { %v851_v12 = vadd.f32 1.0, %v2014_v4 }
 0x1b6   :  { %2017 = vrcp.f32 %v832_v9  ;;  %v844_v29 = vand.u32 2147483648, %v832_v9  ;;  %v842_v25 = vand.u32 2147483647, %v832_v9  ;;  %vm838_vm14 = vweird.f32 %v832_v9 }
 0x1b7   :  { %2019 = vrcp.f32 %v851_v12  ;;  %v863_v30 = vand.u32 2147483648, %v851_v12  ;;  %v861_v27 = vand.u32 2147483647, %v851_v12  ;;  %vm857_vm15 = vweird.f32 %v851_v12 }
 0x1b8   :  { %v845_v37 = vor.u32 1.1754944e-38, %v844_v29  ;;  %vm843_vm2 = vcmp.eq.f32.partialorder %v842_v25, 8.507059e+37 }
 0x1b9   :  { %v864_v57 = vor.u32 1.1754944e-38, %v863_v30  ;;  %vm862_vm3 = vcmp.eq.f32.partialorder %v861_v27, 8.507059e+37  ;;  %v4390_v27 = vld [vmem:[#allocation31_spill] sm:$0xff] }
 0x1ba   :  { %v2016_v16 = vpop.eup %2015 }
 0x1bb   :  { %v871_v17 = vadd.f32 1.0, %v2016_v16 }
 0x1bc   :  { %v2018_v21 = vpop.eup %2017 }
 0x1bd   :  { %v2020_v58 = vpop.eup %2019  ;;  %v834_v0 = vmul.f32 %v2018_v21, %v832_v9  ;;  %2021 = vrcp.f32 %v871_v17  ;;  %vm839_vm12 = vweird.f32 %v2018_v21  ;;  %vm877_vm5 = vweird.f32 %v871_v17 }
 0x1be   :  { %v853_v41 = vmul.f32 %v2020_v58, %v851_v12  ;;  %2023 = vtanh.f32 %v827_v5  ;;  %vm858_vm13 = vweird.f32 %v2020_v58  ;;  %vm840_vm0 = vmor %vm838_vm14, %vm839_vm12 }
 0x1bf   :  { %v835_v28 = vsub.f32 1.0, %v834_v0  ;;  %vm859_vm1 = vmor %vm857_vm15, %vm858_vm13 }
 0x1c0   :  { %v854_v6 = vsub.f32 1.0, %v853_v41 }
 0x1c1   :  { %v836_v38 = vmul.f32 %v2018_v21, %v835_v28 }
 0x1c2   :  { %v855_v26 = vmul.f32 %v2020_v58, %v854_v6  ;;  %v883_v6 = vand.u32 2147483648, %v871_v17 }
 0x1c3   :  { %v2022_v34 = vpop.eup %2021  ;;  %v837_v45 = vadd.f32 %v2018_v21, %v836_v38 }
 0x1c4   :  { %v856_v46 = vadd.f32 %v2020_v58, %v855_v26  ;;  %v873_v55 = vmul.f32 %v2022_v34, %v871_v17  ;;  %v2024_v63 = vpop.eup %2023  ;;  %vm878_vm4 = vweird.f32 %v2022_v34  ;;  %v884_v30 = vor.u32 1.1754944e-38, %v883_v6  ;;  %v3741_v26 = vld [vmem:[%s4276_s3 + $0x110] sm:$0xff]  ;;  %v3843_v6 = vld [vmem:[%s4276_s3 + $0x40] sm:$0xff] }
 0x1c5   :  { %v841_v59 = vsel %vm840_vm0, %v2018_v21, %v837_v45  ;;  %v881_v21 = vand.u32 2147483647, %v871_v17  ;;  %vm879_vm6 = vmor %vm877_vm5, %vm878_vm4  ;;  %v4389_v17 = vld [vmem:[#allocation30_spill] sm:$0xff]  ;;  %v3750_v45 = vld [vmem:[%s4276_s3 + $0xf0] sm:$0xff]  ;;  %4406 = vst [vmem:[#allocation44_spill] sm:$0xff] %v3843_v6 }
 0x1c6   :  { %v846_v4 = vsel %vm843_vm2, %v845_v37, %v841_v59  ;;  %v860_v15 = vsel %vm859_vm1, %v2020_v58, %v856_v46  ;;  %v874_v16 = vsub.f32 1.0, %v873_v55  ;;  %v3759_v37 = vld [vmem:[%s4276_s3 + $0xd0] sm:$0xff]  ;;  %v3765_v46 = vld [vmem:[%s4276_s3 + $0xd8] sm:$0xff]  ;;  %v3771_v55 = vld [vmem:[%s4276_s3 + $0xa0] sm:$0xff] }
 0x1c7   :  { %v865_v5 = vsel %vm862_vm3, %v864_v57, %v860_v15  ;;  %v888_v0 = vmul.f32 %v2024_v63, %v846_v4  ;;  %vm882_vm7 = vcmp.eq.f32.partialorder %v881_v21, 8.507059e+37  ;;  %4392 = vst [vmem:[#allocation30_spill] sm:$0xff] %v3759_v37  ;;  %v3777_v57 = vld [vmem:[%s4276_s3 + $0xa8] sm:$0xff]  ;;  %v3783_v59 = vld [vmem:[%s4276_s3 + $0xb0] sm:$0xff]  ;;  %v3789_v63 = vld [vmem:[%s4276_s3 + $0xb8] sm:$0xff] }
 0x1c8   :  { %v887_v41 = vmul.f32 %v865_v5, %v3453_v48  ;;  %v875_v28 = vmul.f32 %v2022_v34, %v874_v16  ;;  %v3732_v48 = vld [vmem:[%s4276_s3 + $0x130] sm:$0xff]  ;;  %4393 = vst [vmem:[#allocation31_spill] sm:$0xff] %v3765_v46  ;;  %v3795_v4 = vld [vmem:[%s4276_s3 + $0x80] sm:$0xff]  ;;  %v3801_v15 = vld [vmem:[%s4276_s3 + $0x88] sm:$0xff] }
 0x1c9   :  { %4395 = vst [vmem:[#allocation33_spill] sm:$0xff] %v3777_v57  ;;  %v3807_v16 = vld [vmem:[%s4276_s3 + $0x90] sm:$0xff]  ;;  %v3813_v5 = vld [vmem:[%s4276_s3 + $0x98] sm:$0xff]  ;;  %v3849_v21 = vld [vmem:[%s4276_s3 + $0x48] sm:$0xff] }
 0x1ca   :  { %v3700_v9 = vadd.f32 %v888_v0, %v887_v41  ;;  %v876_v12 = vadd.f32 %v2022_v34, %v875_v28  ;;  %4396 = vst [vmem:[#allocation34_spill] sm:$0xff] %v3783_v59  ;;  %v3819_v0 = vld [vmem:[%s4276_s3 + $0x60] sm:$0xff]  ;;  %v3825_v41 = vld [vmem:[%s4276_s3 + $0x68] sm:$0xff]  ;;  %v3831_v28 = vld [vmem:[%s4276_s3 + $0x70] sm:$0xff] }
 0x1cb   :  { %4397 = vst [vmem:[#allocation35_spill] sm:$0xff] %v3789_v63 }
 0x1cc   :  { %2025 = vtanh.f32 %v3700_v9  ;;  %v880_v29 = vsel %vm879_vm6, %v2022_v34, %v876_v12  ;;  %v4391_v34 = vld [vmem:[#allocation32_spill] sm:$0xff]  ;;  %4398 = vst [vmem:[#allocation36_spill] sm:$0xff] %v3795_v4  ;;  %v3837_v12 = vld [vmem:[%s4276_s3 + $0x78] sm:$0xff] }
 0x1cd   :  { %v885_v38 = vsel %vm882_vm7, %v884_v30, %v880_v29  ;;  %4394 = vst [vmem:[#allocation32_spill] sm:$0xff] %v3771_v55  ;;  %v3855_v29 = vld [vmem:[%s4276_s3 + $0x50] sm:$0xff]  ;;  %v3861_v30 = vld [vmem:[%s4276_s3 + $0x58] sm:$0xff] }
 0x1ce   :  { %4399 = vst [vmem:[#allocation37_spill] sm:$0xff] %v3801_v15 }
 0x1cf   :  { %4400 = vst [vmem:[#allocation38_spill] sm:$0xff] %v3807_v16 }
 0x1d0   :  { %4401 = vst [vmem:[#allocation39_spill] sm:$0xff] %v3813_v5 }
 0x1d1   :  { %4402 = vst [vmem:[#allocation40_spill] sm:$0xff] %v3819_v0 }
 0x1d2   :  { %v2026_v58 = vpop.eup %2025  ;;  %4403 = vst [vmem:[#allocation41_spill] sm:$0xff] %v3825_v41 }
 0x1d3   :  { %v891_v25 = vmul.f32 %v2026_v58, %v885_v38  ;;  %4404 = vst [vmem:[#allocation42_spill] sm:$0xff] %v3831_v28  ;;  %v3867_v58 = vld [vmem:[%s4276_s3 + $0x20] sm:$0xff]  ;;  %v3873_v38 = vld [vmem:[%s4276_s3 + $0x28] sm:$0xff] }
 0x1d4   :  { %4405 = vst [vmem:[#allocation43_spill] sm:$0xff] %v3837_v12 }
 0x1d5   :  { %908 = vmatmul.f32.vlgmr.msrb.gmra.mxu0 %v891_v25  ;;  %928 = vmatmul.f32.vlgmr.msrb.gmra.mxu1 %v891_v25  ;;  %4407 = vst [vmem:[#allocation45_spill] sm:$0xff] %v3849_v21 }
 0x1d6   :  { %948 = vmatmul.f32.vlgmr.msrb.gmra.mxu2 %v891_v25  ;;  %968 = vmatmul.f32.vlgmr.msrb.gmra.mxu3 %v891_v25  ;;  %4408 = vst [vmem:[#allocation46_spill] sm:$0xff] %v3855_v29  ;;  %v3881_v25 = vld [vmem:[%s4276_s3] sm:$0xff] }
 0x1d7   :  { %1186 = vmatpush.msrb.mxu0 %v3459_v56  ;;  %1206 = vmatpush.msrb.mxu1 %v3465_v1  ;;  %4409 = vst [vmem:[#allocation47_spill] sm:$0xff] %v3861_v30 }
 0x1d8   :  { %1226 = vmatpush.msrb.mxu2 %v3471_v39  ;;  %1246 = vmatpush.msrb.mxu3 %v3477_v24  ;;  %4410 = vst [vmem:[#allocation48_spill] sm:$0xff] %v3867_v58 }
 0x1d9   :  { %1187 = vmatpush.msrb.mxu0 %v3483_v61  ;;  %1207 = vmatpush.msrb.mxu1 %v3489_v14  ;;  %4411 = vst [vmem:[#allocation49_spill] sm:$0xff] %v3873_v38 }
 0x1da   :  { %1227 = vmatpush.msrb.mxu2 %v3495_v18  ;;  %1247 = vmatpush.msrb.mxu3 %v3501_v20  ;;  %4412 = vst [vmem:[#allocation50_spill] sm:$0xff] %v3881_v25 }
 0x1db   :  { %1188 = vmatpush.msrb.mxu0 %v3507_v31  ;;  %1208 = vmatpush.msrb.mxu1 %v3513_v23 }
 0x1dc   :  { %1228 = vmatpush.msrb.mxu2 %v3519_v7  ;;  %1248 = vmatpush.msrb.mxu3 %v3525_v13 }
 0x1dd   :  { %1189 = vmatpush.msrb.mxu0 %v3531_v32  ;;  %1209 = vmatpush.msrb.mxu1 %v3537_v47 }
 0x1de   :  { %1229 = vmatpush.msrb.mxu2 %v3543_v62  ;;  %1249 = vmatpush.msrb.mxu3 %v3549_v60 }
 0x1df   :  { %1190 = vmatpush.msrb.mxu0 %v3555_v35  ;;  %1210 = vmatpush.msrb.mxu1 %v3561_v53 }
 0x1e0   :  { %1230 = vmatpush.msrb.mxu2 %v3567_v2  ;;  %1250 = vmatpush.msrb.mxu3 %v3573_v40 }
 0x1e1   :  { %1191 = vmatpush.msrb.mxu0 %v3579_v36  ;;  %1211 = vmatpush.msrb.mxu1 %v3585_v52 }
 0x1e2   :  { %1231 = vmatpush.msrb.mxu2 %v3591_v22  ;;  %1251 = vmatpush.msrb.mxu3 %v3597_v10 }
 0x1e3   :  { %1192 = vmatpush.msrb.mxu0 %v3603_v11  ;;  %1212 = vmatpush.msrb.mxu1 %v3609_v54 }
 0x1e4   :  { %1232 = vmatpush.msrb.mxu2 %v3732_v48  ;;  %1252 = vmatpush.msrb.mxu3 %v3616_v49 }
 0x1e5   :  { %1193 = vmatpush.msrb.mxu0 %v3622_v50  ;;  %1213 = vmatpush.msrb.mxu1 %v4389_v17 }
 0x1e6   :  { %1233 = vmatpush.msrb.mxu2 %v3741_v26  ;;  %1253 = vmatpush.msrb.mxu3 %v3635_v8 }
 0x1e7   :  { %1194 = vmatpush.msrb.mxu0 %v4390_v27  ;;  %1214 = vmatpush.msrb.mxu1 %v4391_v34 }
 0x1e8   :  { %1234 = vmatpush.msrb.mxu2 %v3750_v45  ;;  %1254 = vmatpush.msrb.mxu3 %v3654_v33 }
 0x1e9   :  { %1195 = vmatpush.msrb.mxu0 %v3660_v42  ;;  %1215 = vmatpush.msrb.mxu1 %v3666_v43 }
 0x1ea   :  { %1235 = vmatpush.msrb.mxu2 %v3759_v37  ;;  %1255 = vmatpush.msrb.mxu3 %v3765_v46 }
 0x1eb   :  { %1196 = vmatpush.msrb.mxu0 %v3771_v55  ;;  %1216 = vmatpush.msrb.mxu1 %v3777_v57 }
 0x1ec   :  { %1236 = vmatpush.msrb.mxu2 %v3783_v59  ;;  %1256 = vmatpush.msrb.mxu3 %v3789_v63 }
 0x1ed   :  { %1197 = vmatpush.msrb.mxu0 %v3795_v4  ;;  %1217 = vmatpush.msrb.mxu1 %v3801_v15 }
 0x1ee   :  { %1237 = vmatpush.msrb.mxu2 %v3807_v16  ;;  %1257 = vmatpush.msrb.mxu3 %v3813_v5 }
 0x1ef   :  { %1198 = vmatpush.msrb.mxu0 %v3819_v0  ;;  %1218 = vmatpush.msrb.mxu1 %v3825_v41 }
 0x1f0   :  { %1238 = vmatpush.msrb.mxu2 %v3831_v28  ;;  %1258 = vmatpush.msrb.mxu3 %v3837_v12  ;;  %v4416_v28 = vld [vmem:[#allocation8_spill] sm:$0xff] }
 0x1f1   :  { %1199 = vmatpush.msrb.mxu0 %v3843_v6  ;;  %1219 = vmatpush.msrb.mxu1 %v3849_v21 }
 0x1f2   :  { %1239 = vmatpush.msrb.mxu2 %v3855_v29  ;;  %1259 = vmatpush.msrb.mxu3 %v3861_v30  ;;  %v4415_v29 = vld [vmem:[#allocation9_spill] sm:$0xff] }
 0x1f3   :  { %1200 = vmatpush.msrb.mxu0 %v3867_v58  ;;  %1220 = vmatpush.msrb.mxu1 %v3873_v38  ;;  %v3887_v58 = vld [vmem:[%s4276_s3 + $0x8] sm:$0xff]  ;;  %v4414_v38 = vld [vmem:[#allocation6_spill] sm:$0xff] }
 0x1f4   :  { %1240 = vmatpush.msrb.mxu2 %v4358_v3  ;;  %1260 = vmatpush.msrb.mxu3 %v3222_v44  ;;  %4413 = vst [vmem:[#allocation51_spill] sm:$0xff] %v3887_v58 }
 0x1f5   :  { %1201 = vmatpush.msrb.mxu0 %v3881_v25  ;;  %1221 = vmatpush.msrb.mxu1 %v3887_v58 }
 0x1f6   :  { %1241 = vmatpush.msrb.mxu2 %v3227_v51  ;;  %1261 = vmatpush.msrb.mxu3 %v3238_v19 }
 0x252   :  { %v909_v3 = vpop.f32.mrf.mxu0  ;;  %v929_v44 = vpop.f32.mrf.mxu1 }
 0x253   :  { %v972_v30 = vadd.f32 %v909_v3, %v4414_v38  ;;  %v973_v21 = vadd.f32 %v929_v44, %v4415_v29  ;;  %v4417_v29 = vld [vmem:[#allocation7_spill] sm:$0xff] }
 0x255   :  { %v1974_v6 = vmul.f32 -1.442695, %v972_v30  ;;  %v1975_v12 = vmul.f32 -1.442695, %v973_v21 }
 0x257   :  { %2027 = vpow2.f32 %v1974_v6 }
 0x258   :  { %2029 = vpow2.f32 %v1975_v12 }
 0x259   :  { %v969_v25 = vpop.f32.mrf.mxu3  ;;  %v949_v19 = vpop.f32.mrf.mxu2 }
 0x25a   :  { %v975_v41 = vadd.f32 %v969_v25, %v4416_v28  ;;  %v974_v30 = vadd.f32 %v949_v19, %v4417_v29 }
 0x25c   :  { %v1976_v0 = vmul.f32 -1.442695, %v975_v41 }
 0x25d   :  { %v2028_v5 = vpop.eup %2027 }
 0x25e   :  { %v2030_v58 = vpop.eup %2029  ;;  %v979_v16 = vadd.f32 1.0, %v2028_v5  ;;  %2031 = vpow2.f32 %v1976_v0 }
 0x25f   :  { %v998_v51 = vadd.f32 1.0, %v2030_v58 }
 0x260   :  { %2033 = vrcp.f32 %v979_v16  ;;  %v991_v41 = vand.u32 2147483648, %v979_v16  ;;  %v989_v0 = vand.u32 2147483647, %v979_v16  ;;  %vm985_vm10 = vweird.f32 %v979_v16 }
 0x261   :  { %2035 = vrcp.f32 %v998_v51  ;;  %v1010_v25 = vand.u32 2147483648, %v998_v51  ;;  %v1008_v4 = vand.u32 2147483647, %v998_v51  ;;  %vm1004_vm11 = vweird.f32 %v998_v51 }
 0x262   :  { %v992_v19 = vor.u32 1.1754944e-38, %v991_v41  ;;  %vm990_vm14 = vcmp.eq.f32.partialorder %v989_v0, 8.507059e+37 }
 0x263   :  { %vm1009_vm15 = vcmp.eq.f32.partialorder %v1008_v4, 8.507059e+37 }
 0x264   :  { %v2032_v15 = vpop.eup %2031 }
 0x265   :  { %v1018_v38 = vadd.f32 1.0, %v2032_v15 }
 0x266   :  { %v2034_v3 = vpop.eup %2033 }
 0x267   :  { %v2036_v21 = vpop.eup %2035  ;;  %v981_v6 = vmul.f32 %v2034_v3, %v979_v16  ;;  %2037 = vrcp.f32 %v1018_v38  ;;  %vm986_vm8 = vweird.f32 %v2034_v3  ;;  %v1030_v41 = vand.u32 2147483648, %v1018_v38 }
 0x268   :  { %v1000_v12 = vmul.f32 %v2036_v21, %v998_v51  ;;  %2039 = vtanh.f32 %v974_v30  ;;  %vm1005_vm9 = vweird.f32 %v2036_v21  ;;  %vm987_vm12 = vmor %vm985_vm10, %vm986_vm8  ;;  %vm1024_vm1 = vweird.f32 %v1018_v38 }
 0x269   :  { %v982_v44 = vsub.f32 1.0, %v981_v6  ;;  %vm1006_vm13 = vmor %vm1004_vm11, %vm1005_vm9  ;;  %v1011_v6 = vor.u32 1.1754944e-38, %v1010_v25  ;;  %v1031_v0 = vor.u32 1.1754944e-38, %v1030_v41  ;;  %v4436_v41 = vld [vmem:[#allocation48_spill] sm:$0xff] }
 0x26a   :  { %v1001_v28 = vsub.f32 1.0, %v1000_v12 }
 0x26b   :  { %v983_v5 = vmul.f32 %v2034_v3, %v982_v44 }
 0x26c   :  { %v1002_v58 = vmul.f32 %v2036_v21, %v1001_v28 }
 0x26d   :  { %v2038_v63 = vpop.eup %2037  ;;  %v984_v15 = vadd.f32 %v2034_v3, %v983_v5 }
 0x26e   :  { %v1003_v29 = vadd.f32 %v2036_v21, %v1002_v58  ;;  %v1020_v59 = vmul.f32 %v2038_v63, %v1018_v38  ;;  %v2040_v30 = vpop.eup %2039  ;;  %vm1025_vm0 = vweird.f32 %v2038_v63  ;;  %v4425_v58 = vld [vmem:[#allocation37_spill] sm:$0xff] }
 0x26f   :  { %v988_v12 = vsel %vm987_vm12, %v2034_v3, %v984_v15  ;;  %v1028_v3 = vand.u32 2147483647, %v1018_v38  ;;  %vm1026_vm2 = vmor %vm1024_vm1, %vm1025_vm0  ;;  %v4424_v38 = vld [vmem:[#allocation36_spill] sm:$0xff]  ;;  %v4426_v15 = vld [vmem:[#allocation38_spill] sm:$0xff] }
 0x270   :  { %v993_v57 = vsel %vm990_vm14, %v992_v19, %v988_v12  ;;  %v1007_v44 = vsel %vm1006_vm13, %v2036_v21, %v1003_v29  ;;  %v1021_v55 = vsub.f32 1.0, %v1020_v59  ;;  %v4427_v19 = vld [vmem:[#allocation39_spill] sm:$0xff]  ;;  %v4428_v29 = vld [vmem:[#allocation40_spill] sm:$0xff]  ;;  %v4430_v12 = vld [vmem:[#allocation42_spill] sm:$0xff] }
 0x271   :  { %v1012_v28 = vsel %vm1009_vm15, %v1011_v6, %v1007_v44  ;;  %v1035_v46 = vmul.f32 %v2040_v30, %v993_v57  ;;  %vm1029_vm3 = vcmp.eq.f32.partialorder %v1028_v3, 8.507059e+37  ;;  %v4422_v57 = vld [vmem:[#allocation34_spill] sm:$0xff]  ;;  %v4429_v6 = vld [vmem:[#allocation41_spill] sm:$0xff]  ;;  %v4431_v30 = vld [vmem:[#allocation43_spill] sm:$0xff] }
 0x272   :  { %v1034_v37 = vmul.f32 %v1012_v28, %v3700_v9  ;;  %v1022_v5 = vmul.f32 %v2038_v63, %v1021_v55  ;;  %v4418_v9 = vld [vmem:[#allocation30_spill] sm:$0xff]  ;;  %v4421_v55 = vld [vmem:[#allocation33_spill] sm:$0xff]  ;;  %v4432_v44 = vld [vmem:[#allocation44_spill] sm:$0xff] }
 0x273   :  { %v4433_v28 = vld [vmem:[#allocation45_spill] sm:$0xff] }
 0x274   :  { %v3897_v16 = vadd.f32 %v1035_v46, %v1034_v37  ;;  %v1023_v51 = vadd.f32 %v2038_v63, %v1022_v5  ;;  %v4419_v37 = vld [vmem:[#allocation31_spill] sm:$0xff]  ;;  %v4420_v46 = vld [vmem:[#allocation32_spill] sm:$0xff]  ;;  %v4434_v5 = vld [vmem:[#allocation46_spill] sm:$0xff] }
 0x275   :  { %v4437_v3 = vld [vmem:[#allocation49_spill] sm:$0xff] }
 0x276   :  { %2041 = vtanh.f32 %v3897_v16  ;;  %v1027_v25 = vsel %vm1026_vm2, %v2038_v63, %v1023_v51  ;;  %v4423_v63 = vld [vmem:[#allocation35_spill] sm:$0xff] }
 0x277   :  { %v1032_v59 = vsel %vm1029_vm3, %v1031_v0, %v1027_v25  ;;  %v4435_v51 = vld [vmem:[#allocation47_spill] sm:$0xff]  ;;  %v3961_v25 = vld [vmem:[%s4276_s3 + $0x30] sm:$0xff]  ;;  %v3967_v0 = vld [vmem:[%s4276_s3 + $0x38] sm:$0xff] }
 0x278   :  { %4438 = vst [vmem:[#allocation6_spill] sm:$0xff] %v3961_v25 }
 0x279   :  { %4439 = vst [vmem:[#allocation9_spill] sm:$0xff] %v3967_v0 }
 0x27c   :  { %v2042_v4 = vpop.eup %2041 }
 0x27d   :  { %v1038_v21 = vmul.f32 %v2042_v4, %v1032_v59  ;;  %v4440_v4 = vld [vmem:[#allocation50_spill] sm:$0xff]  ;;  %v4441_v59 = vld [vmem:[#allocation51_spill] sm:$0xff] }
 0x27f   :  { %1055 = vmatmul.f32.vlgmr.msra.gmra.mxu0 %v1038_v21  ;;  %1075 = vmatmul.f32.vlgmr.msra.gmra.mxu1 %v1038_v21 }
 0x280   :  { %1095 = vmatmul.f32.vlgmr.msra.gmra.mxu2 %v1038_v21  ;;  %1115 = vmatmul.f32.vlgmr.msra.gmra.mxu3 %v1038_v21  ;;  %v3975_v21 = vld [vmem:[%s4276_s3 + $0x10] sm:$0xff] }
 0x281   :  { %1333 = vmatpush.msra.mxu0 %v3459_v56  ;;  %1353 = vmatpush.msra.mxu1 %v3465_v1  ;;  %4442 = vst [vmem:[#allocation8_spill] sm:$0xff] %v3975_v21 }
 0x282   :  { %1373 = vmatpush.msra.mxu2 %v3471_v39  ;;  %1393 = vmatpush.msra.mxu3 %v3477_v24 }
 0x283   :  { %1334 = vmatpush.msra.mxu0 %v3483_v61  ;;  %1354 = vmatpush.msra.mxu1 %v3489_v14 }
 0x284   :  { %1374 = vmatpush.msra.mxu2 %v3495_v18  ;;  %1394 = vmatpush.msra.mxu3 %v3501_v20 }
 0x285   :  { %1335 = vmatpush.msra.mxu0 %v3507_v31  ;;  %1355 = vmatpush.msra.mxu1 %v3513_v23 }
 0x286   :  { %1375 = vmatpush.msra.mxu2 %v3519_v7  ;;  %1395 = vmatpush.msra.mxu3 %v3525_v13 }
 0x287   :  { %1336 = vmatpush.msra.mxu0 %v3531_v32  ;;  %1356 = vmatpush.msra.mxu1 %v3537_v47 }
 0x288   :  { %1376 = vmatpush.msra.mxu2 %v3543_v62  ;;  %1396 = vmatpush.msra.mxu3 %v3549_v60 }
 0x289   :  { %1337 = vmatpush.msra.mxu0 %v3555_v35  ;;  %1357 = vmatpush.msra.mxu1 %v3561_v53 }
 0x28a   :  { %1377 = vmatpush.msra.mxu2 %v3567_v2  ;;  %1397 = vmatpush.msra.mxu3 %v3573_v40 }
 0x28b   :  { %1338 = vmatpush.msra.mxu0 %v3579_v36  ;;  %1358 = vmatpush.msra.mxu1 %v3585_v52 }
 0x28c   :  { %1378 = vmatpush.msra.mxu2 %v3591_v22  ;;  %1398 = vmatpush.msra.mxu3 %v3597_v10 }
 0x28d   :  { %1339 = vmatpush.msra.mxu0 %v3603_v11  ;;  %1359 = vmatpush.msra.mxu1 %v3609_v54 }
 0x28e   :  { %1379 = vmatpush.msra.mxu2 %v3732_v48  ;;  %1399 = vmatpush.msra.mxu3 %v3616_v49 }
 0x28f   :  { %1340 = vmatpush.msra.mxu0 %v3622_v50  ;;  %1360 = vmatpush.msra.mxu1 %v4389_v17 }
 0x290   :  { %1380 = vmatpush.msra.mxu2 %v3741_v26  ;;  %1400 = vmatpush.msra.mxu3 %v3635_v8 }
 0x291   :  { %1341 = vmatpush.msra.mxu0 %v4390_v27  ;;  %1361 = vmatpush.msra.mxu1 %v4391_v34 }
 0x292   :  { %1381 = vmatpush.msra.mxu2 %v3750_v45  ;;  %1401 = vmatpush.msra.mxu3 %v3654_v33 }
 0x293   :  { %1342 = vmatpush.msra.mxu0 %v3660_v42  ;;  %1362 = vmatpush.msra.mxu1 %v3666_v43 }
 0x294   :  { %1382 = vmatpush.msra.mxu2 %v4418_v9  ;;  %1402 = vmatpush.msra.mxu3 %v4419_v37 }
 0x295   :  { %1343 = vmatpush.msra.mxu0 %v4420_v46  ;;  %1363 = vmatpush.msra.mxu1 %v4421_v55 }
 0x296   :  { %1383 = vmatpush.msra.mxu2 %v4422_v57  ;;  %1403 = vmatpush.msra.mxu3 %v4423_v63 }
 0x297   :  { %1344 = vmatpush.msra.mxu0 %v4424_v38  ;;  %1364 = vmatpush.msra.mxu1 %v4425_v58 }
 0x298   :  { %1384 = vmatpush.msra.mxu2 %v4426_v15  ;;  %1404 = vmatpush.msra.mxu3 %v4427_v19 }
 0x299   :  { %1345 = vmatpush.msra.mxu0 %v4428_v29  ;;  %1365 = vmatpush.msra.mxu1 %v4429_v6 }
 0x29a   :  { %1385 = vmatpush.msra.mxu2 %v4430_v12  ;;  %1405 = vmatpush.msra.mxu3 %v4431_v30  ;;  %v4446_v30 = vld [vmem:[#allocation13_spill] sm:$0xff] }
 0x29b   :  { %1346 = vmatpush.msra.mxu0 %v4432_v44  ;;  %1366 = vmatpush.msra.mxu1 %v4433_v28 }
 0x29c   :  { %1386 = vmatpush.msra.mxu2 %v4434_v5  ;;  %1406 = vmatpush.msra.mxu3 %v4435_v51  ;;  %v4445_v51 = vld [vmem:[#allocation11_spill] sm:$0xff] }
 0x29d   :  { %1347 = vmatpush.msra.mxu0 %v4436_v41  ;;  %1367 = vmatpush.msra.mxu1 %v4437_v3  ;;  %v4444_v41 = vld [vmem:[#allocation10_spill] sm:$0xff] }
 0x29e   :  { %1387 = vmatpush.msra.mxu2 %v3961_v25  ;;  %1407 = vmatpush.msra.mxu3 %v3967_v0  ;;  %v3981_v25 = vld [vmem:[%s4276_s3 + $0x18] sm:$0xff] }
 0x29f   :  { %1348 = vmatpush.msra.mxu0 %v4440_v4  ;;  %1368 = vmatpush.msra.mxu1 %v4441_v59  ;;  %4443 = vst [vmem:[#allocation7_spill] sm:$0xff] %v3981_v25 }
 0x2a0   :  { %1388 = vmatpush.msra.mxu2 %v3975_v21  ;;  %1408 = vmatpush.msra.mxu3 %v3981_v25 }
 0x2fc   :  { %v1056_v3 = vpop.f32.mrf.mxu0  ;;  %v1076_v0 = vpop.f32.mrf.mxu1 }
 0x2fd   :  { %v1119_v4 = vadd.f32 %v1056_v3, %v4444_v41  ;;  %v1120_v59 = vadd.f32 %v1076_v0, %v4445_v51  ;;  %v4447_v51 = vld [vmem:[#allocation12_spill] sm:$0xff] }
 0x2ff   :  { %v1977_v5 = vmul.f32 -1.442695, %v1119_v4  ;;  %v1978_v28 = vmul.f32 -1.442695, %v1120_v59 }
 0x301   :  { %2043 = vpow2.f32 %v1977_v5 }
 0x302   :  { %2045 = vpow2.f32 %v1978_v28 }
 0x303   :  { %v1116_v44 = vpop.f32.mrf.mxu3  ;;  %v1096_v25 = vpop.f32.mrf.mxu2 }
 0x304   :  { %v1122_v21 = vadd.f32 %v1116_v44, %v4446_v30  ;;  %v1121_v0 = vadd.f32 %v1096_v25, %v4447_v51 }
 0x306   :  { %v1979_v12 = vmul.f32 -1.442695, %v1122_v21 }
 0x307   :  { %v2044_v6 = vpop.eup %2043 }
 0x308   :  { %v2046_v29 = vpop.eup %2045  ;;  %v1126_v19 = vadd.f32 1.0, %v2044_v6  ;;  %2047 = vpow2.f32 %v1979_v12 }
 0x309   :  { %v1145_v15 = vadd.f32 1.0, %v2046_v29 }
 0x30a   :  { %2049 = vrcp.f32 %v1126_v19  ;;  %v1138_v44 = vand.u32 2147483648, %v1126_v19  ;;  %v1136_v29 = vand.u32 2147483647, %v1126_v19  ;;  %vm1132_vm6 = vweird.f32 %v1126_v19 }
 0x30b   :  { %2051 = vrcp.f32 %v1145_v15  ;;  %v1157_v21 = vand.u32 2147483648, %v1145_v15  ;;  %v1155_v38 = vand.u32 2147483647, %v1145_v15  ;;  %vm1151_vm7 = vweird.f32 %v1145_v15 }
 0x30c   :  { %v1139_v25 = vor.u32 1.1754944e-38, %v1138_v44  ;;  %vm1137_vm10 = vcmp.eq.f32.partialorder %v1136_v29, 8.507059e+37 }
 0x30d   :  { %vm1156_vm11 = vcmp.eq.f32.partialorder %v1155_v38, 8.507059e+37 }
 0x30e   :  { %v2048_v58 = vpop.eup %2047 }
 0x30f   :  { %v1165_v41 = vadd.f32 1.0, %v2048_v58 }
 0x310   :  { %v2050_v3 = vpop.eup %2049 }
 0x311   :  { %v2052_v4 = vpop.eup %2051  ;;  %v1128_v5 = vmul.f32 %v2050_v3, %v1126_v19  ;;  %2053 = vrcp.f32 %v1165_v41  ;;  %vm1133_vm4 = vweird.f32 %v2050_v3  ;;  %v1177_v44 = vand.u32 2147483648, %v1165_v41 }
 0x312   :  { %v1147_v28 = vmul.f32 %v2052_v4, %v1145_v15  ;;  %2055 = vtanh.f32 %v1121_v0  ;;  %vm1152_vm5 = vweird.f32 %v2052_v4  ;;  %vm1134_vm8 = vmor %vm1132_vm6, %vm1133_vm4  ;;  %vm1171_vm13 = vweird.f32 %v1165_v41 }
 0x313   :  { %v1129_v59 = vsub.f32 1.0, %v1128_v5  ;;  %vm1153_vm9 = vmor %vm1151_vm7, %vm1152_vm5  ;;  %v1158_v5 = vor.u32 1.1754944e-38, %v1157_v21  ;;  %v1178_v29 = vor.u32 1.1754944e-38, %v1177_v44 }
 0x314   :  { %v1148_v30 = vsub.f32 1.0, %v1147_v28 }
 0x315   :  { %v1130_v6 = vmul.f32 %v2050_v3, %v1129_v59 }
 0x316   :  { %v1149_v12 = vmul.f32 %v2052_v4, %v1148_v30 }
 0x317   :  { %v2054_v63 = vpop.eup %2053  ;;  %v1131_v58 = vadd.f32 %v2050_v3, %v1130_v6 }
 0x318   :  { %v1150_v51 = vadd.f32 %v2052_v4, %v1149_v12  ;;  %v1167_v57 = vmul.f32 %v2054_v63, %v1165_v41  ;;  %v2056_v0 = vpop.eup %2055  ;;  %vm1172_vm12 = vweird.f32 %v2054_v63 }
 0x319   :  { %v1135_v28 = vsel %vm1134_vm8, %v2050_v3, %v1131_v58  ;;  %v1175_v3 = vand.u32 2147483647, %v1165_v41  ;;  %vm1173_vm14 = vmor %vm1171_vm13, %vm1172_vm12 }
 0x31a   :  { %v1140_v55 = vsel %vm1137_vm10, %v1139_v25, %v1135_v28  ;;  %v1154_v59 = vsel %vm1153_vm9, %v2052_v4, %v1150_v51  ;;  %v1168_v46 = vsub.f32 1.0, %v1167_v57 }
 0x31b   :  { %v1159_v30 = vsel %vm1156_vm11, %v1158_v5, %v1154_v59  ;;  %v1182_v37 = vmul.f32 %v2056_v0, %v1140_v55  ;;  %vm1176_vm15 = vcmp.eq.f32.partialorder %v1175_v3, 8.507059e+37  ;;  %v4477_v5 = vld [vmem:[#allocation16_spill] sm:$0xff] }
 0x31c   :  { %v1181_v9 = vmul.f32 %v1159_v30, %v3897_v16  ;;  %v1169_v6 = vmul.f32 %v2054_v63, %v1168_v46  ;;  %v4476_v16 = vld [vmem:[#allocation17_spill] sm:$0xff] }
 0x31e   :  { %v3989_v19 = vadd.f32 %v1182_v37, %v1181_v9  ;;  %v1170_v15 = vadd.f32 %v2054_v63, %v1169_v6 }
 0x320   :  { %2057 = vtanh.f32 %v3989_v19  ;;  %v1174_v21 = vsel %vm1173_vm14, %v2054_v63, %v1170_v15 }
 0x321   :  { %v1179_v57 = vsel %vm1176_vm15, %v1178_v29, %v1174_v21 }
 0x326   :  { %v2058_v38 = vpop.eup %2057 }
 0x327   :  { %v1185_v4 = vmul.f32 %v2058_v38, %v1179_v57 }
 0x329   :  { %1202 = vmatmul.f32.vlgmr.msrb.gmra.mxu0 %v1185_v4  ;;  %1222 = vmatmul.f32.vlgmr.msrb.gmra.mxu1 %v1185_v4 }
 0x32a   :  { %1242 = vmatmul.f32.vlgmr.msrb.gmra.mxu2 %v1185_v4  ;;  %1262 = vmatmul.f32.vlgmr.msrb.gmra.mxu3 %v1185_v4 }
 0x32b   :  { %1480 = vmatpush.msrb.mxu0 %v3459_v56  ;;  %1500 = vmatpush.msrb.mxu1 %v3465_v1  ;;  %v4451_v56 = vld [vmem:[#allocation33_spill] sm:$0xff]  ;;  %v4452_v1 = vld [vmem:[#allocation34_spill] sm:$0xff] }
 0x32c   :  { %1520 = vmatpush.msrb.mxu2 %v3471_v39  ;;  %1540 = vmatpush.msrb.mxu3 %v3477_v24  ;;  %v4453_v39 = vld [vmem:[#allocation35_spill] sm:$0xff]  ;;  %v4454_v24 = vld [vmem:[#allocation36_spill] sm:$0xff] }
 0x32d   :  { %1481 = vmatpush.msrb.mxu0 %v3483_v61  ;;  %1501 = vmatpush.msrb.mxu1 %v3489_v14  ;;  %v4455_v61 = vld [vmem:[#allocation37_spill] sm:$0xff]  ;;  %v4456_v14 = vld [vmem:[#allocation38_spill] sm:$0xff] }
 0x32e   :  { %1521 = vmatpush.msrb.mxu2 %v3495_v18  ;;  %1541 = vmatpush.msrb.mxu3 %v3501_v20  ;;  %v4459_v18 = vld [vmem:[#allocation41_spill] sm:$0xff]  ;;  %v4460_v20 = vld [vmem:[#allocation42_spill] sm:$0xff] }
 0x32f   :  { %1482 = vmatpush.msrb.mxu0 %v3507_v31  ;;  %1502 = vmatpush.msrb.mxu1 %v3513_v23  ;;  %v4461_v31 = vld [vmem:[#allocation43_spill] sm:$0xff]  ;;  %v4462_v23 = vld [vmem:[#allocation44_spill] sm:$0xff] }
 0x330   :  { %1522 = vmatpush.msrb.mxu2 %v3519_v7  ;;  %1542 = vmatpush.msrb.mxu3 %v3525_v13  ;;  %v4463_v7 = vld [vmem:[#allocation45_spill] sm:$0xff]  ;;  %v4464_v13 = vld [vmem:[#allocation46_spill] sm:$0xff] }
 0x331   :  { %1483 = vmatpush.msrb.mxu0 %v3531_v32  ;;  %1503 = vmatpush.msrb.mxu1 %v3537_v47  ;;  %v4465_v32 = vld [vmem:[#allocation47_spill] sm:$0xff]  ;;  %v4466_v47 = vld [vmem:[#allocation48_spill] sm:$0xff] }
 0x332   :  { %1523 = vmatpush.msrb.mxu2 %v3543_v62  ;;  %1543 = vmatpush.msrb.mxu3 %v3549_v60  ;;  %v4467_v62 = vld [vmem:[#allocation49_spill] sm:$0xff]  ;;  %v4468_v60 = vld [vmem:[#allocation6_spill] sm:$0xff] }
 0x333   :  { %1484 = vmatpush.msrb.mxu0 %v3555_v35  ;;  %1504 = vmatpush.msrb.mxu1 %v3561_v53  ;;  %v4469_v35 = vld [vmem:[#allocation9_spill] sm:$0xff]  ;;  %v4470_v53 = vld [vmem:[#allocation50_spill] sm:$0xff] }
 0x334   :  { %1524 = vmatpush.msrb.mxu2 %v3567_v2  ;;  %1544 = vmatpush.msrb.mxu3 %v3573_v40  ;;  %v4471_v2 = vld [vmem:[#allocation51_spill] sm:$0xff]  ;;  %v4472_v40 = vld [vmem:[#allocation8_spill] sm:$0xff] }
 0x335   :  { %1485 = vmatpush.msrb.mxu0 %v3579_v36  ;;  %1505 = vmatpush.msrb.mxu1 %v3585_v52  ;;  %v4473_v36 = vld [vmem:[#allocation7_spill] sm:$0xff] }
 0x336   :  { %1525 = vmatpush.msrb.mxu2 %v3591_v22  ;;  %1545 = vmatpush.msrb.mxu3 %v3597_v10  ;;  %v4474_v10 = vld [vmem:[#allocation14_spill] sm:$0xff] }
 0x337   :  { %1486 = vmatpush.msrb.mxu0 %v3603_v11  ;;  %1506 = vmatpush.msrb.mxu1 %v3609_v54  ;;  %v4450_v54 = vld [vmem:[#allocation32_spill] sm:$0xff] }
 0x338   :  { %1526 = vmatpush.msrb.mxu2 %v3732_v48  ;;  %1546 = vmatpush.msrb.mxu3 %v3616_v49  ;;  %v4448_v49 = vld [vmem:[#allocation30_spill] sm:$0xff] }
 0x339   :  { %1487 = vmatpush.msrb.mxu0 %v3622_v50  ;;  %1507 = vmatpush.msrb.mxu1 %v4389_v17  ;;  %v4449_v50 = vld [vmem:[#allocation31_spill] sm:$0xff] }
 0x33a   :  { %1527 = vmatpush.msrb.mxu2 %v3741_v26  ;;  %1547 = vmatpush.msrb.mxu3 %v3635_v8  ;;  %v4475_v8 = vld [vmem:[#allocation15_spill] sm:$0xff] }
 0x33b   :  { %1488 = vmatpush.msrb.mxu0 %v4390_v27  ;;  %1508 = vmatpush.msrb.mxu1 %v4391_v34 }
 0x33c   :  { %1528 = vmatpush.msrb.mxu2 %v3750_v45  ;;  %1548 = vmatpush.msrb.mxu3 %v3654_v33 }
 0x33d   :  { %1489 = vmatpush.msrb.mxu0 %v3660_v42  ;;  %1509 = vmatpush.msrb.mxu1 %v3666_v43  ;;  %v4457_v42 = vld [vmem:[#allocation39_spill] sm:$0xff]  ;;  %v4458_v43 = vld [vmem:[#allocation40_spill] sm:$0xff] }
 0x33e   :  { %1529 = vmatpush.msrb.mxu2 %v4448_v49  ;;  %1549 = vmatpush.msrb.mxu3 %v4449_v50 }
 0x33f   :  { %1490 = vmatpush.msrb.mxu0 %v4450_v54  ;;  %1510 = vmatpush.msrb.mxu1 %v4451_v56 }
 0x340   :  { %1530 = vmatpush.msrb.mxu2 %v4452_v1  ;;  %1550 = vmatpush.msrb.mxu3 %v4453_v39 }
 0x341   :  { %1491 = vmatpush.msrb.mxu0 %v4454_v24  ;;  %1511 = vmatpush.msrb.mxu1 %v4455_v61 }
 0x342   :  { %1531 = vmatpush.msrb.mxu2 %v4456_v14  ;;  %1551 = vmatpush.msrb.mxu3 %v4457_v42 }
 0x343   :  { %1492 = vmatpush.msrb.mxu0 %v4458_v43  ;;  %1512 = vmatpush.msrb.mxu1 %v4459_v18 }
 0x344   :  { %1532 = vmatpush.msrb.mxu2 %v4460_v20  ;;  %1552 = vmatpush.msrb.mxu3 %v4461_v31 }
 0x345   :  { %1493 = vmatpush.msrb.mxu0 %v4462_v23  ;;  %1513 = vmatpush.msrb.mxu1 %v4463_v7 }
 0x346   :  { %1533 = vmatpush.msrb.mxu2 %v4464_v13  ;;  %1553 = vmatpush.msrb.mxu3 %v4465_v32 }
 0x347   :  { %1494 = vmatpush.msrb.mxu0 %v4466_v47  ;;  %1514 = vmatpush.msrb.mxu1 %v4467_v62 }
 0x348   :  { %1534 = vmatpush.msrb.mxu2 %v4468_v60  ;;  %1554 = vmatpush.msrb.mxu3 %v4469_v35 }
 0x349   :  { %1495 = vmatpush.msrb.mxu0 %v4470_v53  ;;  %1515 = vmatpush.msrb.mxu1 %v4471_v2 }
 0x34a   :  { %1535 = vmatpush.msrb.mxu2 %v4472_v40  ;;  %1555 = vmatpush.msrb.mxu3 %v4473_v36 }
 0x3a6   :  { %v1203_v52 = vpop.f32.mrf.mxu0  ;;  %v1223_v22 = vpop.f32.mrf.mxu1 }
 0x3a7   :  { %v1266_v11 = vadd.f32 %v1203_v52, %v4474_v10  ;;  %v1267_v33 = vadd.f32 %v1223_v22, %v4475_v8 }
 0x3a9   :  { %v1980_v17 = vmul.f32 -1.442695, %v1266_v11  ;;  %v1981_v27 = vmul.f32 -1.442695, %v1267_v33 }
 0x3ab   :  { %2059 = vpow2.f32 %v1980_v17 }
 0x3ac   :  { %2061 = vpow2.f32 %v1981_v27 }
 0x3ad   :  { %v1263_v34 = vpop.f32.mrf.mxu3  ;;  %v1243_v12 = vpop.f32.mrf.mxu2 }
 0x3ae   :  { %v1269_v9 = vadd.f32 %v1263_v34, %v4476_v16  ;;  %v1268_v28 = vadd.f32 %v1243_v12, %v4477_v5 }
 0x3b0   :  { %v1982_v37 = vmul.f32 -1.442695, %v1269_v9 }
 0x3b1   :  { %v2060_v46 = vpop.eup %2059 }
 0x3b2   :  { %v2062_v55 = vpop.eup %2061  ;;  %v1273_v63 = vadd.f32 1.0, %v2060_v46  ;;  %2063 = vpow2.f32 %v1982_v37 }
 0x3b3   :  { %v1292_v41 = vadd.f32 1.0, %v2062_v55 }
 0x3b4   :  { %2065 = vrcp.f32 %v1273_v63  ;;  %v1285_v44 = vand.u32 2147483648, %v1273_v63  ;;  %v1283_v29 = vand.u32 2147483647, %v1273_v63  ;;  %vm1279_vm2 = vweird.f32 %v1273_v63 }
 0x3b5   :  { %2067 = vrcp.f32 %v1292_v41  ;;  %v1304_v3 = vand.u32 2147483648, %v1292_v41  ;;  %v1302_v57 = vand.u32 2147483647, %v1292_v41  ;;  %vm1298_vm3 = vweird.f32 %v1292_v41 }
 0x3b6   :  { %v1286_v22 = vor.u32 1.1754944e-38, %v1285_v44  ;;  %vm1284_vm6 = vcmp.eq.f32.partialorder %v1283_v29, 8.507059e+37  ;;  %v2196_v44 = vld [vmem:[%s4276_s3 + $0x1c8] sm:$0xff]  ;;  %v2199_v29 = vld [vmem:[%s4276_s3 + $0x1a0] sm:$0xff] }
 0x3b7   :  { %v1305_v8 = vor.u32 1.1754944e-38, %v1304_v3  ;;  %vm1303_vm7 = vcmp.eq.f32.partialorder %v1302_v57, 8.507059e+37  ;;  %v2197_v3 = vld [vmem:[%s4276_s3 + $0x1d0] sm:$0xff] }
 0x3b8   :  { %v2064_v58 = vpop.eup %2063  ;;  %v2201_v57 = vld [vmem:[%s4276_s3 + $0x1b0] sm:$0xff] }
 0x3b9   :  { %v1312_v25 = vadd.f32 1.0, %v2064_v58 }
 0x3ba   :  { %v2066_v51 = vpop.eup %2065 }
 0x3bb   :  { %v2068_v0 = vpop.eup %2067  ;;  %v1275_v59 = vmul.f32 %v2066_v51, %v1273_v63  ;;  %2069 = vrcp.f32 %v1312_v25  ;;  %vm1280_vm0 = vweird.f32 %v2066_v51  ;;  %v1324_v12 = vand.u32 2147483648, %v1312_v25 }
 0x3bc   :  { %v1294_v30 = vmul.f32 %v2068_v0, %v1292_v41  ;;  %2071 = vtanh.f32 %v1268_v28  ;;  %vm1299_vm1 = vweird.f32 %v2068_v0  ;;  %vm1281_vm4 = vmor %vm1279_vm2, %vm1280_vm0  ;;  %vm1318_vm9 = vweird.f32 %v1312_v25 }
 0x3bd   :  { %v1276_v6 = vsub.f32 1.0, %v1275_v59  ;;  %vm1300_vm5 = vmor %vm1298_vm3, %vm1299_vm1  ;;  %v1322_v58 = vand.u32 2147483647, %v1312_v25  ;;  %v1325_v5 = vor.u32 1.1754944e-38, %v1324_v12  ;;  %v2218_v12 = vld [vmem:[%s4276_s3 + $0x100] sm:$0xff] }
 0x3be   :  { %v1295_v15 = vsub.f32 1.0, %v1294_v30  ;;  %v2193_v30 = vld [vmem:[%s4276_s3 + $0x1f0] sm:$0xff] }
 0x3bf   :  { %v1277_v21 = vmul.f32 %v2066_v51, %v1276_v6  ;;  %vm1323_vm11 = vcmp.eq.f32.partialorder %v1322_v58, 8.507059e+37  ;;  %v2194_v6 = vld [vmem:[%s4276_s3 + $0x1f8] sm:$0xff]  ;;  %v2219_v58 = vld [vmem:[%s4276_s3 + $0x108] sm:$0xff] }
 0x3c0   :  { %v1296_v38 = vmul.f32 %v2068_v0, %v1295_v15  ;;  %v2195_v15 = vld [vmem:[%s4276_s3 + $0x1c0] sm:$0xff] }
 0x3c1   :  { %v2070_v4 = vpop.eup %2069  ;;  %v1278_v52 = vadd.f32 %v2066_v51, %v1277_v21  ;;  %v2198_v21 = vld [vmem:[%s4276_s3 + $0x1d8] sm:$0xff] }
 0x3c2   :  { %v1297_v10 = vadd.f32 %v2068_v0, %v1296_v38  ;;  %v1314_v11 = vmul.f32 %v2070_v4, %v1312_v25  ;;  %v2072_v17 = vpop.eup %2071  ;;  %vm1319_vm8 = vweird.f32 %v2070_v4  ;;  %v2192_v25 = vld [vmem:[%s4276_s3 + $0x1e8] sm:$0xff] }
 0x3c3   :  { %v1282_v33 = vsel %vm1281_vm4, %v2066_v51, %v1278_v52  ;;  %vm1320_vm10 = vmor %vm1318_vm9, %vm1319_vm8  ;;  %v2200_v38 = vld [vmem:[%s4276_s3 + $0x1a8] sm:$0xff]  ;;  %v2203_v52 = vld [vmem:[%s4276_s3 + $0x180] sm:$0xff] }
 0x3c4   :  { %v1287_v27 = vsel %vm1284_vm6, %v1286_v22, %v1282_v33  ;;  %v1301_v34 = vsel %vm1300_vm5, %v2068_v0, %v1297_v10  ;;  %v1315_v16 = vsub.f32 1.0, %v1314_v11  ;;  %v2204_v22 = vld [vmem:[%s4276_s3 + $0x188] sm:$0xff]  ;;  %v2205_v10 = vld [vmem:[%s4276_s3 + $0x190] sm:$0xff]  ;;  %v2206_v11 = vld [vmem:[%s4276_s3 + $0x198] sm:$0xff] }
 0x3c5   :  { %v1306_v9 = vsel %vm1303_vm7, %v1305_v8, %v1301_v34  ;;  %v1329_v37 = vmul.f32 %v2072_v17, %v1287_v27  ;;  %v2207_v8 = vld [vmem:[%s4276_s3 + $0x160] sm:$0xff]  ;;  %v2208_v33 = vld [vmem:[%s4276_s3 + $0x168] sm:$0xff]  ;;  %v2209_v17 = vld [vmem:[%s4276_s3 + $0x170] sm:$0xff] }
 0x3c6   :  { %v1328_v46 = vmul.f32 %v1306_v9, %v3989_v19  ;;  %v1316_v55 = vmul.f32 %v2070_v4, %v1315_v16  ;;  %v2191_v19 = vld [vmem:[%s4276_s3 + $0x1e0] sm:$0xff]  ;;  %v2210_v27 = vld [vmem:[%s4276_s3 + $0x178] sm:$0xff]  ;;  %v2212_v16 = vld [vmem:[%s4276_s3 + $0x148] sm:$0xff] }
 0x3c7   :  { %v2211_v34 = vld [vmem:[%s4276_s3 + $0x140] sm:$0xff]  ;;  %v2213_v9 = vld [vmem:[%s4276_s3 + $0x150] sm:$0xff] }
 0x3c8   :  { %v4061_v63 = vadd.f32 %v1329_v37, %v1328_v46  ;;  %v1317_v41 = vadd.f32 %v2070_v4, %v1316_v55  ;;  %v2214_v37 = vld [vmem:[%s4276_s3 + $0x158] sm:$0xff]  ;;  %v2215_v46 = vld [vmem:[%s4276_s3 + $0x120] sm:$0xff]  ;;  %v2216_v55 = vld [vmem:[%s4276_s3 + $0x128] sm:$0xff] }
 0x3ca   :  { %2073 = vtanh.f32 %v4061_v63  ;;  %v1321_v51 = vsel %vm1320_vm10, %v2070_v4, %v1317_v41  ;;  %v2202_v4 = vld [vmem:[%s4276_s3 + $0x1b8] sm:$0xff] }
 0x3cb   :  { %v1326_v0 = vsel %vm1323_vm11, %v1325_v5, %v1321_v51  ;;  %v2217_v41 = vld [vmem:[%s4276_s3 + $0x138] sm:$0xff]  ;;  %v2221_v51 = vld [vmem:[%s4276_s3 + $0xe0] sm:$0xff]  ;;  %v2222_v5 = vld [vmem:[%s4276_s3 + $0xe8] sm:$0xff] }
 0x3d0   :  { %v2074_v28 = vpop.eup %2073 }
 0x3d1   :  { %v1332_v59 = vmul.f32 %v2074_v28, %v1326_v0  ;;  %v2224_v28 = vld [vmem:[%s4276_s3 + $0xc0] sm:$0xff]  ;;  %v2225_v0 = vld [vmem:[%s4276_s3 + $0xc8] sm:$0xff] }
 0x3d3   :  { %1349 = vmatmul.f32.vlgmr.msra.gmra.mxu0 %v1332_v59  ;;  %1369 = vmatmul.f32.vlgmr.msra.gmra.mxu1 %v1332_v59 }
 0x3d4   :  { %1389 = vmatmul.f32.vlgmr.msra.gmra.mxu2 %v1332_v59  ;;  %1409 = vmatmul.f32.vlgmr.msra.gmra.mxu3 %v1332_v59 }
 0x3d5   :  { %1627 = vmatpush.msra.mxu0 %v2191_v19  ;;  %1647 = vmatpush.msra.mxu1 %v2192_v25 }
 0x3d6   :  { %1667 = vmatpush.msra.mxu2 %v2193_v30  ;;  %1687 = vmatpush.msra.mxu3 %v2194_v6 }
 0x3d7   :  { %1628 = vmatpush.msra.mxu0 %v2195_v15  ;;  %1648 = vmatpush.msra.mxu1 %v2196_v44 }
 0x3d8   :  { %1668 = vmatpush.msra.mxu2 %v2197_v3  ;;  %1688 = vmatpush.msra.mxu3 %v2198_v21 }
 0x3d9   :  { %1629 = vmatpush.msra.mxu0 %v2199_v29  ;;  %1649 = vmatpush.msra.mxu1 %v2200_v38 }
 0x3da   :  { %1669 = vmatpush.msra.mxu2 %v2201_v57  ;;  %1689 = vmatpush.msra.mxu3 %v2202_v4 }
 0x3db   :  { %1630 = vmatpush.msra.mxu0 %v2203_v52  ;;  %1650 = vmatpush.msra.mxu1 %v2204_v22 }
 0x3dc   :  { %1670 = vmatpush.msra.mxu2 %v2205_v10  ;;  %1690 = vmatpush.msra.mxu3 %v2206_v11 }
 0x3dd   :  { %1631 = vmatpush.msra.mxu0 %v2207_v8  ;;  %1651 = vmatpush.msra.mxu1 %v2208_v33 }
 0x3de   :  { %1671 = vmatpush.msra.mxu2 %v2209_v17  ;;  %1691 = vmatpush.msra.mxu3 %v2210_v27 }
 0x3df   :  { %1632 = vmatpush.msra.mxu0 %v2211_v34  ;;  %1652 = vmatpush.msra.mxu1 %v2212_v16 }
 0x3e0   :  { %1672 = vmatpush.msra.mxu2 %v2213_v9  ;;  %1692 = vmatpush.msra.mxu3 %v2214_v37 }
 0x3e1   :  { %1633 = vmatpush.msra.mxu0 %v2215_v46  ;;  %1653 = vmatpush.msra.mxu1 %v2216_v55 }
 0x3e2   :  { %1673 = vmatpush.msra.mxu2 %v3732_v48  ;;  %1693 = vmatpush.msra.mxu3 %v2217_v41  ;;  %v2220_v48 = vld [vmem:[%s4276_s3 + $0x118] sm:$0xff] }
 0x3e3   :  { %1634 = vmatpush.msra.mxu0 %v2218_v12  ;;  %1654 = vmatpush.msra.mxu1 %v2219_v58 }
 0x3e4   :  { %1674 = vmatpush.msra.mxu2 %v3741_v26  ;;  %1694 = vmatpush.msra.mxu3 %v2220_v48  ;;  %v2223_v26 = vld [vmem:[%s4276_s3 + $0xf8] sm:$0xff] }
 0x3e5   :  { %1635 = vmatpush.msra.mxu0 %v2221_v51  ;;  %1655 = vmatpush.msra.mxu1 %v2222_v5  ;;  %v4482_v51 = vld [vmem:[#allocation22_spill] sm:$0xff] }
 0x3e6   :  { %1675 = vmatpush.msra.mxu2 %v3750_v45  ;;  %1695 = vmatpush.msra.mxu3 %v2223_v26  ;;  %v4483_v26 = vld [vmem:[#allocation23_spill] sm:$0xff] }
 0x3e7   :  { %1636 = vmatpush.msra.mxu0 %v2224_v28  ;;  %1656 = vmatpush.msra.mxu1 %v2225_v0 }
 0x3e8   :  { %1676 = vmatpush.msra.mxu2 %v4448_v49  ;;  %1696 = vmatpush.msra.mxu3 %v4449_v50  ;;  %v4478_v50 = vld [vmem:[#allocation18_spill] sm:$0xff] }
 0x3e9   :  { %1637 = vmatpush.msra.mxu0 %v4450_v54  ;;  %1657 = vmatpush.msra.mxu1 %v4451_v56  ;;  %v4479_v56 = vld [vmem:[#allocation19_spill] sm:$0xff] }
 0x3ea   :  { %1677 = vmatpush.msra.mxu2 %v4452_v1  ;;  %1697 = vmatpush.msra.mxu3 %v4453_v39 }
 0x3eb   :  { %1638 = vmatpush.msra.mxu0 %v4454_v24  ;;  %1658 = vmatpush.msra.mxu1 %v4455_v61 }
 0x3ec   :  { %1678 = vmatpush.msra.mxu2 %v4456_v14  ;;  %1698 = vmatpush.msra.mxu3 %v4457_v42  ;;  %v4480_v14 = vld [vmem:[#allocation21_spill] sm:$0xff] }
 0x3ed   :  { %1639 = vmatpush.msra.mxu0 %v4458_v43  ;;  %1659 = vmatpush.msra.mxu1 %v4459_v18 }
 0x3ee   :  { %1679 = vmatpush.msra.mxu2 %v4460_v20  ;;  %1699 = vmatpush.msra.mxu3 %v4461_v31 }
 0x3ef   :  { %1640 = vmatpush.msra.mxu0 %v4462_v23  ;;  %1660 = vmatpush.msra.mxu1 %v4463_v7 }
 0x3f0   :  { %1680 = vmatpush.msra.mxu2 %v4464_v13  ;;  %1700 = vmatpush.msra.mxu3 %v4465_v32 }
 0x3f1   :  { %1641 = vmatpush.msra.mxu0 %v4466_v47  ;;  %1661 = vmatpush.msra.mxu1 %v4467_v62  ;;  %v4481_v62 = vld [vmem:[#allocation20_spill] sm:$0xff] }
 0x3f2   :  { %1681 = vmatpush.msra.mxu2 %v4468_v60  ;;  %1701 = vmatpush.msra.mxu3 %v4469_v35 }
 0x3f3   :  { %1642 = vmatpush.msra.mxu0 %v4470_v53  ;;  %1662 = vmatpush.msra.mxu1 %v4471_v2 }
 0x3f4   :  { %1682 = vmatpush.msra.mxu2 %v4472_v40  ;;  %1702 = vmatpush.msra.mxu3 %v4473_v36 }
 0x450   :  { %v1350_v45 = vpop.f32.mrf.mxu0  ;;  %v1370_v49 = vpop.f32.mrf.mxu1 }
 0x451   :  { %v1413_v54 = vadd.f32 %v1350_v45, %v4478_v50  ;;  %v1414_v1 = vadd.f32 %v1370_v49, %v4479_v56  ;;  %v4484_v50 = vld [vmem:[#allocation25_spill] sm:$0xff] }
 0x453   :  { %v1983_v39 = vmul.f32 -1.442695, %v1413_v54  ;;  %v1984_v24 = vmul.f32 -1.442695, %v1414_v1 }
 0x455   :  { %2075 = vpow2.f32 %v1983_v39 }
 0x456   :  { %2077 = vpow2.f32 %v1984_v24 }
 0x457   :  { %v1410_v61 = vpop.f32.mrf.mxu3  ;;  %v1390_v7 = vpop.f32.mrf.mxu2 }
 0x458   :  { %v1416_v42 = vadd.f32 %v1410_v61, %v4480_v14  ;;  %v1415_v60 = vadd.f32 %v1390_v7, %v4481_v62 }
 0x45a   :  { %v1985_v43 = vmul.f32 -1.442695, %v1416_v42 }
 0x45b   :  { %v2076_v18 = vpop.eup %2075 }
 0x45c   :  { %v2078_v20 = vpop.eup %2077  ;;  %v1420_v31 = vadd.f32 1.0, %v2076_v18  ;;  %2079 = vpow2.f32 %v1985_v43 }
 0x45d   :  { %v1439_v23 = vadd.f32 1.0, %v2078_v20  ;;  %v4485_v20 = vld [vmem:[#allocation24_spill] sm:$0xff] }
 0x45e   :  { %2081 = vrcp.f32 %v1420_v31  ;;  %v1432_v59 = vand.u32 2147483648, %v1420_v31  ;;  %v1430_v30 = vand.u32 2147483647, %v1420_v31  ;;  %vm1426_vm14 = vweird.f32 %v1420_v31 }
 0x45f   :  { %2083 = vrcp.f32 %v1439_v23  ;;  %v1451_v19 = vand.u32 2147483648, %v1439_v23  ;;  %v1449_v15 = vand.u32 2147483647, %v1439_v23  ;;  %vm1445_vm15 = vweird.f32 %v1439_v23 }
 0x460   :  { %v1433_v21 = vor.u32 1.1754944e-38, %v1432_v59  ;;  %vm1431_vm2 = vcmp.eq.f32.partialorder %v1430_v30, 8.507059e+37 }
 0x461   :  { %v1452_v57 = vor.u32 1.1754944e-38, %v1451_v19  ;;  %vm1450_vm3 = vcmp.eq.f32.partialorder %v1449_v15, 8.507059e+37 }
 0x462   :  { %v2080_v13 = vpop.eup %2079 }
 0x463   :  { %v1459_v32 = vadd.f32 1.0, %v2080_v13 }
 0x464   :  { %v2082_v47 = vpop.eup %2081 }
 0x465   :  { %v2084_v35 = vpop.eup %2083  ;;  %v1422_v53 = vmul.f32 %v2082_v47, %v1420_v31  ;;  %2085 = vrcp.f32 %v1459_v32  ;;  %vm1427_vm12 = vweird.f32 %v2082_v47  ;;  %v1471_v9 = vand.u32 2147483648, %v1459_v32 }
 0x466   :  { %v1441_v2 = vmul.f32 %v2084_v35, %v1439_v23  ;;  %2087 = vtanh.f32 %v1415_v60  ;;  %vm1446_vm13 = vweird.f32 %v2084_v35  ;;  %vm1428_vm0 = vmor %vm1426_vm14, %vm1427_vm12  ;;  %vm1465_vm5 = vweird.f32 %v1459_v32 }
 0x467   :  { %v1423_v40 = vsub.f32 1.0, %v1422_v53  ;;  %vm1447_vm1 = vmor %vm1445_vm15, %vm1446_vm13  ;;  %v1469_v37 = vand.u32 2147483647, %v1459_v32  ;;  %v1472_v55 = vor.u32 1.1754944e-38, %v1471_v9 }
 0x468   :  { %v1442_v36 = vsub.f32 1.0, %v1441_v2 }
 0x469   :  { %v1424_v25 = vmul.f32 %v2082_v47, %v1423_v40  ;;  %vm1470_vm7 = vcmp.eq.f32.partialorder %v1469_v37, 8.507059e+37  ;;  %v1788_v37 = vld [vmem:[%s4486_s8 + $0x70] sm:$0xff] }
 0x46a   :  { %v1443_v6 = vmul.f32 %v2084_v35, %v1442_v36 }
 0x46b   :  { %v2086_v44 = vpop.eup %2085  ;;  %v1425_v3 = vadd.f32 %v2082_v47, %v1424_v25 }
 0x46c   :  { %v1444_v29 = vadd.f32 %v2084_v35, %v1443_v6  ;;  %v1461_v38 = vmul.f32 %v2086_v44, %v1459_v32  ;;  %v2088_v52 = vpop.eup %2087  ;;  %vm1466_vm4 = vweird.f32 %v2086_v44 }
 0x46d   :  { %v1429_v4 = vsel %vm1428_vm0, %v2082_v47, %v1425_v3  ;;  %vm1467_vm6 = vmor %vm1465_vm5, %vm1466_vm4 }
 0x46e   :  { %v1434_v22 = vsel %vm1431_vm2, %v1433_v21, %v1429_v4  ;;  %v1448_v10 = vsel %vm1447_vm1, %v2084_v35, %v1444_v29  ;;  %v1462_v11 = vsub.f32 1.0, %v1461_v38 }
 0x46f   :  { %v1453_v8 = vsel %vm1450_vm3, %v1452_v57, %v1448_v10  ;;  %v1476_v33 = vmul.f32 %v2088_v52, %v1434_v22 }
 0x470   :  { %v1475_v17 = vmul.f32 %v1453_v8, %v4061_v63  ;;  %v1463_v27 = vmul.f32 %v2086_v44, %v1462_v11 }
 0x472   :  { %v4203_v34 = vadd.f32 %v1476_v33, %v1475_v17  ;;  %v1464_v16 = vadd.f32 %v2086_v44, %v1463_v27 }
 0x474   :  { %2089 = vtanh.f32 %v4203_v34  ;;  %v1468_v46 = vsel %vm1467_vm6, %v2086_v44, %v1464_v16 }
 0x475   :  { %v1473_v12 = vsel %vm1470_vm7, %v1472_v55, %v1468_v46  ;;  %v1787_v46 = vld [vmem:[%s4486_s8 + $0x68] sm:$0xff]  ;;  %v1786_v55 = vld [vmem:[%s4486_s8 + $0x60] sm:$0xff] }
 0x47a   :  { %v2090_v41 = vpop.eup %2089 }
 0x47b   :  { %v1479_v58 = vmul.f32 %v2090_v41, %v1473_v12  ;;  %v1785_v41 = vld [vmem:[%s4486_s8 + $0x58] sm:$0xff]  ;;  %v1784_v12 = vld [vmem:[%s4486_s8 + $0x50] sm:$0xff] }
 0x47d   :  { %1496 = vmatmul.f32.vlgmr.msrb.gmra.mxu0 %v1479_v58  ;;  %1516 = vmatmul.f32.vlgmr.msrb.gmra.mxu1 %v1479_v58 }
 0x47e   :  { %1536 = vmatmul.f32.vlgmr.msrb.gmra.mxu2 %v1479_v58  ;;  %1556 = vmatmul.f32.vlgmr.msrb.gmra.mxu3 %v1479_v58  ;;  %v1783_v58 = vld [vmem:[%s4486_s8 + $0x48] sm:$0xff] }
 0x4fa   :  { %v1497_v63 = vpop.f32.mrf.mxu0  ;;  %v1517_v48 = vpop.f32.mrf.mxu1 }
 0x4fb   :  { %v1560_v5 = vadd.f32 %v1497_v63, %v4482_v51  ;;  %v1561_v28 = vadd.f32 %v1517_v48, %v4483_v26  ;;  %v1782_v63 = vld [vmem:[%s4486_s8 + $0x40] sm:$0xff]  ;;  %v1781_v48 = vld [vmem:[%s4486_s8 + $0x38] sm:$0xff]  ;;  %v1780_v51 = vld [vmem:[%s4486_s8 + $0x30] sm:$0xff] }
 0x4fd   :  { %v1986_v0 = vmul.f32 -1.442695, %v1560_v5  ;;  %v1987_v45 = vmul.f32 -1.442695, %v1561_v28  ;;  %v4487_v28 = vld [vmem:[#allocation26_spill] sm:$0xff] }
 0x4ff   :  { %2091 = vpow2.f32 %v1986_v0 }
 0x500   :  { %2093 = vpow2.f32 %v1987_v45  ;;  %v4488_v45 = vld [vmem:[#allocation27_spill] sm:$0xff] }
 0x501   :  { %v1557_v49 = vpop.f32.mrf.mxu3  ;;  %v1537_v14 = vpop.f32.mrf.mxu2 }
 0x502   :  { %v1563_v54 = vadd.f32 %v1557_v49, %v4484_v50  ;;  %v1562_v31 = vadd.f32 %v1537_v14, %v4485_v20  ;;  %v1779_v50 = vld [vmem:[%s4486_s8 + $0x28] sm:$0xff] }
 0x503   :  { %v1775_v14 = vld [vmem:[%s4486_s8 + $0x8] sm:$0xff] }
 0x504   :  { %v1988_v56 = vmul.f32 -1.442695, %v1563_v54 }
 0x505   :  { %v2092_v1 = vpop.eup %2091 }
 0x506   :  { %v2094_v39 = vpop.eup %2093  ;;  %v1567_v24 = vadd.f32 1.0, %v2092_v1  ;;  %2095 = vpow2.f32 %v1988_v56  ;;  %v1778_v1 = vld [vmem:[%s4486_s8 + $0x20] sm:$0xff] }
 0x507   :  { %v1586_v61 = vadd.f32 1.0, %v2094_v39  ;;  %v1777_v39 = vld [vmem:[%s4486_s8 + $0x18] sm:$0xff] }
 0x508   :  { %2097 = vrcp.f32 %v1567_v24  ;;  %v1579_v62 = vand.u32 2147483648, %v1567_v24  ;;  %v1577_v53 = vand.u32 2147483647, %v1567_v24  ;;  %vm1573_vm10 = vweird.f32 %v1567_v24 }
 0x509   :  { %2099 = vrcp.f32 %v1586_v61  ;;  %v1598_v60 = vand.u32 2147483648, %v1586_v61  ;;  %v1596_v40 = vand.u32 2147483647, %v1586_v61  ;;  %vm1592_vm11 = vweird.f32 %v1586_v61 }
 0x50a   :  { %v1580_v19 = vor.u32 1.1754944e-38, %v1579_v62  ;;  %vm1578_vm14 = vcmp.eq.f32.partialorder %v1577_v53, 8.507059e+37 }
 0x50b   :  { %v1599_v6 = vor.u32 1.1754944e-38, %v1598_v60  ;;  %vm1597_vm15 = vcmp.eq.f32.partialorder %v1596_v40, 8.507059e+37 }
 0x50c   :  { %v2096_v42 = vpop.eup %2095 }
 0x50d   :  { %v1606_v43 = vadd.f32 1.0, %v2096_v42  ;;  %v4489_v42 = vld [vmem:[#allocation29_spill] sm:$0xff] }
 0x50e   :  { %v2098_v18 = vpop.eup %2097 }
 0x50f   :  { %v2100_v23 = vpop.eup %2099  ;;  %v1569_v7 = vmul.f32 %v2098_v18, %v1567_v24  ;;  %2101 = vrcp.f32 %v1606_v43  ;;  %vm1574_vm8 = vweird.f32 %v2098_v18  ;;  %v1618_v11 = vand.u32 2147483648, %v1606_v43  ;;  %v1776_v24 = vld [vmem:[%s4486_s8 + $0x10] sm:$0xff] }
 0x510   :  { %v1588_v13 = vmul.f32 %v2100_v23, %v1586_v61  ;;  %2103 = vtanh.f32 %v1562_v31  ;;  %vm1593_vm9 = vweird.f32 %v2100_v23  ;;  %vm1575_vm12 = vmor %vm1573_vm10, %vm1574_vm8  ;;  %vm1612_vm1 = vweird.f32 %v1606_v43 }
 0x511   :  { %v1570_v32 = vsub.f32 1.0, %v1569_v7  ;;  %vm1594_vm13 = vmor %vm1592_vm11, %vm1593_vm9  ;;  %v1616_v8 = vand.u32 2147483647, %v1606_v43  ;;  %v1619_v17 = vor.u32 1.1754944e-38, %v1618_v11 }
 0x512   :  { %v1589_v47 = vsub.f32 1.0, %v1588_v13 }
 0x513   :  { %v1571_v35 = vmul.f32 %v2098_v18, %v1570_v32  ;;  %vm1617_vm3 = vcmp.eq.f32.partialorder %v1616_v8, 8.507059e+37 }
 0x514   :  { %v1590_v2 = vmul.f32 %v2100_v23, %v1589_v47 }
 0x515   :  { %v2102_v36 = vpop.eup %2101  ;;  %v1572_v59 = vadd.f32 %v2098_v18, %v1571_v35  ;;  %v4490_v35 = vld [vmem:[#allocation28_spill] sm:$0xff] }
 0x516   :  { %v1591_v25 = vadd.f32 %v2100_v23, %v1590_v2  ;;  %v1608_v30 = vmul.f32 %v2102_v36, %v1606_v43  ;;  %v2104_v44 = vpop.eup %2103  ;;  %vm1613_vm0 = vweird.f32 %v2102_v36 }
 0x517   :  { %v1576_v15 = vsel %vm1575_vm12, %v2098_v18, %v1572_v59  ;;  %vm1614_vm2 = vmor %vm1612_vm1, %vm1613_vm0  ;;  %v1774_v18 = vld [vmem:[%s4486_s8] sm:$0xff] }
 0x518   :  { %v1581_v3 = vsel %vm1578_vm14, %v1580_v19, %v1576_v15  ;;  %v1595_v21 = vsel %vm1594_vm13, %v2100_v23, %v1591_v25  ;;  %v1609_v29 = vsub.f32 1.0, %v1608_v30 }
 0x519   :  { %v1600_v38 = vsel %vm1597_vm15, %v1599_v6, %v1595_v21  ;;  %v1623_v57 = vmul.f32 %v2104_v44, %v1581_v3 }
 0x51a   :  { %v1622_v4 = vmul.f32 %v1600_v38, %v4203_v34  ;;  %v1610_v52 = vmul.f32 %v2102_v36, %v1609_v29  ;;  %v1789_v34 = vld [vmem:[%s4486_s8 + $0x78] sm:$0xff] }
 0x51b   :  { %1794 = vmatpush.msrb.mxu0 %v1789_v34 }
 0x51c   :  { %v4211_v22 = vadd.f32 %v1623_v57, %v1622_v4  ;;  %v1611_v10 = vadd.f32 %v2102_v36, %v1610_v52 }
 0x51d   :  { %1795 = vmatpush.msrb.mxu0 %v1788_v37 }
 0x51e   :  { %2105 = vtanh.f32 %v4211_v22  ;;  %v1615_v33 = vsel %vm1614_vm2, %v2102_v36, %v1611_v10 }
 0x51f   :  { %v1620_v16 = vsel %vm1617_vm3, %v1619_v17, %v1615_v33  ;;  %1796 = vmatpush.msrb.mxu0 %v1787_v46 }
 0x521   :  { %1797 = vmatpush.msrb.mxu0 %v1786_v55 }
 0x523   :  { %1798 = vmatpush.msrb.mxu0 %v1785_v41 }
 0x524   :  { %v2106_v27 = vpop.eup %2105 }
 0x525   :  { %v1626_v9 = vmul.f32 %v2106_v27, %v1620_v16  ;;  %1799 = vmatpush.msrb.mxu0 %v1784_v12 }
 0x527   :  { %1643 = vmatmul.f32.vlgmr.msra.gmra.mxu0 %v1626_v9  ;;  %1663 = vmatmul.f32.vlgmr.msra.gmra.mxu1 %v1626_v9 }
 0x528   :  { %1683 = vmatmul.f32.vlgmr.msra.gmra.mxu2 %v1626_v9  ;;  %1703 = vmatmul.f32.vlgmr.msra.gmra.mxu3 %v1626_v9 }
 0x529   :  { %1800 = vmatpush.msrb.mxu0 %v1783_v58 }
 0x52b   :  { %1801 = vmatpush.msrb.mxu0 %v1782_v63 }
 0x52d   :  { %1802 = vmatpush.msrb.mxu0 %v1781_v48 }
 0x52f   :  { %1803 = vmatpush.msrb.mxu0 %v1780_v51 }
 0x531   :  { %1804 = vmatpush.msrb.mxu0 %v1779_v50 }
 0x533   :  { %1805 = vmatpush.msrb.mxu0 %v1778_v1 }
 0x535   :  { %1806 = vmatpush.msrb.mxu0 %v1777_v39 }
 0x537   :  { %1807 = vmatpush.msrb.mxu0 %v1776_v24 }
 0x539   :  { %1808 = vmatpush.msrb.mxu0 %v1775_v14 }
 0x53b   :  { %1809 = vmatpush.msrb.mxu0 %v1774_v18 }
 0x5a4   :  { %v1644_v5 = vpop.f32.mrf.mxu0  ;;  %v1664_v26 = vpop.f32.mrf.mxu1 }
 0x5a5   :  { %v1707_v0 = vadd.f32 %v1644_v5, %v4487_v28  ;;  %v1708_v49 = vadd.f32 %v1664_v26, %v4488_v45 }
 0x5a7   :  { %v1989_v54 = vmul.f32 -1.442695, %v1707_v0  ;;  %v1990_v56 = vmul.f32 -1.442695, %v1708_v49 }
 0x5a9   :  { %2107 = vpow2.f32 %v1989_v54 }
 0x5aa   :  { %2109 = vpow2.f32 %v1990_v56 }
 0x5ab   :  { %v1704_v61 = vpop.f32.mrf.mxu3  ;;  %v1684_v32 = vpop.f32.mrf.mxu2 }
 0x5ac   :  { %v1710_v43 = vadd.f32 %v1704_v61, %v4489_v42  ;;  %v1709_v53 = vadd.f32 %v1684_v32, %v4490_v35 }
 0x5ae   :  { %v1991_v20 = vmul.f32 -1.442695, %v1710_v43 }
 0x5af   :  { %v2108_v31 = vpop.eup %2107 }
 0x5b0   :  { %v2110_v23 = vpop.eup %2109  ;;  %v1714_v7 = vadd.f32 1.0, %v2108_v31  ;;  %2111 = vpow2.f32 %v1991_v20 }
 0x5b1   :  { %v1733_v13 = vadd.f32 1.0, %v2110_v23 }
 0x5b2   :  { %2113 = vrcp.f32 %v1714_v7  ;;  %v1726_v25 = vand.u32 2147483648, %v1714_v7  ;;  %v1724_v15 = vand.u32 2147483647, %v1714_v7  ;;  %vm1720_vm6 = vweird.f32 %v1714_v7 }
 0x5b3   :  { %2115 = vrcp.f32 %v1733_v13  ;;  %v1745_v30 = vand.u32 2147483648, %v1733_v13  ;;  %v1743_v3 = vand.u32 2147483647, %v1733_v13  ;;  %vm1739_vm7 = vweird.f32 %v1733_v13 }
 0x5b4   :  { %v1727_v38 = vor.u32 1.1754944e-38, %v1726_v25  ;;  %vm1725_vm10 = vcmp.eq.f32.partialorder %v1724_v15, 8.507059e+37 }
 0x5b5   :  { %v1746_v52 = vor.u32 1.1754944e-38, %v1745_v30  ;;  %vm1744_vm11 = vcmp.eq.f32.partialorder %v1743_v3, 8.507059e+37 }
 0x5b6   :  { %v2112_v47 = vpop.eup %2111 }
 0x5b7   :  { %v1753_v62 = vadd.f32 1.0, %v2112_v47 }
 0x5b8   :  { %v2114_v60 = vpop.eup %2113 }
 0x5b9   :  { %v2116_v2 = vpop.eup %2115  ;;  %v1716_v40 = vmul.f32 %v2114_v60, %v1714_v7  ;;  %2117 = vrcp.f32 %v1753_v62  ;;  %vm1721_vm4 = vweird.f32 %v2114_v60  ;;  %v1765_v55 = vand.u32 2147483648, %v1753_v62 }
 0x5ba   :  { %v1735_v36 = vmul.f32 %v2116_v2, %v1733_v13  ;;  %2119 = vtanh.f32 %v1709_v53  ;;  %vm1740_vm5 = vweird.f32 %v2116_v2  ;;  %vm1722_vm8 = vmor %vm1720_vm6, %vm1721_vm4  ;;  %vm1759_vm13 = vweird.f32 %v1753_v62 }
 0x5bb   :  { %v1717_v59 = vsub.f32 1.0, %v1716_v40  ;;  %vm1741_vm9 = vmor %vm1739_vm7, %vm1740_vm5  ;;  %v1763_v41 = vand.u32 2147483647, %v1753_v62  ;;  %v1766_v58 = vor.u32 1.1754944e-38, %v1765_v55 }
 0x5bc   :  { %v1736_v19 = vsub.f32 1.0, %v1735_v36 }
 0x5bd   :  { %v1718_v6 = vmul.f32 %v2114_v60, %v1717_v59  ;;  %vm1764_vm15 = vcmp.eq.f32.partialorder %v1763_v41, 8.507059e+37 }
 0x5be   :  { %v1737_v44 = vmul.f32 %v2116_v2, %v1736_v19 }
 0x5bf   :  { %v2118_v21 = vpop.eup %2117  ;;  %v1719_v29 = vadd.f32 %v2114_v60, %v1718_v6 }
 0x5c0   :  { %v1738_v57 = vadd.f32 %v2116_v2, %v1737_v44  ;;  %v1755_v4 = vmul.f32 %v2118_v21, %v1753_v62  ;;  %v2120_v11 = vpop.eup %2119  ;;  %vm1760_vm12 = vweird.f32 %v2118_v21 }
 0x5c1   :  { %v1723_v10 = vsel %vm1722_vm8, %v2114_v60, %v1719_v29  ;;  %vm1761_vm14 = vmor %vm1759_vm13, %vm1760_vm12 }
 0x5c2   :  { %v1728_v8 = vsel %vm1725_vm10, %v1727_v38, %v1723_v10  ;;  %v1742_v33 = vsel %vm1741_vm9, %v2116_v2, %v1738_v57  ;;  %v1756_v17 = vsub.f32 1.0, %v1755_v4 }
 0x5c3   :  { %v1747_v27 = vsel %vm1744_vm11, %v1746_v52, %v1742_v33  ;;  %v1770_v16 = vmul.f32 %v2120_v11, %v1728_v8 }
 0x5c4   :  { %v1769_v9 = vmul.f32 %v1747_v27, %v4211_v22  ;;  %v1757_v34 = vmul.f32 %v2118_v21, %v1756_v17  ;;  %v1994_v22 = vld [vmem:[%s4491_s0] ss:$0 sm:$0xff] }
 0x5c6   :  { %v1771_v37 = vadd.f32 %v1770_v16, %v1769_v9  ;;  %v1758_v46 = vadd.f32 %v2118_v21, %v1757_v34 }
 0x5c8   :  { %2121 = vtanh.f32 %v1771_v37  ;;  %v1762_v12 = vsel %vm1761_vm14, %v2118_v21, %v1758_v46 }
 0x5c9   :  { %v1767_v48 = vsel %vm1764_vm15, %v1766_v58, %v1762_v12 }
 0x5ce   :  { %v2122_v63 = vpop.eup %2121 }
 0x5cf   :  { %v1773_v51 = vmul.f32 %v2122_v63, %v1767_v48 }
 0x5d1   :  { %1810 = vmatmul.f32.vlgmr.msrb.gmra.mxu0 %v1773_v51 }
 0x64e   :  { %v1811_v5 = vpop.f32.mrf.mxu0 }
 0x64f   :  { %v1812_v26 = vadd.f32 %v1994_v22, %v1811_v5 }
 0x651   :  { %1814 = vmax.xlane.f32.xlu0 %v1812_v26 }
 0x6c4   :  { %v1815_v28 = vpop.xlane.xlu0 %1814 }
 0x6c5   :  { %v1816_v0 = vsub.f32 %v1812_v26, %v1815_v28 }
 0x6c7   :  { %v1817_v45 = vmul.f32 1.442695, %v1816_v0 }
 0x6c9   :  { %2123 = vpow2.f32 %v1817_v45 }
 0x6cf   :  { %v2124_v49 = vpop.eup %2123 }
 0x6d0   :  { %1819 = vadd.xlane.f32.xlu0 %v2124_v49 }
 0x743   :  { %v1820_v50 = vpop.xlane.xlu0 %1819 }
 0x744   :  { %2125 = vrcp.f32 %v1820_v50  ;;  %v1832_v39 = vand.u32 2147483648, %v1820_v50  ;;  %v1830_v61 = vand.u32 2147483647, %v1820_v50  ;;  %vm1826_vm1 = vweird.f32 %v1820_v50 }
 0x746   :  { %v1833_v42 = vor.u32 1.1754944e-38, %v1832_v39  ;;  %vm1831_vm3 = vcmp.eq.f32.partialorder %v1830_v61, 8.507059e+37 }
 0x74a   :  { %v2126_v54 = vpop.eup %2125 }
 0x74b   :  { %v1822_v56 = vmul.f32 %v2126_v54, %v1820_v50  ;;  %vm1827_vm0 = vweird.f32 %v2126_v54 }
 0x74c   :  { %vm1828_vm2 = vmor %vm1826_vm1, %vm1827_vm0 }
 0x74d   :  { %v1823_v1 = vsub.f32 1.0, %v1822_v56 }
 0x74f   :  { %v1824_v24 = vmul.f32 %v2126_v54, %v1823_v1 }
 0x751   :  { %v1825_v14 = vadd.f32 %v2126_v54, %v1824_v24 }
 0x753   :  { %v1829_v43 = vsel %vm1828_vm2, %v2126_v54, %v1825_v14 }
 0x754   :  { %v1834_v18 = vsel %vm1831_vm3, %v1833_v42, %v1829_v43 }
 0x755   :  { %v1835_v20 = vmul.f32 %v2124_v49, %v1834_v18 }
 0x757   :  { %1836 = vst [vmem:[%s4492_s29] sm:$0xff] %v1835_v20 }

</bundles_post_ra>
